<compile_context>
chip_gen: v7x
topology: tpu7x:2x2x1
jax: 0.10.0
libtpu: 0.0.40
codegen_flags: <defaults>
</compile_context>

<pallas_src>
import functools

import jax
import jax.numpy as jnp
from jax.experimental import pallas as pl
from jax.experimental.pallas import tpu as pltpu


def _bottleneck_kernel(x_ref, w1_ref, b1_ref, w2_ref, b2_ref, w3_ref, b3_ref,
                       o_ref, *, H, W, TH, Cp, Pp, Co):
    """Grid step (n, hb): one batch element, TH output rows.

    x_ref : (H+2, W, Cp)  bf16  pre-padded input (1 zero row top/bottom,
                                 channels zero-padded to Cp)
    w1_ref: (Cp, Pp)      bf16  1x1 conv weight, BN1 scale folded, zero-padded
    w2_ref: (9*Pp, Pp)    bf16  3x3 conv weight (im2col layout), BN2 folded
    w3_ref: (Pp, Co)      bf16  1x1 conv weight, BN3 scale folded, zero-padded
    b*_ref: (1, C)        f32   folded BN biases (zero in padded lanes)
    o_ref : (TH, W, Co)   f32   output row tile (channels zero in padded lanes)
    """
    hb = pl.program_id(1)
    row0 = pl.multiple_of(hb * TH, TH)

    # ---- halo slice: TH + 2 pre-padded rows in one contiguous read ----------
    xb = x_ref[pl.ds(row0, TH + 2)]                         # (TH+2, W, Cp) bf16

    # ---- conv1 (1x1, BN scale folded) + bias + relu  [bf16 MXU, f32 acc] -----
    h1 = jnp.dot(xb.reshape((TH + 2) * W, Cp), w1_ref[...],
                 preferred_element_type=jnp.float32)
    h1 = jnp.maximum(h1 + b1_ref[...], 0.0)                 # ((TH+2)*W, Pp)

    # Rows outside the image must contribute exact zeros to conv2 (its zero
    # padding applies to the conv1+BN+ReLU output, not relu(b1)).
    grow = (row0 - 1) + jax.lax.broadcasted_iota(jnp.int32, (TH + 2, 1), 0)
    valid = jnp.logical_and(grow >= 0, grow < H)            # (TH+2, 1)
    h1_img = h1.reshape(TH + 2, W, Pp)
    h1b = jnp.where(valid[:, :, None], h1_img, 0.0).astype(jnp.bfloat16)

    # ---- conv2 (3x3, stride 1, pad 1) as a single lane-aligned im2col matmul -
    zcol = jnp.zeros((TH + 2, 1, Pp), jnp.bfloat16)
    padded = jnp.concatenate([zcol, h1b, zcol], axis=1)     # (TH+2, W+2, Pp)
    windows = [padded[dh:dh + TH, dw:dw + W, :]
               for dh in range(3) for dw in range(3)]
    cols = jnp.concatenate(windows, axis=-1).reshape(TH * W, 9 * Pp)
    h2 = jnp.dot(cols, w2_ref[...], preferred_element_type=jnp.float32)
    h2 = jnp.maximum(h2 + b2_ref[...], 0.0)                 # (TH*W, Pp)

    # ---- conv3 (1x1, BN scale folded) + bias ---------------------------------
    h3 = jnp.dot(h2.astype(jnp.bfloat16), w3_ref[...],
                 preferred_element_type=jnp.float32)        # (TH*W, Co)
    h3 = h3 + b3_ref[...]

    # ---- residual (identity path) + final relu (f32) -------------------------
    res = x_ref[pl.ds(row0 + 1, TH)].astype(jnp.float32).reshape(TH * W, Co)
    out = jnp.maximum(h3 + res, 0.0)
    o_ref[...] = out.reshape(TH, W, Co).astype(o_ref.dtype)


def _fold_bn(gamma, beta, mean, var, eps=1e-5):
    scale = gamma / jnp.sqrt(var + eps)
    bias = beta - mean * scale
    return scale, bias


def _round_up(v, m):
    return ((v + m - 1) // m) * m


def _pick_th(H, W, Pp):
    """Largest divisor of H keeping the per-step im2col buffer <= ~8 MiB."""
    max_rows = max(1, (8 * 1024 * 1024) // max(1, W * 9 * Pp * 2))
    th = 1
    for d in range(1, H + 1):
        if H % d == 0 and d <= max_rows:
            th = d
    return th


def bottleneck_forward_nhwc(x, params):
    """x: (N, H, W, Cin) NHWC. Returns (N, H, W, Cin) f32."""
    N, H, W, Cin = x.shape
    P = params["w1"].shape[1]
    Cout = 4 * P
    assert Cout == Cin, "identity skip requires in_planes == 4*planes"

    s1, b1 = _fold_bn(params["bn1_g"], params["bn1_b"], params["bn1_m"], params["bn1_v"])
    s2, b2 = _fold_bn(params["bn2_g"], params["bn2_b"], params["bn2_m"], params["bn2_v"])
    s3, b3 = _fold_bn(params["bn3_g"], params["bn3_b"], params["bn3_m"], params["bn3_v"])

    # Lane-aligned (multiple-of-128) channel dims; padded weight rows/cols are
    # zero so the padded lanes carry exact zeros end-to-end.
    Cp = _round_up(Cin, 128)
    Pp = _round_up(P, 128)
    Co = _round_up(Cout, 128)
    assert Cp == Co  # identity skip: padded residual matches padded output

    w1e = (jnp.zeros((Cp, Pp), jnp.float32)
           .at[:Cin, :P].set(params["w1"] * s1).astype(jnp.bfloat16))
    w2e = (jnp.zeros((3, 3, Pp, Pp), jnp.float32)
           .at[:, :, :P, :P].set(params["w2"] * s2)
           .reshape(9 * Pp, Pp).astype(jnp.bfloat16))
    w3e = (jnp.zeros((Pp, Co), jnp.float32)
           .at[:P, :Cout].set(params["w3"] * s3).astype(jnp.bfloat16))
    b1e = jnp.zeros((1, Pp), jnp.float32).at[0, :P].set(b1)
    b2e = jnp.zeros((1, Pp), jnp.float32).at[0, :P].set(b2)
    b3e = jnp.zeros((1, Co), jnp.float32).at[0, :Cout].set(b3)

    # bf16 activations, one zero halo row top+bottom, zero channel padding.
    xp = jnp.zeros((N, H + 2, W, Cp), jnp.bfloat16)
    xp = xp.at[:, 1:H + 1, :, :Cin].set(x.astype(jnp.bfloat16))

    TH = _pick_th(H, W, Pp)
    nb = H // TH

    def full(arr):
        return pl.BlockSpec(arr.shape, lambda n, hb: (0,) * arr.ndim)

    kernel = functools.partial(_bottleneck_kernel, H=H, W=W, TH=TH,
                               Cp=Cp, Pp=Pp, Co=Co)
    # Batch axis parallel for dual-TC chips; when N == 1 parallelize the row
    # axis instead so both TensorCores are used.
    dims = ("parallel", "arbitrary") if N > 1 else ("arbitrary", "parallel")
    out = pl.pallas_call(
        kernel,
        out_shape=jax.ShapeDtypeStruct((N, H, W, Co), jnp.float32),
        grid=(N, nb),
        in_specs=[
            # Input block constant across hb -> DMA'd once per batch element.
            pl.BlockSpec((None, H + 2, W, Cp), lambda n, hb: (n, 0, 0, 0)),
            full(w1e), full(b1e), full(w2e), full(b2e), full(w3e), full(b3e),
        ],
        out_specs=pl.BlockSpec((None, TH, W, Co), lambda n, hb: (n, hb, 0, 0)),
        compiler_params=pltpu.CompilerParams(
            dimension_semantics=dims,
            vmem_limit_bytes=48 * 1024 * 1024),
    )(xp, w1e, b1e, w2e, b2e, w3e, b3e)

    if Co != Cout:
        out = out[..., :Cout]
    return out


def bottleneck_forward(x_nchw, params):
    """PyTorch-compatible NCHW entry point.

    NOTE: production networks should stay NHWC end-to-end; these two transposes
    each cost a full read+write of the activation tensor in HBM.
    """
    x = jnp.transpose(x_nchw, (0, 2, 3, 1))
    out = bottleneck_forward_nhwc(x, params)
    return jnp.transpose(out, (0, 3, 1, 2))


def _reference_forward(x_nchw, params):
    """Pure-JAX f32 reference (lax.conv) for correctness check."""
    x = jnp.transpose(x_nchw, (0, 2, 3, 1)).astype(jnp.float32)
    dn = ("NHWC", "HWIO", "NHWC")

    def bn(h, g, b, m, v, eps=1e-5):
        return (h - m) / jnp.sqrt(v + eps) * g + b

    P = params["w1"].shape[1]
    w1 = params["w1"].reshape(1, 1, -1, P)
    w3 = params["w3"].reshape(1, 1, P, 4 * P)

    h = jax.lax.conv_general_dilated(x, w1, (1, 1), "VALID", dimension_numbers=dn)
    h = jnp.maximum(bn(h, params["bn1_g"], params["bn1_b"], params["bn1_m"], params["bn1_v"]), 0)
    h = jax.lax.conv_general_dilated(h, params["w2"], (1, 1), "SAME", dimension_numbers=dn)
    h = jnp.maximum(bn(h, params["bn2_g"], params["bn2_b"], params["bn2_m"], params["bn2_v"]), 0)
    h = jax.lax.conv_general_dilated(h, w3, (1, 1), "VALID", dimension_numbers=dn)
    h = bn(h, params["bn3_g"], params["bn3_b"], params["bn3_m"], params["bn3_v"])
    h = jnp.maximum(h + x, 0)
    return jnp.transpose(h, (0, 3, 1, 2))


def make_params(key, in_planes, planes):
    ks = jax.random.split(key, 9)
    f32 = jnp.float32
    return {
        "w1": 0.1 * jax.random.normal(ks[0], (in_planes, planes), f32),
        "w2": 0.1 * jax.random.normal(ks[1], (3, 3, planes, planes), f32),
        "w3": 0.1 * jax.random.normal(ks[2], (planes, 4 * planes), f32),
        "bn1_g": 1.0 + 0.1 * jax.random.normal(ks[3], (planes,), f32),
        "bn1_b": 0.1 * jax.random.normal(ks[4], (planes,), f32),
        "bn1_m": 0.05 * jnp.arange(planes, dtype=f32),
        "bn1_v": jnp.ones((planes,), f32) * 1.5,
        "bn2_g": 1.0 + 0.1 * jax.random.normal(ks[5], (planes,), f32),
        "bn2_b": 0.1 * jax.random.normal(ks[6], (planes,), f32),
        "bn2_m": -0.05 * jnp.arange(planes, dtype=f32),
        "bn2_v": jnp.ones((planes,), f32) * 0.8,
        "bn3_g": 1.0 + 0.1 * jax.random.normal(ks[7], (4 * planes,), f32),
        "bn3_b": 0.1 * jax.random.normal(ks[8], (4 * planes,), f32),
        "bn3_m": 0.02 * jnp.arange(4 * planes, dtype=f32),
        "bn3_v": jnp.ones((4 * planes,), f32) * 1.2,
    }


if __name__ == "__main__":
    key = jax.random.PRNGKey(0)
    k_x, k_p = jax.random.split(key)

    N, planes, H, W = 2, 4, 16, 16
    in_planes = 4 * planes  # identity skip requires in_planes == expansion*planes

    x = jax.random.normal(k_x, (N, in_planes, H, W), jnp.float32)
    params = make_params(k_p, in_planes, planes)

    out = bottleneck_forward(x, params)
    out = jax.block_until_ready(out)

    ref = _reference_forward(x, params)
    assert out.shape == (N, in_planes, H, W)
    # bf16 activations/weights on the MXU (f32 accumulation) vs. f32 reference:
    # tolerance covers bf16 rounding of inputs, weights and the residual path.
    max_diff = float(jnp.max(jnp.abs(out - ref)))
    assert jnp.allclose(out, ref, atol=3e-2, rtol=3e-2), (
        "mismatch vs. reference; max abs diff = %r" % max_diff)

    print("KERNEL_OK")
</pallas_src>

<mosaic_0001>
module attributes {stable_mosaic.version = 11 : i64} {
  func.func @_bottleneck_kernel(%arg0: i32, %arg1: i32, %arg2: memref<1x18x16x128xbf16, #tpu.memory_space<vmem>>, %arg3: memref<128x128xbf16, #tpu.memory_space<vmem>>, %arg4: memref<1x128xf32, #tpu.memory_space<vmem>>, %arg5: memref<1152x128xbf16, #tpu.memory_space<vmem>>, %arg6: memref<1x128xf32, #tpu.memory_space<vmem>>, %arg7: memref<128x128xbf16, #tpu.memory_space<vmem>>, %arg8: memref<1x128xf32, #tpu.memory_space<vmem>>, %arg9: memref<1x16x16x128xf32, #tpu.memory_space<vmem>>) attributes {dimension_semantics = [#tpu.dimension_semantics<parallel>, #tpu.dimension_semantics<arbitrary>], iteration_bounds = array<i64: 2, 1>, scalar_prefetch = 0 : i64, scratch_operands = 0 : i64, tpu.core_type = #tpu.core_type<tc>, window_params = [{transform_indices = @transform_0, window_bounds = array<i64: 1, 18, 16, 128>}, {pipeline_mode = #tpu.pipeline_mode<synchronous>, transform_indices = @transform_1, window_bounds = array<i64: 128, 128>}, {pipeline_mode = #tpu.pipeline_mode<synchronous>, transform_indices = @transform_2, window_bounds = array<i64: 1, 128>}, {pipeline_mode = #tpu.pipeline_mode<synchronous>, transform_indices = @transform_3, window_bounds = array<i64: 1152, 128>}, {pipeline_mode = #tpu.pipeline_mode<synchronous>, transform_indices = @transform_4, window_bounds = array<i64: 1, 128>}, {pipeline_mode = #tpu.pipeline_mode<synchronous>, transform_indices = @transform_5, window_bounds = array<i64: 128, 128>}, {pipeline_mode = #tpu.pipeline_mode<synchronous>, transform_indices = @transform_6, window_bounds = array<i64: 1, 128>}, {transform_indices = @transform_7, window_bounds = array<i64: 1, 16, 16, 128>}]} {
    %c16_i32 = arith.constant 16 : i32
    %0 = arith.muli %arg1, %c16_i32 : i32
    %1 = tpu.assume_multiple %0, 16 : i32
    %c0 = arith.constant 0 : index
    %2 = arith.index_cast %1 : i32 to index
    %c0_0 = arith.constant 0 : index
    %c0_1 = arith.constant 0 : index
    %3 = vector.load %arg2[%c0, %2, %c0_0, %c0_1] : memref<1x18x16x128xbf16, #tpu.memory_space<vmem>>, vector<1x18x16x128xbf16>
    %4 = vector.shape_cast %3 : vector<1x18x16x128xbf16> to vector<18x16x128xbf16>
    %5 = vector.shape_cast %4 : vector<18x16x128xbf16> to vector<288x128xbf16>
    %c0_2 = arith.constant 0 : index
    %c0_3 = arith.constant 0 : index
    %6 = vector.load %arg3[%c0_2, %c0_3] : memref<128x128xbf16, #tpu.memory_space<vmem>>, vector<128x128xbf16>
    %cst = arith.constant dense<0.000000e+00> : vector<288x128xf32>
    %7 = tpu.matmul %5, %6, %cst {dimension_numbers = #tpu.dot_dimension_numbers<[1], [0], [0], [1], [0, 0, 1, 1], [], []>} : vector<288x128xbf16>, vector<128x128xbf16>, vector<288x128xf32> -> vector<288x128xf32>
    %c0_4 = arith.constant 0 : index
    %c0_5 = arith.constant 0 : index
    %8 = vector.load %arg4[%c0_4, %c0_5] : memref<1x128xf32, #tpu.memory_space<vmem>>, vector<1x128xf32>
    %9 = vector.broadcast %8 : vector<1x128xf32> to vector<288x128xf32>
    %10 = arith.addf %7, %9 : vector<288x128xf32>
    %cst_6 = arith.constant 0.000000e+00 : f32
    %11 = vector.broadcast %cst_6 : f32 to vector<288x128xf32>
    %12 = arith.maximumf %10, %11 : vector<288x128xf32>
    %c1_i32 = arith.constant 1 : i32
    %13 = arith.subi %1, %c1_i32 : i32
    %14 = tpu.iota {dimensions = array<i32: 0>} : vector<18x1xi32>
    %15 = vector.broadcast %13 : i32 to vector<18x1xi32>
    %16 = arith.addi %15, %14 : vector<18x1xi32>
    %c0_i32 = arith.constant 0 : i32
    %17 = vector.broadcast %c0_i32 : i32 to vector<18x1xi32>
    %18 = arith.cmpi sge, %16, %17 : vector<18x1xi32>
    %c16_i32_7 = arith.constant 16 : i32
    %19 = vector.broadcast %c16_i32_7 : i32 to vector<18x1xi32>
    %20 = arith.cmpi slt, %16, %19 : vector<18x1xi32>
    %21 = arith.andi %18, %20 : vector<18x1xi1>
    %22 = vector.shape_cast %12 : vector<288x128xf32> to vector<18x16x128xf32>
    %23 = vector.shape_cast %21 : vector<18x1xi1> to vector<18x1x1xi1>
    %cst_8 = arith.constant 0.000000e+00 : f32
    %24 = vector.shape_cast %23 : vector<18x1x1xi1> to vector<18x1x1xi1>
    %25 = vector.broadcast %24 : vector<18x1x1xi1> to vector<18x16x128xi1>
    %26 = vector.broadcast %cst_8 : f32 to vector<18x16x128xf32>
    %27 = arith.select %25, %22, %26 : vector<18x16x128xi1>, vector<18x16x128xf32>
    %28 = arith.truncf %27 : vector<18x16x128xf32> to vector<18x16x128xbf16>
    %cst_9 = arith.constant 0.000000e+00 : bf16
    %29 = vector.broadcast %cst_9 : bf16 to vector<18x1x128xbf16>
    %30 = tpu.concatenate %29, %28, %29 in 1 : vector<18x1x128xbf16>, vector<18x16x128xbf16>, vector<18x1x128xbf16> -> vector<18x18x128xbf16>
    %31 = vector.extract_strided_slice %30 {offsets = [0, 0, 0], sizes = [16, 16, 128], strides = [1, 1, 1]} : vector<18x18x128xbf16> to vector<16x16x128xbf16>
    %32 = vector.extract_strided_slice %30 {offsets = [0, 1, 0], sizes = [16, 16, 128], strides = [1, 1, 1]} : vector<18x18x128xbf16> to vector<16x16x128xbf16>
    %33 = vector.extract_strided_slice %30 {offsets = [0, 2, 0], sizes = [16, 16, 128], strides = [1, 1, 1]} : vector<18x18x128xbf16> to vector<16x16x128xbf16>
    %34 = vector.extract_strided_slice %30 {offsets = [1, 0, 0], sizes = [16, 16, 128], strides = [1, 1, 1]} : vector<18x18x128xbf16> to vector<16x16x128xbf16>
    %35 = vector.extract_strided_slice %30 {offsets = [1, 1, 0], sizes = [16, 16, 128], strides = [1, 1, 1]} : vector<18x18x128xbf16> to vector<16x16x128xbf16>
    %36 = vector.extract_strided_slice %30 {offsets = [1, 2, 0], sizes = [16, 16, 128], strides = [1, 1, 1]} : vector<18x18x128xbf16> to vector<16x16x128xbf16>
    %37 = vector.extract_strided_slice %30 {offsets = [2, 0, 0], sizes = [16, 16, 128], strides = [1, 1, 1]} : vector<18x18x128xbf16> to vector<16x16x128xbf16>
    %38 = vector.extract_strided_slice %30 {offsets = [2, 1, 0], sizes = [16, 16, 128], strides = [1, 1, 1]} : vector<18x18x128xbf16> to vector<16x16x128xbf16>
    %39 = vector.extract_strided_slice %30 {offsets = [2, 2, 0], sizes = [16, 16, 128], strides = [1, 1, 1]} : vector<18x18x128xbf16> to vector<16x16x128xbf16>
    %40 = tpu.concatenate %31, %32, %33, %34, %35, %36, %37, %38, %39 in 2 : vector<16x16x128xbf16>, vector<16x16x128xbf16>, vector<16x16x128xbf16>, vector<16x16x128xbf16>, vector<16x16x128xbf16>, vector<16x16x128xbf16>, vector<16x16x128xbf16>, vector<16x16x128xbf16>, vector<16x16x128xbf16> -> vector<16x16x1152xbf16>
    %41 = vector.shape_cast %40 : vector<16x16x1152xbf16> to vector<256x1152xbf16>
    %c0_10 = arith.constant 0 : index
    %c0_11 = arith.constant 0 : index
    %42 = vector.load %arg5[%c0_10, %c0_11] : memref<1152x128xbf16, #tpu.memory_space<vmem>>, vector<1152x128xbf16>
    %cst_12 = arith.constant dense<0.000000e+00> : vector<256x128xf32>
    %43 = tpu.matmul %41, %42, %cst_12 {dimension_numbers = #tpu.dot_dimension_numbers<[1], [0], [0], [1], [0, 0, 1, 1], [], []>} : vector<256x1152xbf16>, vector<1152x128xbf16>, vector<256x128xf32> -> vector<256x128xf32>
    %c0_13 = arith.constant 0 : index
    %c0_14 = arith.constant 0 : index
    %44 = vector.load %arg6[%c0_13, %c0_14] : memref<1x128xf32, #tpu.memory_space<vmem>>, vector<1x128xf32>
    %45 = vector.broadcast %44 : vector<1x128xf32> to vector<256x128xf32>
    %46 = arith.addf %43, %45 : vector<256x128xf32>
    %cst_15 = arith.constant 0.000000e+00 : f32
    %47 = vector.broadcast %cst_15 : f32 to vector<256x128xf32>
    %48 = arith.maximumf %46, %47 : vector<256x128xf32>
    %49 = arith.truncf %48 : vector<256x128xf32> to vector<256x128xbf16>
    %c0_16 = arith.constant 0 : index
    %c0_17 = arith.constant 0 : index
    %50 = vector.load %arg7[%c0_16, %c0_17] : memref<128x128xbf16, #tpu.memory_space<vmem>>, vector<128x128xbf16>
    %cst_18 = arith.constant dense<0.000000e+00> : vector<256x128xf32>
    %51 = tpu.matmul %49, %50, %cst_18 {dimension_numbers = #tpu.dot_dimension_numbers<[1], [0], [0], [1], [0, 0, 1, 1], [], []>} : vector<256x128xbf16>, vector<128x128xbf16>, vector<256x128xf32> -> vector<256x128xf32>
    %c0_19 = arith.constant 0 : index
    %c0_20 = arith.constant 0 : index
    %52 = vector.load %arg8[%c0_19, %c0_20] : memref<1x128xf32, #tpu.memory_space<vmem>>, vector<1x128xf32>
    %53 = vector.broadcast %52 : vector<1x128xf32> to vector<256x128xf32>
    %54 = arith.addf %51, %53 : vector<256x128xf32>
    %c1_i32_21 = arith.constant 1 : i32
    %55 = arith.addi %1, %c1_i32_21 : i32
    %c0_22 = arith.constant 0 : index
    %56 = arith.index_cast %55 : i32 to index
    %c0_23 = arith.constant 0 : index
    %c0_24 = arith.constant 0 : index
    %57 = vector.load %arg2[%c0_22, %56, %c0_23, %c0_24] : memref<1x18x16x128xbf16, #tpu.memory_space<vmem>>, vector<1x16x16x128xbf16>
    %58 = vector.shape_cast %57 : vector<1x16x16x128xbf16> to vector<16x16x128xbf16>
    %59 = arith.extf %58 : vector<16x16x128xbf16> to vector<16x16x128xf32>
    %60 = vector.shape_cast %59 : vector<16x16x128xf32> to vector<256x128xf32>
    %61 = arith.addf %54, %60 : vector<256x128xf32>
    %cst_25 = arith.constant 0.000000e+00 : f32
    %62 = vector.broadcast %cst_25 : f32 to vector<256x128xf32>
    %63 = arith.maximumf %61, %62 : vector<256x128xf32>
    %64 = vector.shape_cast %63 : vector<256x128xf32> to vector<16x16x128xf32>
    %c0_26 = arith.constant 0 : index
    %c0_27 = arith.constant 0 : index
    %c0_28 = arith.constant 0 : index
    %c0_29 = arith.constant 0 : index
    %65 = vector.load %arg9[%c0_26, %c0_27, %c0_28, %c0_29] : memref<1x16x16x128xf32, #tpu.memory_space<vmem>>, vector<1x16x16x128xf32>
    %66 = vector.shape_cast %65 : vector<1x16x16x128xf32> to vector<16x16x128xf32>
    %67 = vector.shape_cast %64 : vector<16x16x128xf32> to vector<1x16x16x128xf32>
    tpu.vector_store %arg9[%c0_26, %c0_27, %c0_28, %c0_29], %67 {strides = array<i32>} : memref<1x16x16x128xf32, #tpu.memory_space<vmem>>, vector<1x16x16x128xf32>,
    return
  }
  func.func @transform_0(%arg0: i32, %arg1: i32) -> (i32, i32, i32, i32) {
    %c0_i32 = arith.constant 0 : i32
    %c0_i32_0 = arith.constant 0 : i32
    %c0_i32_1 = arith.constant 0 : i32
    %c0_i32_2 = arith.constant 0 : i32
    return %arg0, %c0_i32, %c0_i32_0, %c0_i32_1 : i32, i32, i32, i32
  }
  func.func @transform_1(%arg0: i32, %arg1: i32) -> (i32, i32) {
    %c0_i32 = arith.constant 0 : i32
    %c0_i32_0 = arith.constant 0 : i32
    %c0_i32_1 = arith.constant 0 : i32
    return %c0_i32, %c0_i32_0 : i32, i32
  }
  func.func @transform_2(%arg0: i32, %arg1: i32) -> (i32, i32) {
    %c0_i32 = arith.constant 0 : i32
    %c0_i32_0 = arith.constant 0 : i32
    %c0_i32_1 = arith.constant 0 : i32
    return %c0_i32, %c0_i32_0 : i32, i32
  }
  func.func @transform_3(%arg0: i32, %arg1: i32) -> (i32, i32) {
    %c0_i32 = arith.constant 0 : i32
    %c0_i32_0 = arith.constant 0 : i32
    %c0_i32_1 = arith.constant 0 : i32
    return %c0_i32, %c0_i32_0 : i32, i32
  }
  func.func @transform_4(%arg0: i32, %arg1: i32) -> (i32, i32) {
    %c0_i32 = arith.constant 0 : i32
    %c0_i32_0 = arith.constant 0 : i32
    %c0_i32_1 = arith.constant 0 : i32
    return %c0_i32, %c0_i32_0 : i32, i32
  }
  func.func @transform_5(%arg0: i32, %arg1: i32) -> (i32, i32) {
    %c0_i32 = arith.constant 0 : i32
    %c0_i32_0 = arith.constant 0 : i32
    %c0_i32_1 = arith.constant 0 : i32
    return %c0_i32, %c0_i32_0 : i32, i32
  }
  func.func @transform_6(%arg0: i32, %arg1: i32) -> (i32, i32) {
    %c0_i32 = arith.constant 0 : i32
    %c0_i32_0 = arith.constant 0 : i32
    %c0_i32_1 = arith.constant 0 : i32
    return %c0_i32, %c0_i32_0 : i32, i32
  }
  func.func @transform_7(%arg0: i32, %arg1: i32) -> (i32, i32, i32, i32) {
    %c0_i32 = arith.constant 0 : i32
    %c0_i32_0 = arith.constant 0 : i32
    %c0_i32_1 = arith.constant 0 : i32
    return %arg0, %arg1, %c0_i32, %c0_i32_0 : i32, i32, i32, i32
  }
}

</mosaic_0001>

<bundles_post_ra>
// kernel: tpu_custom_call.1
= control target key start
LH: loop header
LB: loop body
LE: loop exit
PB: predicated region body
PF: predicated region fallthrough
CT: control target
= control target key end

     0   :  { %s6290_s0 = inlined_call_operand.hbm [shape: bf16[2,18,16,128], index: 0, kind: input, shape index: {}]   ;;  %s6291_s1 = inlined_call_operand.hbm [shape: bf16[128,128], index: 1, kind: input, shape index: {}]   ;;  %s6292_s2 = inlined_call_operand.vmem [shape: f32[1,128], index: 2, kind: input, shape index: {}]   ;;  %s6293_s3 = inlined_call_operand.hbm [shape: bf16[1152,128], index: 3, kind: input, shape index: {}]   ;;  %s6294_s4 = inlined_call_operand.vmem [shape: f32[1,128], index: 4, kind: input, shape index: {}]   ;;  %s6295_s5 = inlined_call_operand.hbm [shape: bf16[128,128], index: 5, kind: input, shape index: {}]   ;;  %s6296_s6 = inlined_call_operand.vmem [shape: f32[1,128], index: 6, kind: input, shape index: {}]   ;;  %s6297_s7 = inlined_call_operand.hbm [shape: f32[2,16,16,128], index: 7, kind: output, shape index: {}]  }
   0x1   :  { %6306 = sst [smem:[#allocation18_spill]] %s6297_s7 }
   0x2   :  { %12 = vsyncpa [#allocation3], 0 }
   0x3   :  { %14 = vsyncpa [#allocation3 + $0x1], 0 }
   0x4   :  { %15 = vsyncpa [#allocation6], 0 }
   0x5   :  { %16 = vsyncpa [#allocation9], 0 }
   0x6   :  { %17 = vsyncpa [#allocation4], 0 }
   0x7   :  { %19 = vsyncpa [#allocation4 + $0x1], 0  ;;  %s4894_s24 = smov 0   ;;  %s4896_s25 = smov 0  }
   0x8   :  { %s4898_s26 = smov 0   ;;  %s4900_s27 = smov 0  }
   0x9   :  { %s4902_s28 = smov 0   ;;  %s4904_s29 = smov 0  }
   0xa LB: > { %6307 = sst [smem:[#allocation15_spill]] %s4821_s24  ;;  %s3503_s30 = sadd.s32 4294967295, %s4841_s29   ;;  %s4841_s29 = sphi %s4904_s29, %s25_s29   ;;  %s4837_s28 = sphi %s4902_s28, %s6340_s28   ;;  %s4833_s27 = sphi %s4900_s27, %s6339_s27   ;;  %s4829_s26 = sphi %s4898_s26, %s6338_s26   ;;  %s4825_s25 = sphi %s4896_s25, %s6337_s25   ;;  %s4821_s24 = sphi %s4894_s24, %s6336_s24  }
   0xb   : > { %6308 = sst [smem:[#allocation16_spill]] %s4833_s27  ;;  %s3504_s8 = sadd.s32 4294967294, %s4841_s29  }
   0xc   : > { %p57_p0 = scmp.ne.s32.totalorder %s4825_s25, %s4821_s24  ;;  %p4928_p1 = scmp.eq.s32.totalorder %s3503_s30, 0 }
   0xd   : > { %p4932_p2 = scmp.eq.s32.totalorder %s3503_s30, 1  ;;  %p215_p3 = scmp.eq.s32.totalorder %s3504_s8, 1 }
   0xe   : > { %s6309_s9 = scalar_select %p4928_p1, 1, 0 }
   0xf   : > { %s6310_s10 = scalar_select %p4932_p2, 1, 0 }
  0x10   : > { %p4938_p4 = por %p4928_p1, %p57_p0  ;;  %p3505_p5 = scmp.ge.s32.totalorder %s4841_s29, 1 }
  0x11   : > { %p4943_p6 = por %p215_p3, %p57_p0  ;;  %p222_p7 = scmp.lt.s32.totalorder %s4841_s29, 3 }
  0x12   : > { %s6311_s11 = scalar_select %p4938_p4, 1, 0 }
  0x13   : > { %s6312_s12 = scalar_select %p4943_p6, 1, 0 }
  0x14   : > { %p4948_p8 = pnand %p3505_p5, %p222_p7  ;;  %s4843_s14 = smov [#allocation5]  }
  0x15   : > { %6313 = sst [smem:[#allocation17_spill]] %s6312_s12  ;;  %s234_s15 = sshll.u32 %s4843_s14, 4  ;;  %s4952_s15 = int_to_ptr.vmem [resolvable:$true] %s234_s15 }
  0x16   : > { %s6314_s13 = scalar_select %p4948_p8, 1, 0 }
  0x17   : > { %p4448_p9 = pneg %p4948_p8  ;;  %s4844_s17 = smov [#allocation7]  }
  0x18   : > { %s250_s18 = sshll.u32 %s4844_s17, 4  ;;  %s4845_s19 = smov [#allocation8]   ;;  %s4963_s18 = int_to_ptr.vmem [resolvable:$true] %s250_s18 }
  0x19   : > { %p4959_p11 = pnand %p4448_p9, %p4928_p1  ;;  %s4965_s20 = sshll.u32 %s4845_s19, 4  ;;  %s267_s20 = int_to_ptr.vmem [resolvable:$true] %s4965_s20 }
  0x1a   : > { %s4637_s23 = scalar_lea.hbm %s6291_s1, 1024 }
  0x1b   : > { %p4638_p12 = scmp.ne.s32.totalorder %s6291_s1, %s4637_s23  ;;  %p4975_p13 = pneg %p4959_p11 }
  0x1c   : > { %p4644_p5 = scmp.lt.u32.totalorder %s4637_s23, %s6291_s1 }
  0x1d   : > { %p4640_p0 = pnand %p4975_p13, %p4638_p12 }
  0x1f   : > { %p4641_p3 = pneg %p4640_p0 }
  0x21   : > { %p4646_p7 = pnand %p4644_p5, %p4641_p3 }
  0x23   : > { %4649 = shalt.err (!%p4646_p7)
}
  0x24   : > { %s4650_s21 = scalar_lea.vmem %s4952_s15, 1024  ;;  %p4658_p1 = scmp.lt.s32.totalorder %s4952_s15, %s4952_s15 }
  0x25   : > { %p4651_p9 = scmp.ne.s32.totalorder %s4952_s15, %s4650_s21  ;;  %p4659_p4 = scmp.lt.s32.totalorder %s4650_s21, %s4650_s21 }
  0x27   : > { %p4653_p10 = pnand %p4651_p9, %p4975_p13  ;;  %p4660_p12 = por %p4659_p4, %p4658_p1 }
  0x29   : > { %p4654_p6 = pneg %p4653_p10 }
  0x2b   : > { %p4661_p0 = pnand %p4660_p12, %p4654_p6 }
  0x2d   : > { %4664 = shalt.err (!%p4661_p0)
}
  0x2e   : > { %s6305_s22 = smov 64   ;;  %s4847_s23 = smov 4  }
  0x2f   : > { %4451 = dma.hbm_to_vmem [thread:$0]  (!%p4959_p11), %s6291_s1, 1024, %s4952_s15, [#allocation6], %s6305_s22, %s6305_s22, %s4847_s23  }
  0x30   : > { %s4665_s21 = scalar_lea.hbm %s6293_s3, 9216 }
  0x31   : > { %p4666_p1 = scmp.ne.s32.totalorder %s6293_s3, %s4665_s21  ;;  %p4672_p10 = scmp.lt.u32.totalorder %s4665_s21, %s6293_s3 }
  0x33   : > { %p4668_p4 = pnand %p4666_p1, %p4975_p13 }
  0x35   : > { %p4669_p6 = pneg %p4668_p4 }
  0x37   : > { %p4674_p3 = pnand %p4672_p10, %p4669_p6 }
  0x39   : > { %4677 = shalt.err (!%p4674_p3)
}
  0x3a   : > { %s4678_s15 = scalar_lea.vmem %s4963_s18, 9216  ;;  %p4686_p12 = scmp.lt.s32.totalorder %s4963_s18, %s4963_s18 }
  0x3b   : > { %p4679_p5 = scmp.ne.s32.totalorder %s4963_s18, %s4678_s15  ;;  %p4687_p0 = scmp.lt.s32.totalorder %s4678_s15, %s4678_s15 }
  0x3d   : > { %p4681_p7 = pnand %p4679_p5, %p4975_p13  ;;  %p4688_p1 = por %p4687_p0, %p4686_p12 }
  0x3f   : > { %p4682_p9 = pneg %p4681_p7 }
  0x41   : > { %p4689_p4 = pnand %p4688_p1, %p4682_p9 }
  0x43   : > { %4692 = shalt.err (!%p4689_p4)
}
  0x44   : > { %4454 = dma.hbm_to_vmem [thread:$0]  (!%p4959_p11), %s6293_s3, 9216, %s4963_s18, [#allocation6], %s6305_s22, %s6305_s22, %s4847_s23  }
  0x45   : > { %s4693_s30 = scalar_lea.hbm %s6295_s5, 1024 }
  0x46   : > { %p4694_p6 = scmp.ne.s32.totalorder %s6295_s5, %s4693_s30  ;;  %p4700_p5 = scmp.lt.u32.totalorder %s4693_s30, %s6295_s5 }
  0x48   : > { %p4696_p10 = pnand %p4694_p6, %p4975_p13 }
  0x4a   : > { %p4697_p3 = pneg %p4696_p10 }
  0x4c   : > { %p4702_p7 = pnand %p4700_p5, %p4697_p3 }
  0x4e   : > { %4705 = shalt.err (!%p4702_p7)
}
  0x4f   : > { %s4706_s15 = scalar_lea.vmem %s267_s20, 1024  ;;  %p4714_p1 = scmp.lt.s32.totalorder %s267_s20, %s267_s20 }
  0x50   : > { %p4707_p9 = scmp.ne.s32.totalorder %s267_s20, %s4706_s15  ;;  %p4715_p4 = scmp.lt.s32.totalorder %s4706_s15, %s4706_s15 }
  0x52   : > { %p4709_p12 = pnand %p4707_p9, %p4975_p13  ;;  %p4716_p8 = por %p4715_p4, %p4714_p1 }
  0x54   : > { %p4710_p0 = pneg %p4709_p12 }
  0x56   : > { %p4717_p2 = pnand %p4716_p8, %p4710_p0 }
  0x58   : > { %4720 = shalt.err (!%p4717_p2)
}
  0x59   : > { %4457 = dma.hbm_to_vmem [thread:$0]  (!%p4959_p11), %s6295_s5, 1024, %s267_s20, [#allocation9], %s6305_s22, %s6305_s22, %s4847_s23  }
  0x5a   : > { %s44_s14 = sadd.s32 1, %s4829_s26  ;;  %s37_s16 = sadd.s32 1, %s4837_s28 }
  0x5b   : > { %p51_p2 = scmp.ne.s32.totalorder %s4829_s26, %s4825_s25  ;;  %p39_p8 = scmp.ge.s32.totalorder %s37_s16, 2 }
  0x5c   : > { %p52_p13 = scmp.eq.s32.totalorder %s4841_s29, 0  ;;  %p6317_p6 = scmp.ne.s32.totalorder %s6310_s10, 0 }
  0x5d   : > { %p4469_p3 = scmp.lt.s32.totalorder %s4841_s29, 2  ;;  %s6342_s16 = smov (%p39_p8, %s37_s16), 0 }
  0x5e   : > { %p5054_p10 = por %p6317_p6, %p51_p2  ;;  %p53_p5 = por %p52_p13, %p51_p2 }
  0x5f   : > { %s283_s27 = sand.u32 1, %s4829_s26   ;;  %s41_s12 = ssub.s32 %s4837_s28, %s6342_s16 }
  0x60   : > { %p42_p7 = scmp.eq.s32.totalorder %s41_s12, 0  ;;  %s4429_s20 = smul.u32 144, %s283_s27 }
  0x61   : > { %s4430_s30 = smul.u32 2304, %s4837_s28  ;;  %p5065_p11 = pnand %p4469_p3, %p53_p5 }
  0x62   : > { %s5070_s10 = scalar_select %p42_p7, %s4829_s26, %s44_s14  }
  0x63   : > { %s5075_s21 = scalar_lea.hbm %s6290_s0, %s4430_s30  ;;  %s287_s15 = scalar_lea.vmem [#allocation2], %s4429_s20 }
  0x64   : > { %s294_s18 = sshll.u32 %s287_s15, 4  ;;  %s5079_s7 = scalar_lea.sflag [#allocation3], %s283_s27  ;;  %s5077_s18 = int_to_ptr.vmem [resolvable:$true] %s294_s18 }
  0x65   : > { %s4721_s12 = scalar_lea.hbm %s5075_s21, 2304  ;;  %p4723_p12 = pneg %p5065_p11 }
  0x66   : > { %p4722_p9 = scmp.ne.s32.totalorder %s5075_s21, %s4721_s12  ;;  %s4726_s17 = scalar_lea.hbm %s6290_s0, 4608 }
  0x67   : > { %p4727_p4 = scmp.lt.u32.totalorder %s5075_s21, %s6290_s0  ;;  %p4728_p2 = scmp.lt.u32.totalorder %s4726_s17, %s4721_s12 }
  0x68   : > { %p4724_p0 = pnand %p4723_p12, %p4722_p9  ;;  %p4730_p13 = scmp.lt.u32.totalorder %s4721_s12, %s5075_s21 }
  0x69   : > { %p4729_p8 = por %p4728_p2, %p4727_p4 }
  0x6a   : > { %p4725_p1 = pneg %p4724_p0 }
  0x6b   : > { %p4731_p6 = por %p4730_p13, %p4729_p8 }
  0x6d   : > { %p4732_p3 = pnand %p4731_p6, %p4725_p1 }
  0x6f   : > { %4735 = shalt.err (!%p4732_p3)
}
  0x70   : > { %s4736_s27 = scalar_lea.vmem %s5077_s18, 2304  ;;  %s4848_s20 = smov [#allocation2]  }
  0x71   : > { %p4737_p5 = scmp.ne.s32.totalorder %s5077_s18, %s4736_s27  ;;  %s4741_s15 = sshll.u32 %s4848_s20, 4  ;;  %s4742_s15 = int_to_ptr.vmem [resolvable:$false] %s4741_s15 }
  0x72   : > { %s4743_s22 = scalar_lea.vmem %s4742_s15, 4608  ;;  %p4744_p0 = scmp.lt.s32.totalorder %s5077_s18, %s4742_s15 }
  0x73   : > { %p4739_p7 = pnand %p4737_p5, %p4723_p12  ;;  %p4745_p4 = scmp.lt.s32.totalorder %s4743_s22, %s4736_s27 }
  0x75   : > { %p4740_p9 = pneg %p4739_p7  ;;  %p4746_p2 = por %p4745_p4, %p4744_p0 }
  0x77   : > { %p4747_p8 = pnand %p4746_p2, %p4740_p9 }
  0x79   : > { %4750 = shalt.err (!%p4747_p8)
}
  0x7a   : > { %s6320_s12 = smov 64   ;;  %p6321_p12 = scmp.ne.s32.totalorder %s6314_s13, 0 }
  0x7b   : > { %4461 = dma.hbm_to_vmem [thread:$0]  (!%p5065_p11), %s5075_s21, 2304, %s5077_s18, %s5079_s7, %s6320_s12, %s6320_s12, %s4847_s23  }
  0x7c   : > { %306 = sbr.rel (%p6321_p12) target bundleno = 1172 (0x494), region = 48  ;;  %s5113_s14 = sand.u32 (!%p6321_p12), 1, %s4825_s25  }
  0x7d   : > { %s4431_s30 = smul.u32 (!%p6321_p12), 144, %s5113_s14  ;;  %s309_s17 = scalar_lea.sflag (!%p6321_p12), [#allocation3], %s5113_s14 }
  0x7e   : > { %p6322_p1 = scmp.ne.s32.totalorder (!%p6321_p12), %s6311_s11, 0 }
  0x7f   : > { %s5117_s19 = scalar_lea.vmem (!%p6321_p12), [#allocation2], %s4431_s30 }
  0x83   : > { %4804 = dma.done.wait (%p6322_p1), %s309_s17, 2304  }
  0x84   : > { %4806 = vsyncadd (%p6322_p1), %s309_s17, 4294964992  ;;  %p6323_p11 = scmp.ne.s32.totalorder %s6309_s9, 0 }
  0x86   : > { %4808 = dma.done.wait (%p6323_p11), [#allocation6], 10240  }
  0x87   : > { %4810 = vsyncadd (%p6323_p11), [#allocation6], 4294957056 }
  0x88   : > { %4812 = dma.done.wait (%p6323_p11), [#allocation9], 1024  }
  0x89   : > { %4814 = vsyncadd (%p6323_p11), [#allocation9], 4294966272  ;;  %v4531_v0 = vld [vmem:[#allocation5] sm:$0xff]   ;;  %v4532_v1 = vld [vmem:[#allocation5 + $0x8] sm:$0xff]   ;;  %v790_v60 = vlaneseq  ;;  %vm1152_vm3 = vcmask 1040384   ;;  %vm1432_vm7 = vcmask 1046528  }
  0x8a   : > { %4265 = vmatprep.subr.bf16.mxu0 %v4531_v0  ;;  %v4533_v2 = vld [vmem:[#allocation5 + $0x10] sm:$0xff]   ;;  %v4534_v3 = vld [vmem:[#allocation5 + $0x18] sm:$0xff]   ;;  %v4535_v5 = vld [vmem:[#allocation5 + $0x20] sm:$0xff]   ;;  %vm1153_vm4 = vsmask.f32 256  ;;  %s3515_s18 = sshll.u32 %s5113_s14, 8 }
  0x8b   : > { %4266 = vmatpush3.bf16.msra.mxu0 %v4531_v0  ;;  %v4539_v4 = vld [vmem:[%s5117_s19] sm:$0xff]   ;;  %v4536_v6 = vld [vmem:[#allocation5 + $0x28] sm:$0xff]   ;;  %v4538_v8 = vld [vmem:[#allocation5 + $0x38] sm:$0xff]   ;;  %v5149_v61 = vshrl.u32 %v790_v60, 7  ;;  %v4849_v0 = vmov 0   ;;  %s6160_s7 = scalar_lea.vmem [#allocation10], %s3515_s18 }
  0x8c   : > { %4267 = vmatprep.subr.bf16.mxu0 %v4532_v1  ;;  %4281 = vmatprep.mubr.bf16.mxu0 %v4539_v4  ;;  %v4537_v7 = vld [vmem:[#allocation5 + $0x30] sm:$0xff]   ;;  %v4557_v9 = vld [vmem:[#allocation7 + $0xc0] sm:$0xff]   ;;  %v4540_v10 = vld [vmem:[%s5117_s19 + $0x8] sm:$0xff]   ;;  %vm1191_vm11 = vsmask.f32 7424  ;;  %s6330_s27 = sld [smem:[#allocation16_spill]] }
  0x8d   : > { %v4541_v11 = vld [vmem:[%s5117_s19 + $0x10] sm:$0xff]   ;;  %v4559_v13 = vld [vmem:[#allocation7 + $0xc8] sm:$0xff]   ;;  %v4543_v17 = vld [vmem:[%s5117_s19 + $0x20] sm:$0xff]   ;;  %v795_v62 = vadd.s32 4294967295, %v5149_v61  ;;  %v5153_v63 = vsub.s32 1, %v5149_v61  ;;  %v824_v4 = vsub.s32 3, %v5149_v61 }
  0x8e   : > { %v4558_v12 = vld [vmem:[#allocation7 + $0x80] sm:$0xff]   ;;  %v4560_v14 = vld [vmem:[#allocation7 + $0x88] sm:$0xff]   ;;  %v4561_v16 = vld [vmem:[#allocation7 + $0xd0] sm:$0xff]   ;;  %s3384_s15 = sshll.u32 %s6160_s7, 4  ;;  %s6331_s30 = sld [smem:[#allocation18_spill]]  ;;  %s6238_s15 = int_to_ptr.vmem [resolvable:$true] %s3384_s15 }
  0x8f   : > { %4268 = vmatpush3.bf16.msra.mxu0 %v4532_v1  ;;  %v4542_v15 = vld [vmem:[%s5117_s19 + $0x18] sm:$0xff]   ;;  %v4562_v18 = vld [vmem:[#allocation7 + $0x90] sm:$0xff]   ;;  %v4568_v19 = vld [vmem:[#allocation7 + $0x40] sm:$0xff]   ;;  %vm798_vm0 = vcmp.ge.s32.totalorder %v795_v62, 0  ;;  %s4751_s9 = scalar_lea.vmem %s6238_s15, 4096  ;;  %s4851_s11 = smov [#allocation10]  }
  0x90   : > { %4269 = vmatprep.subr.bf16.mxu0 %v4533_v2  ;;  %v4563_v20 = vld [vmem:[#allocation7 + $0xd8] sm:$0xff]   ;;  %3769 = vmatprep.subr.bf16.mxu1 %v4568_v19  ;;  %v4570_v21 = vld [vmem:[#allocation7] sm:$0xff]   ;;  %v4571_v22 = vld [vmem:[#allocation7 + $0x48] sm:$0xff]   ;;  %v5156_v1 = vsel %vm798_vm0, 1, %v4849_v0  ;;  %p4752_p13 = scmp.ne.s32.totalorder %s6238_s15, %s4751_s9  ;;  %s4755_s13 = sshll.u32 %s4851_s11, 4  ;;  %s4756_s13 = int_to_ptr.vmem [resolvable:$false] %s4755_s13 }
  0x91   : > { %v4564_v23 = vld [vmem:[#allocation7 + $0x98] sm:$0xff]   ;;  %3770 = vmatpush3.bf16.msra.mxu1 %v4570_v21  ;;  %v4572_v24 = vld [vmem:[#allocation7 + $0x8] sm:$0xff]   ;;  %v4565_v25 = vld [vmem:[#allocation7 + $0xe0] sm:$0xff]   ;;  %s4757_s23 = scalar_lea.vmem %s4756_s13, 8192  ;;  %p4758_p5 = scmp.lt.s32.totalorder %s6238_s15, %s4756_s13 }
  0x92   : > { %3771 = vmatprep.subr.bf16.mxu1 %v4571_v22  ;;  %v4544_v26 = vld [vmem:[%s5117_s19 + $0x28] sm:$0xff]   ;;  %v4545_v27 = vld [vmem:[%s5117_s19 + $0x30] sm:$0xff]   ;;  %v4546_v31 = vld [vmem:[%s5117_s19 + $0x38] sm:$0xff]   ;;  %v828_v22 = vsub.s32 4, %v5149_v61  ;;  %s3662_s20 = sshll.u32 %s6330_s27, 12  ;;  %p4753_p6 = pnand %p4752_p13, %p5054_p10 }
  0x93   : > { %4270 = vmatpush3.bf16.msra.mxu0 %v4533_v2  ;;  %v4566_v28 = vld [vmem:[#allocation7 + $0xa0] sm:$0xff]   ;;  %v4567_v29 = vld [vmem:[#allocation7 + $0xe8] sm:$0xff]   ;;  %v4573_v42 = vld [vmem:[#allocation7 + $0x50] sm:$0xff]   ;;  %v5159_v2 = vsub.s32 0, %v5149_v61  ;;  %p4759_p7 = scmp.lt.s32.totalorder %s4757_s23, %s4751_s9 }
  0x94   : > { %4271 = vmatprep.subr.bf16.mxu0 %v4534_v3  ;;  %v4569_v30 = vld [vmem:[#allocation7 + $0xa8] sm:$0xff]   ;;  %v4547_v32 = vld [vmem:[%s5117_s19 + $0x40] sm:$0xff]   ;;  %v4549_v34 = vld [vmem:[%s5117_s19 + $0x50] sm:$0xff]   ;;  %s6236_s17 = scalar_lea.hbm %s6331_s30, %s3662_s20  ;;  %p4754_p3 = pneg %p4753_p6 }
  0x95   : > { %3772 = vmatpush3.bf16.msra.mxu1 %v4572_v24  ;;  %v4548_v33 = vld [vmem:[%s5117_s19 + $0x48] sm:$0xff]   ;;  %v4550_v35 = vld [vmem:[%s5117_s19 + $0x58] sm:$0xff]   ;;  %v4551_v36 = vld [vmem:[%s5117_s19 + $0x60] sm:$0xff]   ;;  %p4760_p9 = por %p4759_p7, %p4758_p5 }
  0x96   : > { %v4552_v37 = vld [vmem:[%s5117_s19 + $0x68] sm:$0xff]   ;;  %v4553_v38 = vld [vmem:[%s5117_s19 + $0x70] sm:$0xff]   ;;  %v4554_v39 = vld [vmem:[%s5117_s19 + $0x78] sm:$0xff]   ;;  %3773 = vmatprep.subr.bf16.mxu1 %v4573_v42 }
  0x97   : > { %4272 = vmatpush3.bf16.msra.mxu0 %v4534_v3  ;;  %v4555_v40 = vld [vmem:[%s5117_s19 + $0x80] sm:$0xff]   ;;  %v4556_v41 = vld [vmem:[%s5117_s19 + $0x88] sm:$0xff]   ;;  %vm5202_vm9 = vmand %vm1152_vm3, %vm1153_vm4  ;;  %p4761_p0 = pnand %p4760_p9, %p4754_p3 }
  0x98   : > { %4273 = vmatprep.subr.bf16.mxu0 %v4535_v5  ;;  %v4575_v43 = vld [vmem:[#allocation7 + $0x10] sm:$0xff]   ;;  %v4577_v44 = vld [vmem:[#allocation7 + $0x58] sm:$0xff]   ;;  %v4579_v46 = vld [vmem:[#allocation7 + $0x60] sm:$0xff]  }
  0x99   : > { %3774 = vmatpush3.bf16.msra.mxu1 %v4575_v43  ;;  %v4578_v45 = vld [vmem:[#allocation7 + $0x18] sm:$0xff]   ;;  %v4580_v47 = vld [vmem:[#allocation7 + $0x20] sm:$0xff]   ;;  %v4574_v48 = vld [vmem:[#allocation7 + $0xf0] sm:$0xff]   ;;  %v836_v43 = vsub.s32 6, %v5149_v61 }
  0x9a   : > { %3775 = vmatprep.subr.bf16.mxu1 %v4577_v44  ;;  %v4576_v49 = vld [vmem:[#allocation7 + $0xb0] sm:$0xff]   ;;  %v4583_v50 = vld [vmem:[#allocation7 + $0x68] sm:$0xff]   ;;  %v4581_v52 = vld [vmem:[#allocation7 + $0xf8] sm:$0xff]  }
  0x9b   : > { %4274 = vmatpush3.bf16.msra.mxu0 %v4535_v5  ;;  %v4584_v51 = vld [vmem:[#allocation7 + $0x28] sm:$0xff]   ;;  %v4582_v53 = vld [vmem:[#allocation7 + $0xb8] sm:$0xff]   ;;  %v4585_v54 = vld [vmem:[#allocation7 + $0x70] sm:$0xff]  }
  0x9c   : > { %4275 = vmatprep.subr.bf16.mxu0 %v4536_v6  ;;  %v4586_v55 = vld [vmem:[#allocation7 + $0x30] sm:$0xff]   ;;  %v4589_v56 = vld [vmem:[#allocation7 + $0x78] sm:$0xff]   ;;  %v4587_v58 = vld [vmem:[#allocation7 + $0x1c0] sm:$0xff]  }
  0x9d   : > { %3776 = vmatpush3.bf16.msra.mxu1 %v4578_v45  ;;  %v4590_v57 = vld [vmem:[#allocation7 + $0x38] sm:$0xff]   ;;  %v4593_v59 = vld [vmem:[#allocation7 + $0x140] sm:$0xff]  }
  0x9e   : > { %3777 = vmatprep.subr.bf16.mxu1 %v4579_v46  ;;  %v5164_v3 = vld [vmem:[%s6292_s2] ss:$0 sm:$0xff] }
  0x9f   : > { %4276 = vmatpush3.bf16.msra.mxu0 %v4536_v6  ;;  %v817_v6 = vrot.slane %v5156_v1, %v5153_v63 }
  0xa0   : > { %4277 = vmatprep.subr.bf16.mxu0 %v4537_v7 }
  0xa1   : > { %3778 = vmatpush3.bf16.msra.mxu1 %v4580_v47  ;;  %vm883_vm1 = vcmp.ne.s32.totalorder %v817_v6, 0 }
  0xa2   : > { %3779 = vmatprep.subr.bf16.mxu1 %v4583_v50 }
  0xa3   : > { %4278 = vmatpush3.bf16.msra.mxu0 %v4537_v7  ;;  %v820_v7 = vsub.s32 2, %v5149_v61 }
  0xa4   : > { %4279 = vmatprep.subr.bf16.mxu0 %v4538_v8 }
  0xa5   : > { %3780 = vmatpush3.bf16.msra.mxu1 %v4584_v51 }
  0xa6   : > { %3781 = vmatprep.subr.bf16.mxu1 %v4585_v54 }
  0xa7   : > { %4280 = vmatpush3.bf16.msra.mxu0 %v4538_v8 }
  0xa8   : > { %3881 = vmatprep.subr.bf16.mxu0 %v4557_v9 }
  0xa9   : > { %3782 = vmatpush3.bf16.msra.mxu1 %v4586_v55 }
  0xaa   : > { %4282 = vmatmul.mubr.bf16.vlgmr.msra.gmra.mrb[0].mxu0 %v4540_v10  ;;  %3783 = vmatprep.subr.bf16.mxu1 %v4589_v56  ;;  %v813_v10 = vrot.slane %v5156_v1, %v5159_v2 }
  0xab   : > { %4285 = vmatprep.mubr.bf16.mxu0 %v4541_v11  ;;  %3882 = vmatpush3.bf16.msra.mxu0 %v4558_v12 }
  0xac   : > { %3883 = vmatprep.subr.bf16.mxu0 %v4559_v13  ;;  %v832_v13 = vsub.s32 5, %v5149_v61  ;;  %vm882_vm2 = vcmp.ne.s32.totalorder %v813_v10, 0 }
  0xad   : > { %3784 = vmatpush3.bf16.msra.mxu1 %v4590_v57 }
  0xae   : > { %3993 = vmatprep.subr.bf16.mxu1 %v4593_v59  ;;  %v5187_v24 = vrot.slane %v5156_v1, %v832_v13 }
  0xaf   : > { %3884 = vmatpush3.bf16.msra.mxu0 %v4560_v14 }
  0xb0   : > { %3885 = vmatprep.subr.bf16.mxu0 %v4561_v16  ;;  %vm887_vm8 = vcmp.ne.s32.totalorder %v5187_v24, 0 }
  0xb2   : > { %4286 = vmatmul.mubr.bf16.gmra.mrb[4].mxu0 %v4542_v15 }
  0xb3   : > { %4289 = vmatprep.mubr.bf16.mxu0 %v4543_v17  ;;  %3886 = vmatpush3.bf16.msra.mxu0 %v4562_v18  ;;  %v825_v17 = vrot.slane %v5156_v1, %v824_v4 }
  0xb4   : > { %3887 = vmatprep.subr.bf16.mxu0 %v4563_v20  ;;  %v821_v20 = vrot.slane %v5156_v1, %v820_v7 }
  0xb5   : > { %vm885_vm5 = vcmp.ne.s32.totalorder %v825_v17, 0 }
  0xb6   : > { %vm884_vm6 = vcmp.ne.s32.totalorder %v821_v20, 0  ;;  %v4588_v20 = vld [vmem:[#allocation7 + $0x180] sm:$0xff]  }
  0xb7   : > { %3888 = vmatpush3.bf16.msra.mxu0 %v4564_v23 }
  0xb8   : > { %3889 = vmatprep.subr.bf16.mxu0 %v4565_v25 }
  0xba   : > { %4290 = vmatmul.mubr.bf16.gmra.mrb[8].mxu0 %v4544_v26 }
  0xbb   : > { %4293 = vmatprep.mubr.bf16.mxu0 %v4545_v27  ;;  %3890 = vmatpush3.bf16.msra.mxu0 %v4566_v28 }
  0xbc   : > { %3891 = vmatprep.subr.bf16.mxu0 %v4567_v29 }
  0xbf   : > { %3892 = vmatpush3.bf16.msra.mxu0 %v4569_v30 }
  0xc0   : > { %3893 = vmatprep.subr.bf16.mxu0 %v4574_v48 }
  0xc2   : > { %4294 = vmatmul.mubr.bf16.gmra.mrb[12].mxu0 %v4546_v31 }
  0xc3   : > { %4297 = vmatprep.mubr.bf16.mxu0 %v4547_v32  ;;  %3894 = vmatpush3.bf16.msra.mxu0 %v4576_v49 }
  0xc4   : > { %3895 = vmatprep.subr.bf16.mxu0 %v4581_v52 }
  0xc7   : > { %3896 = vmatpush3.bf16.msra.mxu0 %v4582_v53 }
  0xc8   : > { %4105 = vmatprep.subr.bf16.mxu0 %v4587_v58 }
  0xca   : > { %4298 = vmatmul.mubr.bf16.gmra.mrb[16].mxu0 %v4548_v33 }
  0xcb   : > { %4301 = vmatprep.mubr.bf16.mxu0 %v4549_v34  ;;  %v5193_v34 = vrot.slane %v5156_v1, %v828_v22 }
  0xcd   : > { %vm886_vm10 = vcmp.ne.s32.totalorder %v5193_v34, 0 }
  0xd2   : > { %4302 = vmatmul.mubr.bf16.gmra.mrb[20].mxu0 %v4550_v35 }
  0xd3   : > { %4305 = vmatprep.mubr.bf16.mxu0 %v4551_v36 }
  0xda   : > { %4306 = vmatmul.mubr.bf16.gmra.mrb[24].mxu0 %v4552_v37 }
  0xdb   : > { %4309 = vmatprep.mubr.bf16.mxu0 %v4553_v38  ;;  %v840_v38 = vsub.s32 7, %v5149_v61 }
  0xdd   : > { %v5216_v59 = vrot.slane %v5156_v1, %v840_v38 }
  0xdf   : > { %vm889_vm12 = vcmp.ne.s32.totalorder %v5216_v59, 0 }
  0xe2   : > { %4310 = vmatmul.mubr.bf16.gmra.mrb[28].mxu0 %v4554_v39 }
  0xe3   : > { %4313 = vmatprep.mubr.bf16.mxu0 %v4555_v40 }
  0xea   : > { %4314 = vmatmul.mubr.bf16.gmra.mrb[32].mxu0 %v4556_v41 }
 0x17d   : > { %v4283_v5 = vpop.f32.mrb[0].mxu0 }
 0x17e   : > { %v619_v8 = vadd.f32 %v4283_v5, %v5164_v3  ;;  %v610_v9 = vpop.f32.mrb[1].mxu0 }
 0x17f   : > { %v611_v11 = vadd.f32 %v5164_v3, %v610_v9  ;;  %v4284_v12 = vpop.f32.mrb[2].mxu0 }
 0x180   : > { %v755_v14 = vmax.f32 %v619_v8, 0.0  ;;  %v622_v15 = vadd.f32 %v4284_v12, %v5164_v3  ;;  %v613_v16 = vpop.f32.mrb[3].mxu0 }
 0x181   : > { %v753_v18 = vmax.f32 %v611_v11, 0.0  ;;  %v614_v19 = vadd.f32 %v5164_v3, %v613_v16 }
 0x182   : > { %v756_v21 = vmax.f32 %v622_v15, 0.0  ;;  %v938_v25 = vsel %vm883_vm1, %v755_v14, 0.0  ;;  %v5236_v14 = vrot.slane %v5156_v1, %v836_v43 }
 0x183   : > { %v754_v23 = vmax.f32 %v614_v19, 0.0  ;;  %v936_v27 = vsel %vm882_vm2, %v753_v18, 0.0 }
 0x184   : > { %v939_v26 = vsel %vm883_vm1, %v756_v21, 0.0  ;;  %vm888_vm13 = vcmp.ne.s32.totalorder %v5236_v14, 0 }
 0x185   : > { %v973_v28 = vpack.c.bf16 %v939_v26, %v938_v25  ;;  %v937_v29 = vsel %vm882_vm2, %v754_v23, 0.0  ;;  %v4287_v30 = vpop.f32.mrb[4].mxu0 }
 0x186   : > { %v972_v31 = vpack.c.bf16 %v937_v29, %v936_v27  ;;  %v635_v32 = vadd.f32 %v4287_v30, %v5164_v3  ;;  %v626_v33 = vpop.f32.mrb[5].mxu0 }
 0x187   : > { %v998_v35 = vshrl.u32 %v973_v28, 16  ;;  %v627_v36 = vadd.f32 %v5164_v3, %v626_v33  ;;  %v4288_v37 = vpop.f32.mrb[6].mxu0  ;;  %v1001_v45 = vshll.u32 %v973_v28, 16  ;;  %v4591_v28 = vld [vmem:[#allocation7 + $0x1c8] sm:$0xff]  }
 0x188   : > { %v991_v39 = vshrl.u32 %v972_v31, 16  ;;  %v759_v40 = vmax.f32 %v635_v32, 0.0  ;;  %v638_v41 = vadd.f32 %v4288_v37, %v5164_v3  ;;  %v629_v42 = vpop.f32.mrb[7].mxu0  ;;  %v994_v50 = vshll.u32 %v972_v31, 16 }
 0x189   : > { %v1000_v44 = vrot.slane %v998_v35, 7  ;;  %v757_v47 = vmax.f32 %v627_v36, 0.0  ;;  %v630_v48 = vadd.f32 %v5164_v3, %v629_v42  ;;  %v4592_v42 = vld [vmem:[#allocation7 + $0x188] sm:$0xff]  }
 0x18a   : > { %v993_v49 = vrot.slane %v991_v39, 7  ;;  %v942_v51 = vsel %vm885_vm5, %v759_v40, 0.0  ;;  %v760_v52 = vmax.f32 %v638_v41, 0.0 }
 0x18b   : > { %v940_v53 = vsel %vm884_vm6, %v757_v47, 0.0  ;;  %v758_v54 = vmax.f32 %v630_v48, 0.0  ;;  %v1003_v55 = vor.u32 %v1001_v45, %v1000_v44  ;;  %v5225_v8 = vsel %vm5202_vm9, %v1000_v44, 0 }
 0x18c   : > { %v996_v56 = vor.u32 %v994_v50, %v993_v49  ;;  %v1173_v57 = vsel %vm5202_vm9, %v993_v49, 0  ;;  %v943_v58 = vsel %vm885_vm5, %v760_v52, 0.0  ;;  %v1212_v27 = vshll.u32 %v5225_v8, 16  ;;  %v4594_v49 = vld [vmem:[#allocation7 + $0x1d0] sm:$0xff]  }
 0x18d   : > { %v975_v60 = vpack.c.bf16 %v943_v58, %v942_v51  ;;  %v941_v62 = vsel %vm884_vm6, %v758_v54, 0.0  ;;  %v5221_v5 = vsel %vm5202_vm9, 0, %v1003_v55  ;;  %v4291_v6 = vpop.f32.mrb[8].mxu0  ;;  %v1434_v15 = vrot.slane %v1173_v57, 1 }
 0x18e   : > { %v5229_v9 = vsel %vm5202_vm9, 0, %v996_v56  ;;  %v974_v10 = vpack.c.bf16 %v941_v62, %v940_v53  ;;  %2311 = vmatprep.mubr.bf16.mxu0 %v5221_v5  ;;  %v651_v11 = vadd.f32 %v4291_v6, %v5164_v3  ;;  %v642_v12 = vpop.f32.mrb[9].mxu0  ;;  %v1200_v41 = vshll.u32 %v1173_v57, 16 }
 0x18f   : > { %v1012_v16 = vshrl.u32 %v975_v60, 16  ;;  %v643_v17 = vadd.f32 %v5164_v3, %v642_v12  ;;  %v4292_v18 = vpop.f32.mrb[10].mxu0  ;;  %v1433_v19 = vrot.slane %v5229_v9, 1  ;;  %v1195_v40 = vshll.u32 %v5229_v9, 16 }
 0x190   : > { %v1005_v21 = vshrl.u32 %v974_v10, 16  ;;  %v763_v23 = vmax.f32 %v651_v11, 0.0  ;;  %v654_v25 = vadd.f32 %v4292_v18, %v5164_v3  ;;  %v645_v26 = vpop.f32.mrb[11].mxu0  ;;  %v1008_v29 = vshll.u32 %v974_v10, 16 }
 0x191   : > { %v761_v30 = vmax.f32 %v643_v17, 0.0  ;;  %v1435_v1 = vsel %vm1432_vm7, %v1433_v19, %v1434_v15  ;;  %v646_v31 = vadd.f32 %v5164_v3, %v645_v26  ;;  %v5244_v32 = vrot.slane %v1012_v16, 7 }
 0x192   : > { %v1007_v33 = vrot.slane %v1005_v21, 7  ;;  %v946_v35 = vsel %vm887_vm8, %v763_v23, 0.0  ;;  %v764_v36 = vmax.f32 %v654_v25, 0.0  ;;  %2312 = vmatmul.mubr.bf16.vlgmr.msra.gmra.mrb[36].mxu0 %v1435_v1  ;;  %v1015_v44 = vshll.u32 %v975_v60, 16  ;;  %v4595_v21 = vld [vmem:[#allocation7 + $0x100] sm:$0xff]   ;;  %v4596_v23 = vld [vmem:[#allocation7 + $0x190] sm:$0xff]  }
 0x193   : > { %v944_v37 = vsel %vm886_vm10, %v761_v30, 0.0  ;;  %4106 = vmatpush3.bf16.msra.mxu0 %v4588_v20  ;;  %v762_v39 = vmax.f32 %v646_v31, 0.0  ;;  %v1193_v48 = vshrl.u32 %v5229_v9, 16  ;;  %v1197_v52 = vrot.slane %v1195_v40, 1 }
 0x194   : > { %v1010_v45 = vor.u32 %v1008_v29, %v1007_v33  ;;  %v947_v47 = vsel %vm887_vm8, %v764_v36, 0.0  ;;  %4107 = vmatprep.subr.bf16.mxu0 %v4591_v28  ;;  %v1207_v53 = vshll.u32 %v5221_v5, 16  ;;  %v1017_v55 = vor.u32 %v1015_v44, %v5244_v32  ;;  %v4597_v28 = vld [vmem:[#allocation7 + $0x148] sm:$0xff]   ;;  %v4598_v29 = vld [vmem:[#allocation7 + $0x1d8] sm:$0xff]  }
 0x195   : > { %v5255_v50 = vpack.c.bf16 %v947_v47, %v946_v35  ;;  %v945_v51 = vsel %vm886_vm10, %v762_v39, 0.0  ;;  %v4295_v54 = vpop.f32.mrb[12].mxu0  ;;  %v1436_v57 = vrot.slane %v5221_v5, 1  ;;  %v1198_v60 = vor.u32 %v1197_v52, %v1193_v48  ;;  %v4599_v39 = vld [vmem:[#allocation7 + $0x108] sm:$0xff]   ;;  %v4600_v47 = vld [vmem:[#allocation7 + $0x198] sm:$0xff]  }
 0x196   : > { %v5261_v56 = vpack.c.bf16 %v945_v51, %v944_v37  ;;  %v5265_v24 = vsel %vm5202_vm9, 0, %v1010_v45  ;;  %v658_v58 = vpop.f32.mrb[13].mxu0  ;;  %v1202_v62 = vrot.slane %v1200_v41, 1  ;;  %v1205_v34 = vshrl.u32 %v5221_v5, 16 }
 0x197   : > { %2319 = vmatprep.mubr.bf16.mxu0 %v5265_v24  ;;  %v1209_v6 = vrot.slane %v1207_v53, 1  ;;  %v4296_v10 = vpop.f32.mrb[14].mxu0  ;;  %4108 = vmatpush3.bf16.msra.mxu0 %v4592_v42  ;;  %v1214_v12 = vrot.slane %v1212_v27, 1  ;;  %v1437_v15 = vrot.slane %v5225_v8, 1  ;;  %v1026_v17 = vshrl.u32 %v5255_v50, 16 }
 0x198   : > { %v1019_v11 = vshrl.u32 %v5261_v56, 16  ;;  %v661_v16 = vpop.f32.mrb[15].mxu0  ;;  %4109 = vmatprep.subr.bf16.mxu0 %v4594_v49  ;;  %v1203_v18 = vsel %vm1191_vm11, %v1198_v60, %v1202_v62  ;;  %v667_v20 = vadd.f32 %v4295_v54, %v5164_v3  ;;  %v1022_v25 = vshll.u32 %v5261_v56, 16  ;;  %v4601_v54 = vld [vmem:[#allocation7 + $0x150] sm:$0xff]  }
 0x199   : > { %v1210_v19 = vor.u32 %v1209_v6, %v1205_v34  ;;  %2150 = vmatprep.mubr.bf16.mxu1 %v1203_v18  ;;  %v5277_v26 = vsel %vm1432_vm7, %v1436_v57, %v1437_v15  ;;  %v5281_v8 = vsel %vm5202_vm9, 0, %v1017_v55  ;;  %v1175_v27 = vsel %vm5202_vm9, %v1007_v33, 0  ;;  %v4602_v55 = vld [vmem:[#allocation7 + $0x1e0] sm:$0xff]  }
 0x19a   : > { %v5285_v30 = vrot.slane %v1019_v11, 7  ;;  %2151 = vmatmul.mubr.bf16.vlgmr.msra.gmra.mrb[0].mxu1 %v5229_v9  ;;  %2320 = vmatmul.mubr.bf16.gmra.mrb[40].mxu0 %v5277_v26  ;;  %v767_v31 = vmax.f32 %v667_v20, 0.0  ;;  %v1219_v35 = vshll.u32 %v5265_v24, 16  ;;  %v659_v33 = vadd.f32 %v5164_v3, %v658_v58  ;;  %v4604_v18 = vld [vmem:[#allocation7 + $0x1a0] sm:$0xff]  }
 0x19b   : > { %v5289_v1 = vsel %vm1191_vm11, %v1210_v19, %v1214_v12  ;;  %2327 = vmatprep.mubr.bf16.mxu0 %v5281_v8  ;;  %v670_v36 = vadd.f32 %v4296_v10, %v5164_v3  ;;  %v4850_v37 = vmov 1   ;;  %v1217_v41 = vshrl.u32 %v5265_v24, 16  ;;  %3994 = vmatpush3.bf16.msra.mxu1 %v4595_v21  ;;  %v4605_v21 = vld [vmem:[#allocation7 + $0x158] sm:$0xff]  }
 0x19c   : > { %2158 = vmatprep.mubr.bf16.mxu1 %v5289_v1  ;;  %v5300_v9 = vrot.slane %v4850_v37, %v5153_v63  ;;  %v950_v40 = vsel %vm889_vm12, %v767_v31, 0.0  ;;  %v1221_v42 = vrot.slane %v1219_v35, 1  ;;  %v1224_v44 = vshll.u32 %v1175_v27, 16  ;;  %4110 = vmatpush3.bf16.msra.mxu0 %v4596_v23  ;;  %v4606_v23 = vld [vmem:[#allocation7 + $0x1e8] sm:$0xff]  }
 0x19d   : > { %v4299_v45 = vpop.f32.mrb[16].mxu0  ;;  %v765_v48 = vmax.f32 %v659_v33, 0.0  ;;  %v768_v49 = vmax.f32 %v670_v36, 0.0  ;;  %v1439_v51 = vrot.slane %v5265_v24, 1  ;;  %v662_v52 = vadd.f32 %v5164_v3, %v661_v16  ;;  %3995 = vmatprep.subr.bf16.mxu1 %v4597_v28  ;;  %4111 = vmatprep.subr.bf16.mxu0 %v4598_v29 }
 0x19e   : > { %v674_v53 = vpop.f32.mrb[17].mxu0  ;;  %v5307_v56 = vrot.slane %v1026_v17, 7  ;;  %v1029_v57 = vshll.u32 %v5255_v50, 16  ;;  %v1024_v58 = vor.u32 %v1022_v25, %v5285_v30  ;;  %v1222_v60 = vor.u32 %v1221_v42, %v1217_v41  ;;  %v4603_v50 = vld [vmem:[#allocation7 + $0x110] sm:$0xff]  }
 0x19f   : > { %v4300_v62 = vpop.f32.mrb[18].mxu0  ;;  %v948_v34 = vsel %vm888_vm13, %v765_v48, 0.0  ;;  %v951_v6 = vsel %vm889_vm12, %v768_v49, 0.0  ;;  %v1440_v10 = vrot.slane %v1175_v27, 1  ;;  %v766_v11 = vmax.f32 %v662_v52, 0.0  ;;  %3996 = vmatpush3.bf16.msra.mxu1 %v4599_v39  ;;  %v4607_v39 = vld [vmem:[#allocation7 + $0x118] sm:$0xff]  }
 0x1a0   : > { %v5315_v12 = vpop.f32.mrb[19].mxu0  ;;  %v1226_v15 = vrot.slane %v1224_v44, 1  ;;  %v5317_v16 = vpack.c.bf16 %v951_v6, %v950_v40  ;;  %v1231_v17 = vshll.u32 %v5281_v8, 16  ;;  %4112 = vmatpush3.bf16.msra.mxu0 %v4600_v47  ;;  %v1176_v20 = vsel %vm5202_vm9, %v5244_v32, 0  ;;  %3997 = vmatprep.subr.bf16.mxu1 %v4601_v54  ;;  %v4608_v40 = vld [vmem:[#allocation7 + $0x1a8] sm:$0xff]   ;;  %v4609_v47 = vld [vmem:[#allocation7 + $0x160] sm:$0xff]  }
 0x1a1   : > { %v5321_v19 = vsel %vm1432_vm7, %v1439_v51, %v1440_v10  ;;  %v949_v59 = vsel %vm888_vm13, %v766_v11, 0.0  ;;  %4113 = vmatprep.subr.bf16.mxu0 %v4602_v55  ;;  %v5337_v14 = vsel %vm5202_vm9, 0, %v1024_v58  ;;  %v1031_v32 = vor.u32 %v1029_v57, %v5307_v56  ;;  %v4610_v48 = vld [vmem:[#allocation7 + $0x1f0] sm:$0xff]   ;;  %v4611_v11 = vld [vmem:[#allocation7 + $0x120] sm:$0xff]  }
 0x1a2   : > { %2159 = vmatmul.mubr.bf16.gmra.mrb[4].mxu1 %v5221_v5  ;;  %v5330_v25 = vsel %vm1191_vm11, %v1222_v60, %v1226_v15  ;;  %2328 = vmatmul.mubr.bf16.gmra.mrb[44].mxu0 %v5321_v19  ;;  %v5333_v27 = vpack.c.bf16 %v949_v59, %v948_v34  ;;  %v1233_v28 = vrot.slane %v1231_v17, 1  ;;  %v683_v5 = vadd.f32 %v4299_v45, %v5164_v3  ;;  %v4612_v15 = vld [vmem:[#allocation7 + $0x1b0] sm:$0xff]   ;;  %v4614_v59 = vld [vmem:[#allocation7 + $0x1f8] sm:$0xff]  }
 0x1a3   : > { %2166 = vmatprep.mubr.bf16.mxu1 %v5330_v25  ;;  %2335 = vmatprep.mubr.bf16.mxu0 %v5337_v14  ;;  %vm891_vm14 = vcmp.ne.s32.totalorder %v5300_v9, 0  ;;  %v5346_v29 = vrot.slane %v4850_v37, %v5159_v2  ;;  %v1229_v31 = vshrl.u32 %v5281_v8, 16  ;;  %v1236_v35 = vshll.u32 %v1176_v20, 16 }
 0x1a4   : > { %v1442_v33 = vrot.slane %v5281_v8, 1  ;;  %3998 = vmatpush3.bf16.msra.mxu1 %v4603_v50  ;;  %4114 = vmatpush3.bf16.msra.mxu0 %v4604_v18  ;;  %v1443_v41 = vrot.slane %v1176_v20, 1  ;;  %v771_v42 = vmax.f32 %v683_v5, 0.0  ;;  %v5355_v44 = vsel %vm5202_vm9, %v5285_v30, 0  ;;  %v4613_v18 = vld [vmem:[#allocation7 + $0x168] sm:$0xff]  }
 0x1a5   : > { %v5350_v36 = vpop.f32.mrb[20].mxu0  ;;  %3999 = vmatprep.subr.bf16.mxu1 %v4605_v21  ;;  %4115 = vmatprep.subr.bf16.mxu0 %v4606_v23  ;;  %v1033_v49 = vshrl.u32 %v5333_v27, 16  ;;  %v1234_v51 = vor.u32 %v1233_v28, %v1229_v31  ;;  %v1243_v52 = vshll.u32 %v5337_v14, 16  ;;  %v675_v54 = vadd.f32 %v5164_v3, %v674_v53 }
 0x1a6   : > { %v5357_v45 = vpop.f32.mrb[21].mxu0  ;;  %v5366_v57 = vsel %vm5202_vm9, 0, %v1031_v32  ;;  %vm890_vm15 = vcmp.ne.s32.totalorder %v5346_v29, 0  ;;  %v686_v30 = vadd.f32 %v4300_v62, %v5164_v3  ;;  %v5373_v58 = vrot.slane %v4850_v37, %v824_v4 }
 0x1a7   : > { %v5362_v55 = vpop.f32.mrb[22].mxu0  ;;  %v1036_v34 = vshll.u32 %v5333_v27, 16  ;;  %v1238_v53 = vrot.slane %v1236_v35, 1  ;;  %v5379_v6 = vsel %vm1432_vm7, %v1442_v33, %v1443_v41  ;;  %v769_v10 = vmax.f32 %v675_v54, 0.0  ;;  %v4616_v41 = vld [vmem:[#allocation7 + $0x1b8] sm:$0xff]  }
 0x1a8   : > { %v5375_v60 = vpop.f32.mrb[23].mxu0  ;;  %4000 = vmatpush3.bf16.msra.mxu1 %v4607_v39  ;;  %4116 = vmatpush3.bf16.msra.mxu0 %v4608_v40  ;;  %v954_v62 = vsel %vm891_vm14, %v771_v42, 0.0  ;;  %v1248_v17 = vshll.u32 %v5355_v44, 16  ;;  %v772_v4 = vmax.f32 %v686_v30, 0.0  ;;  %v678_v50 = vadd.f32 %v5164_v3, %v5315_v12  ;;  %v4615_v40 = vld [vmem:[#allocation7 + $0x128] sm:$0xff]  }
 0x1a9   : > { %4001 = vmatprep.subr.bf16.mxu1 %v4609_v47  ;;  %4117 = vmatprep.subr.bf16.mxu0 %v4610_v48  ;;  %v5386_v20 = vrot.slane %v1033_v49, 7  ;;  %v5390_v21 = vsel %vm1191_vm11, %v1234_v51, %v1238_v53  ;;  %v1241_v23 = vshrl.u32 %v5337_v14, 16  ;;  %v1245_v27 = vrot.slane %v1243_v52, 1  ;;  %v5415_v51 = vld [vmem:[#allocation7 + $0x200] sm:$0xff]  }
 0x1aa   : > { %2167 = vmatmul.mubr.bf16.gmra.mrb[8].mxu1 %v5265_v24  ;;  %2336 = vmatmul.mubr.bf16.gmra.mrb[48].mxu0 %v5379_v6  ;;  %v1040_v28 = vshrl.u32 %v5317_v16, 16  ;;  %v952_v12 = vsel %vm890_vm15, %v769_v10, 0.0  ;;  %v955_v32 = vsel %vm891_vm14, %v772_v4, 0.0  ;;  %v770_v5 = vmax.f32 %v678_v50, 0.0 }
 0x1ab   : > { %2174 = vmatprep.mubr.bf16.mxu1 %v5390_v21  ;;  %2343 = vmatprep.mubr.bf16.mxu0 %v5366_v57  ;;  %v5401_v31 = vpack.c.bf16 %v955_v32, %v954_v62  ;;  %v1445_v35 = vrot.slane %v5337_v14, 1  ;;  %v1446_v33 = vrot.slane %v5355_v44, 1  ;;  %vm893_vm0 = vcmp.ne.s32.totalorder %v5373_v58, 0  ;;  %v4617_v44 = vld [vmem:[#allocation7 + $0x170] sm:$0xff]  }
 0x1ac   : > { %4002 = vmatpush3.bf16.msra.mxu1 %v4611_v11  ;;  %4118 = vmatpush3.bf16.msra.mxu0 %v4612_v15  ;;  %v1250_v42 = vrot.slane %v1248_v17, 1  ;;  %v953_v9 = vsel %vm890_vm15, %v770_v5, 0.0  ;;  %v1255_v47 = vshll.u32 %v5366_v57, 16  ;;  %v699_v48 = vadd.f32 %v5350_v36, %v5164_v3  ;;  %v4618_v17 = vld [vmem:[#allocation7 + $0x130] sm:$0xff]  }
 0x1ad   : > { %v5406_v39 = vpop.f32.mrb[24].mxu0  ;;  %4003 = vmatprep.subr.bf16.mxu1 %v4613_v18  ;;  %4119 = vmatprep.subr.bf16.mxu0 %v4614_v59  ;;  %v1038_v52 = vor.u32 %v1036_v34, %v5386_v20  ;;  %v1246_v54 = vor.u32 %v1245_v27, %v1241_v23  ;;  %v5418_v30 = vpack.c.bf16 %v953_v9, %v952_v12  ;;  %v1178_v29 = vsel %vm5202_vm9, %v5307_v56, 0  ;;  %v4620_v18 = vld [vmem:[#allocation7 + $0x178] sm:$0xff]  }
 0x1ae   : > { %v5413_v49 = vpop.f32.mrb[25].mxu0  ;;  %v5425_v10 = vrot.slane %v1040_v28, 7  ;;  %v1043_v36 = vshll.u32 %v5317_v16, 16  ;;  %v775_v11 = vmax.f32 %v699_v48, 0.0  ;;  %v853_v15 = vrot.slane %v4850_v37, %v820_v7 }
 0x1af   : > { %v5423_v53 = vpop.f32.mrb[26].mxu0  ;;  %v5434_v34 = vsel %vm1432_vm7, %v1445_v35, %v1446_v33  ;;  %v1253_v56 = vshrl.u32 %v5366_v57, 16  ;;  %v1257_v4 = vrot.slane %v1255_v47, 1  ;;  %v1260_v50 = vshll.u32 %v1178_v29, 16 }
 0x1b0   : > { %v5431_v62 = vpop.f32.mrb[27].mxu0  ;;  %4004 = vmatpush3.bf16.msra.mxu1 %v4615_v40  ;;  %4120 = vmatpush3.bf16.msra.mxu0 %v4616_v41  ;;  %v958_v16 = vsel %vm893_vm0, %v775_v11, 0.0  ;;  %v5442_v7 = vsel %vm1191_vm11, %v1246_v54, %v1250_v42  ;;  %v5447_v59 = vsel %vm5202_vm9, 0, %v1038_v52  ;;  %v691_v23 = vadd.f32 %v5164_v3, %v5357_v45  ;;  %v4621_v45 = vld [vmem:[#allocation7 + $0x138] sm:$0xff]  }
 0x1b1   : > { %4005 = vmatprep.subr.bf16.mxu1 %v4617_v44  ;;  %4317 = vmatprep.subr.bf16.mxu0 %v5415_v51  ;;  %v702_v27 = vadd.f32 %v5362_v55, %v5164_v3  ;;  %v1045_v28 = vor.u32 %v1043_v36, %v5425_v10  ;;  %v1448_v12 = vrot.slane %v5366_v57, 1  ;;  %vm892_vm1 = vcmp.ne.s32.totalorder %v853_v15, 0 }
 0x1b2   : > { %2175 = vmatmul.mubr.bf16.gmra.mrb[12].mxu1 %v5281_v8  ;;  %2344 = vmatmul.mubr.bf16.gmra.mrb[52].mxu0 %v5434_v34  ;;  %v1449_v32 = vrot.slane %v1178_v29, 1  ;;  %v773_v5 = vmax.f32 %v691_v23, 0.0  ;;  %v694_v33 = vadd.f32 %v5164_v3, %v5375_v60  ;;  %v1047_v55 = vshrl.u32 %v5418_v30, 16 }
 0x1b3   : > { %2182 = vmatprep.mubr.bf16.mxu1 %v5442_v7  ;;  %2351 = vmatprep.mubr.bf16.mxu0 %v5447_v59  ;;  %v776_v35 = vmax.f32 %v702_v27, 0.0  ;;  %v1258_v41 = vor.u32 %v1257_v4, %v1253_v56  ;;  %v1262_v42 = vrot.slane %v1260_v50, 1  ;;  %v1267_v9 = vshll.u32 %v5447_v59, 16 }
 0x1b4   : > { %4006 = vmatpush3.bf16.msra.mxu1 %v4618_v17  ;;  %v1179_v48 = vsel %vm5202_vm9, %v5386_v20, 0  ;;  %v956_v44 = vsel %vm892_vm1, %v773_v5, 0.0  ;;  %v774_v52 = vmax.f32 %v694_v33, 0.0  ;;  %v865_v36 = vrot.slane %v4850_v37, %v832_v13 }
 0x1b5   : > { %v5459_v40 = vpop.f32.mrb[28].mxu0  ;;  %4007 = vmatprep.subr.bf16.mxu1 %v4620_v18  ;;  %v959_v60 = vsel %vm893_vm0, %v776_v35, 0.0  ;;  %v5481_v11 = vrot.slane %v4850_v37, %v828_v22  ;;  %v1050_v17 = vshll.u32 %v5418_v30, 16  ;;  %v5487_v58 = vsel %vm1432_vm7, %v1448_v12, %v1449_v32 }
 0x1b6   : > { %v5463_v47 = vpop.f32.mrb[29].mxu0  ;;  %v5473_v29 = vpack.c.bf16 %v959_v60, %v958_v16  ;;  %v1265_v56 = vshrl.u32 %v5447_v59, 16  ;;  %v957_v4 = vsel %vm892_vm1, %v774_v52, 0.0  ;;  %v1049_v50 = vrot.slane %v1047_v55, 7 }
 0x1b7   : > { %v5471_v54 = vpop.f32.mrb[30].mxu0  ;;  %v1269_v16 = vrot.slane %v1267_v9, 1  ;;  %v1272_v13 = vshll.u32 %v1179_v48, 16  ;;  %v5491_v18 = vpack.c.bf16 %v957_v4, %v956_v44  ;;  %v5496_v22 = vsel %vm1191_vm11, %v1258_v41, %v1262_v42 }
 0x1b8   : > { %v5483_v20 = vpop.f32.mrb[31].mxu0  ;;  %4008 = vmatpush3.bf16.msra.mxu1 %v4621_v45  ;;  %v5501_v30 = vsel %vm5202_vm9, 0, %v1045_v28  ;;  %v715_v15 = vadd.f32 %v5406_v39, %v5164_v3  ;;  %vm895_vm2 = vcmp.ne.s32.totalorder %v865_v36, 0  ;;  %vm894_vm3 = vcmp.ne.s32.totalorder %v5481_v11, 0 }
 0x1b9   : > { %4413 = vmatprep.subr.bf16.mxu1 %v5415_v51  ;;  %v793_v23 = vadd.s32 16, %v5149_v61  ;;  %v1054_v27 = vshrl.u32 %v5401_v31, 16  ;;  %v1451_v12 = vrot.slane %v5447_v59, 1  ;;  %v1452_v32 = vrot.slane %v1179_v48, 1 }
 0x1ba   : > { %2183 = vmatmul.mubr.bf16.gmra.mrb[16].mxu1 %v5337_v14  ;;  %2352 = vmatmul.mubr.bf16.gmra.mrb[56].mxu0 %v5487_v58  ;;  %v779_v5 = vmax.f32 %v715_v15, 0.0  ;;  %v1052_v35 = vor.u32 %v1050_v17, %v1049_v50  ;;  %v1270_v33 = vor.u32 %v1269_v16, %v1265_v56  ;;  %v1274_v39 = vrot.slane %v1272_v13, 1 }
 0x1bb   : > { %2190 = vmatprep.mubr.bf16.mxu1 %v5496_v22  ;;  %2359 = vmatprep.mubr.bf16.mxu0 %v5501_v30  ;;  %v707_v45 = vadd.f32 %v5164_v3, %v5413_v49  ;;  %v1180_v41 = vsel %vm5202_vm9, %v5425_v10, 0  ;;  %v1279_v42 = vshll.u32 %v5501_v30, 16  ;;  %v718_v48 = vadd.f32 %v5423_v53, %v5164_v3 }
 0x1bc   : > { %v962_v9 = vsel %vm895_vm2, %v779_v5, 0.0  ;;  %v1057_v60 = vshll.u32 %v5401_v31, 16  ;;  %v5530_v49 = vrot.slane %v4850_v37, %v840_v38  ;;  %v797_v17 = vadd.s32 4294967295, %v793_v23 }
 0x1bd   : > { %v5511_v28 = vpop.f32.mrb[32].mxu0  ;;  %v777_v52 = vmax.f32 %v707_v45, 0.0  ;;  %v5534_v10 = vrot.slane %v1054_v27, 7  ;;  %v5537_v4 = vsel %vm1432_vm7, %v1451_v12, %v1452_v32  ;;  %v780_v16 = vmax.f32 %v718_v48, 0.0 }
 0x1be   : > { %v5515_v55 = vpop.f32.mrb[33].mxu0  ;;  %v710_v53 = vadd.f32 %v5164_v3, %v5431_v62  ;;  %v5543_v31 = vsel %vm5202_vm9, 0, %v1052_v35  ;;  %v1277_v13 = vshrl.u32 %v5501_v30, 16  ;;  %v1284_v38 = vshll.u32 %v1180_v41, 16 }
 0x1bf   : > { %v5524_v44 = vpop.f32.mrb[34].mxu0  ;;  %v960_v15 = vsel %vm894_vm3, %v777_v52, 0.0  ;;  %v5550_v23 = vsel %vm1191_vm11, %v1270_v33, %v1274_v39  ;;  %v1281_v27 = vrot.slane %v1279_v42, 1  ;;  %v963_v62 = vsel %vm895_vm2, %v780_v16, 0.0 }
 0x1c0   : > { %v5532_v56 = vpop.f32.mrb[35].mxu0  ;;  %v778_v12 = vmax.f32 %v710_v53, 0.0  ;;  %v5556_v32 = vpack.c.bf16 %v963_v62, %v962_v9  ;;  %vm897_vm4 = vcmp.ne.s32.totalorder %v5530_v49, 0  ;;  %v869_v5 = vrot.slane %v4850_v37, %v836_v43 }
 0x1c1   : > { %vm803_vm5 = vcmp.lt.s32.totalorder %v797_v17, 16  ;;  %v1059_v35 = vor.u32 %v1057_v60, %v5534_v10  ;;  %v1454_v33 = vrot.slane %v5501_v30, 1  ;;  %v731_v39 = vadd.f32 %v5459_v40, %v5164_v3 }
 0x1c2   : > { %2191 = vmatmul.mubr.bf16.gmra.mrb[20].mxu1 %v5366_v57  ;;  %2360 = vmatmul.mubr.bf16.gmra.mrb[60].mxu0 %v5537_v4  ;;  %v961_v36 = vsel %vm894_vm3, %v778_v12, 0.0  ;;  %v1286_v45 = vrot.slane %v1284_v38, 1  ;;  %v1455_v42 = vrot.slane %v1180_v41, 1  ;;  %v1181_v9 = vsel %vm5202_vm9, %v1049_v50, 0 }
 0x1c3   : > { %2198 = vmatprep.mubr.bf16.mxu1 %v5550_v23  ;;  %2367 = vmatprep.mubr.bf16.mxu0 %v5543_v31  ;;  %v5570_v48 = vpack.c.bf16 %v961_v36, %v960_v15  ;;  %v1061_v61 = vshrl.u32 %v5491_v18, 16  ;;  %v1282_v43 = vor.u32 %v1281_v27, %v1277_v13  ;;  %v1291_v37 = vshll.u32 %v5543_v31, 16 }
 0x1c4   : > { %v783_v60 = vmax.f32 %v731_v39, 0.0  ;;  %vm896_vm6 = vcmp.ne.s32.totalorder %v869_v5, 0  ;;  %v5576_v11 = vsel %vm5202_vm9, 0, %v1059_v35  ;;  %v1296_v52 = vshll.u32 %v1181_v9, 16 }
 0x1c5   : > { %v809_v50 = vsel %vm803_vm5, 1, %v4849_v0  ;;  %v1064_v41 = vshll.u32 %v5491_v18, 16  ;;  %v5584_v16 = vsel %vm1432_vm7, %v1454_v33, %v1455_v42  ;;  %v723_v53 = vadd.f32 %v5164_v3, %v5463_v47 }
 0x1c6   : > { %v966_v40 = vsel %vm897_vm4, %v783_v60, 0.0  ;;  %v734_v13 = vadd.f32 %v5471_v54, %v5164_v3  ;;  %v1063_v38 = vrot.slane %v1061_v61, 7  ;;  %v5592_v15 = vsel %vm1191_vm11, %v1282_v43, %v1286_v45 }
 0x1c7   : > { %v1289_v0 = vshrl.u32 %v5543_v31, 16  ;;  %v1293_v18 = vrot.slane %v1291_v37, 1  ;;  %v781_v17 = vmax.f32 %v723_v53, 0.0  ;;  %v726_v54 = vadd.f32 %v5164_v3, %v5483_v20 }
 0x1c8   : > { %v784_v47 = vmax.f32 %v734_v13, 0.0  ;;  %v881_v27 = vrot.slane %v809_v50, %v5153_v63  ;;  %v1068_v62 = vshrl.u32 %v5473_v29, 16  ;;  %v1298_v12 = vrot.slane %v1296_v52, 1 }
 0x1c9   : > { %v1457_v35 = vrot.slane %v5543_v31, 1  ;;  %v1458_v33 = vrot.slane %v1181_v9, 1  ;;  %v1303_v36 = vshll.u32 %v5576_v11, 16  ;;  %v964_v39 = vsel %vm896_vm6, %v781_v17, 0.0 }
 0x1ca   : > { %2199 = vmatmul.mubr.bf16.gmra.mrb[24].mxu1 %v5447_v59  ;;  %2368 = vmatmul.mubr.bf16.gmra.mrb[64].mxu0 %v5584_v16  ;;  %v967_v45 = vsel %vm897_vm4, %v784_v47, 0.0  ;;  %v782_v42 = vmax.f32 %v726_v54, 0.0  ;;  %v1066_v61 = vor.u32 %v1064_v41, %v1063_v38  ;;  %v1294_v43 = vor.u32 %v1293_v18, %v1289_v0 }
 0x1cb   : > { %2206 = vmatprep.mubr.bf16.mxu1 %v5592_v15  ;;  %2375 = vmatprep.mubr.bf16.mxu0 %v5576_v11  ;;  %v1182_v63 = vsel %vm5202_vm9, %v5534_v10, 0  ;;  %v5610_v20 = vpack.c.bf16 %v967_v45, %v966_v40  ;;  %v1070_v60 = vrot.slane %v1068_v62, 7  ;;  %v1071_v9 = vshll.u32 %v5473_v29, 16 }
 0x1cc   : > { %v965_v37 = vsel %vm896_vm6, %v782_v42, 0.0  ;;  %v5615_v52 = vsel %vm1432_vm7, %v1457_v35, %v1458_v33  ;;  %v1301_v49 = vshrl.u32 %v5576_v11, 16  ;;  %v1305_v41 = vrot.slane %v1303_v36, 1 }
 0x1cd   : > { %v5617_v53 = vpack.c.bf16 %v965_v37, %v964_v39  ;;  %v1308_v13 = vshll.u32 %v1182_v63, 16  ;;  %v747_v0 = vadd.f32 %v5511_v28, %v5164_v3  ;;  %v5624_v10 = vsel %vm1191_vm11, %v1294_v43, %v1298_v12 }
 0x1ce   : > { %v5629_v29 = vsel %vm5202_vm9, 0, %v1066_v61  ;;  %vm5631_vm8 = vcmp.ne.s32.totalorder %v881_v27, 0  ;;  %v877_v40 = vrot.slane %v809_v50, %v5159_v2  ;;  %v1073_v18 = vor.u32 %v1071_v9, %v1070_v60 }
 0x1cf   : > { %v787_v28 = vmax.f32 %v747_v0, 0.0  ;;  %v1460_v17 = vrot.slane %v5576_v11, 1  ;;  %v1461_v47 = vrot.slane %v1182_v63, 1  ;;  %v739_v54 = vadd.f32 %v5164_v3, %v5515_v55 }
 0x1d0   : > { %v1306_v62 = vor.u32 %v1305_v41, %v1301_v49  ;;  %v1310_v12 = vrot.slane %v1308_v13, 1  ;;  %v750_v2 = vadd.f32 %v5524_v44, %v5164_v3  ;;  %v1075_v50 = vshrl.u32 %v5570_v48, 16 }
 0x1d1   : > { %v970_v27 = vsel %vm5631_vm8, %v787_v28, 0.0  ;;  %v1315_v35 = vshll.u32 %v5629_v29, 16  ;;  %v785_v33 = vmax.f32 %v739_v54, 0.0  ;;  %vm5647_vm10 = vcmp.ne.s32.totalorder %v877_v40, 0 }
 0x1d2   : > { %2207 = vmatmul.mubr.bf16.gmra.mrb[28].mxu1 %v5501_v30  ;;  %2376 = vmatmul.mubr.bf16.gmra.mrb[68].mxu0 %v5615_v52  ;;  %v1183_v55 = vsel %vm5202_vm9, %v1063_v38, 0  ;;  %v788_v39 = vmax.f32 %v750_v2, 0.0  ;;  %v742_v45 = vadd.f32 %v5164_v3, %v5532_v56  ;;  %v1078_v42 = vshll.u32 %v5570_v48, 16 }
 0x1d3   : > { %2214 = vmatprep.mubr.bf16.mxu1 %v5624_v10  ;;  %2383 = vmatprep.mubr.bf16.mxu0 %v5629_v29  ;;  %v5657_v44 = vsel %vm1432_vm7, %v1460_v17, %v1461_v47  ;;  %v5661_v61 = vsel %vm5202_vm9, 0, %v1073_v18  ;;  %v1313_v43 = vshrl.u32 %v5629_v29, 16  ;;  %v5665_v63 = vsel %vm1191_vm11, %v1306_v62, %v1310_v12 }
 0x1d4   : > { %v968_v38 = vsel %vm5647_vm10, %v785_v33, 0.0  ;;  %v971_v3 = vsel %vm5631_vm8, %v788_v39, 0.0  ;;  %v786_v56 = vmax.f32 %v742_v45, 0.0  ;;  %v1077_v48 = vrot.slane %v1075_v50, 7 }
 0x1d5   : > { %v1317_v37 = vrot.slane %v1315_v35, 1  ;;  %v1320_v9 = vshll.u32 %v1183_v55, 16  ;;  %v5673_v49 = vpack.c.bf16 %v971_v3, %v970_v27  ;;  %v1082_v0 = vshrl.u32 %v5556_v32, 16 }
 0x1d6   : > { %v969_v41 = vsel %vm5647_vm10, %v786_v56, 0.0  ;;  %v1463_v5 = vrot.slane %v5629_v29, 1  ;;  %v1464_v40 = vrot.slane %v1183_v55, 1  ;;  %v1080_v28 = vor.u32 %v1078_v42, %v1077_v48 }
 0x1d7   : > { %v5679_v13 = vpack.c.bf16 %v969_v41, %v968_v38  ;;  %v1318_v18 = vor.u32 %v1317_v37, %v1313_v43  ;;  %v1322_v17 = vrot.slane %v1320_v9, 1  ;;  %v1327_v47 = vshll.u32 %v5661_v61, 16 }
 0x1d8   : > { %v1184_v54 = vsel %vm5202_vm9, %v1070_v60, 0  ;;  %v1084_v62 = vrot.slane %v1082_v0, 7  ;;  %v1085_v12 = vshll.u32 %v5556_v32, 16  ;;  %v5688_v27 = vsel %vm1432_vm7, %v1463_v5, %v1464_v40 }
 0x1d9   : > { %v1325_v2 = vshrl.u32 %v5661_v61, 16  ;;  %v5693_v50 = vsel %vm1191_vm11, %v1318_v18, %v1322_v17  ;;  %v5698_v35 = vsel %vm5202_vm9, 0, %v1080_v28  ;;  %v1329_v60 = vrot.slane %v1327_v47, 1 }
 0x1da   : > { %2215 = vmatmul.mubr.bf16.gmra.mrb[32].mxu1 %v5543_v31  ;;  %2384 = vmatmul.mubr.bf16.gmra.mrb[72].mxu0 %v5657_v44  ;;  %v1332_v33 = vshll.u32 %v1184_v54, 16  ;;  %v1087_v32 = vor.u32 %v1085_v12, %v1084_v62  ;;  %v1089_v36 = vshrl.u32 %v5617_v53, 16  ;;  %v1466_v55 = vrot.slane %v5661_v61, 1 }
 0x1db   : > { %2222 = vmatprep.mubr.bf16.mxu1 %v5665_v63  ;;  %2391 = vmatprep.mubr.bf16.mxu0 %v5661_v61  ;;  %v1467_v39 = vrot.slane %v1184_v54, 1  ;;  %v1330_v45 = vor.u32 %v1329_v60, %v1325_v2  ;;  %v1339_v43 = vshll.u32 %v5698_v35, 16  ;;  %v1185_v38 = vsel %vm5202_vm9, %v1077_v48, 0 }
 0x1dc   : > { %v1334_v42 = vrot.slane %v1332_v33, 1  ;;  %v1091_v3 = vrot.slane %v1089_v36, 7  ;;  %v1092_v56 = vshll.u32 %v5617_v53, 16  ;;  %v5713_v9 = vsel %vm5202_vm9, 0, %v1087_v32 }
 0x1dd   : > { %v5709_v37 = vsel %vm1432_vm7, %v1466_v55, %v1467_v39  ;;  %v1337_v0 = vshrl.u32 %v5698_v35, 16  ;;  %v1341_v48 = vrot.slane %v1339_v43, 1  ;;  %v1344_v5 = vshll.u32 %v1185_v38, 16 }
 0x1de   : > { %v5717_v41 = vsel %vm1191_vm11, %v1330_v45, %v1334_v42  ;;  %v1096_v53 = vshrl.u32 %v5610_v20, 16  ;;  %v1094_v40 = vor.u32 %v1092_v56, %v1091_v3  ;;  %v1469_v28 = vrot.slane %v5698_v35, 1 }
 0x1df   : > { %v1470_v18 = vrot.slane %v1185_v38, 1  ;;  %v1342_v17 = vor.u32 %v1341_v48, %v1337_v0  ;;  %v1346_v47 = vrot.slane %v1344_v5, 1  ;;  %v1351_v54 = vshll.u32 %v5713_v9, 16 }
 0x1e0   : > { %v1186_v12 = vsel %vm5202_vm9, %v1084_v62, 0  ;;  %v1098_v2 = vrot.slane %v1096_v53, 7  ;;  %v1099_v60 = vshll.u32 %v5610_v20, 16  ;;  %v5734_v32 = vsel %vm5202_vm9, 0, %v1094_v40 }
 0x1e1   : > { %v5730_v33 = vsel %vm1432_vm7, %v1469_v28, %v1470_v18  ;;  %v5738_v36 = vsel %vm1191_vm11, %v1342_v17, %v1346_v47  ;;  %v1349_v55 = vshrl.u32 %v5713_v9, 16  ;;  %v1353_v62 = vrot.slane %v1351_v54, 1 }
 0x1e2   : > { %2223 = vmatmul.mubr.bf16.gmra.mrb[36].mxu1 %v5576_v11  ;;  %2392 = vmatmul.mubr.bf16.gmra.mrb[76].mxu0 %v5688_v27  ;;  %v1356_v39 = vshll.u32 %v1186_v12, 16  ;;  %v1101_v20 = vor.u32 %v1099_v60, %v1098_v2  ;;  %v1472_v45 = vrot.slane %v5713_v9, 1  ;;  %v1473_v42 = vrot.slane %v1186_v12, 1 }
 0x1e3   : > { %2230 = vmatprep.mubr.bf16.mxu1 %v5693_v50  ;;  %2399 = vmatprep.mubr.bf16.mxu0 %v5698_v35  ;;  %v1103_v43 = vshrl.u32 %v5679_v13, 16  ;;  %v1354_v38 = vor.u32 %v1353_v62, %v1349_v55  ;;  %v1363_v0 = vshll.u32 %v5734_v32, 16  ;;  %v1187_v48 = vsel %vm5202_vm9, %v1091_v3, 0 }
 0x1e4   : > { %v1358_v56 = vrot.slane %v1356_v39, 1  ;;  %v1106_v5 = vshll.u32 %v5679_v13, 16  ;;  %v5751_v53 = vsel %vm1432_vm7, %v1472_v45, %v1473_v42  ;;  %v5755_v40 = vsel %vm5202_vm9, 0, %v1101_v20 }
 0x1e5   : > { %v1361_v28 = vshrl.u32 %v5734_v32, 16  ;;  %v5758_v18 = vrot.slane %v1103_v43, 7  ;;  %v1365_v3 = vrot.slane %v1363_v0, 1  ;;  %v1368_v13 = vshll.u32 %v1187_v48, 16 }
 0x1e6   : > { %v5762_v17 = vsel %vm1191_vm11, %v1354_v38, %v1358_v56  ;;  %v1475_v47 = vrot.slane %v5734_v32, 1  ;;  %v1476_v54 = vrot.slane %v1187_v48, 1  ;;  %v1375_v62 = vshll.u32 %v5755_v40, 16 }
 0x1e7   : > { %v1366_v12 = vor.u32 %v1365_v3, %v1361_v28  ;;  %v1370_v60 = vrot.slane %v1368_v13, 1  ;;  %v1108_v55 = vor.u32 %v1106_v5, %v5758_v18  ;;  %v1188_v39 = vsel %vm5202_vm9, %v1098_v2, 0  ;;  %v4622_v13 = vld [vmem:[#allocation7 + $0x208] sm:$0xff]  }
 0x1e8   : > { %v5773_v20 = vsel %vm1432_vm7, %v1475_v47, %v1476_v54  ;;  %v1373_v45 = vshrl.u32 %v5755_v40, 16  ;;  %v1377_v38 = vrot.slane %v1375_v62, 1  ;;  %v1380_v56 = vshll.u32 %v1188_v39, 16  ;;  %v4623_v47 = vld [vmem:[#allocation7 + $0x210] sm:$0xff]   ;;  %v4624_v54 = vld [vmem:[#allocation7 + $0x218] sm:$0xff]  }
 0x1e9   : > { %v5778_v42 = vsel %vm1191_vm11, %v1366_v12, %v1370_v60  ;;  %v5783_v43 = vsel %vm5202_vm9, 0, %v1108_v55  ;;  %v1478_v2 = vrot.slane %v5755_v40, 1  ;;  %v1479_v0 = vrot.slane %v1188_v39, 1 }
 0x1ea   : > { %2231 = vmatmul.mubr.bf16.gmra.mrb[40].mxu1 %v5629_v29  ;;  %2400 = vmatmul.mubr.bf16.gmra.mrb[80].mxu0 %v5709_v37  ;;  %v1378_v48 = vor.u32 %v1377_v38, %v1373_v45  ;;  %v1382_v5 = vrot.slane %v1380_v56, 1  ;;  %v1498_v39 = vshrl.u32 %v5783_v43, 16 }
 0x1eb   : > { %2238 = vmatprep.mubr.bf16.mxu1 %v5717_v41  ;;  %2407 = vmatprep.mubr.bf16.mxu0 %v5713_v9  ;;  %v5789_v28 = vsel %vm1432_vm7, %v1478_v2, %v1479_v0 }
 0x1ec   : > { %v5793_v3 = vsel %vm1191_vm11, %v1378_v48, %v1382_v5 }
 0x1f2   : > { %2239 = vmatmul.mubr.bf16.gmra.mrb[44].mxu1 %v5661_v61  ;;  %2408 = vmatmul.mubr.bf16.gmra.mrb[84].mxu0 %v5730_v33 }
 0x1f3   : > { %2246 = vmatprep.mubr.bf16.mxu1 %v5738_v36  ;;  %2415 = vmatprep.mubr.bf16.mxu0 %v5734_v32 }
 0x1fa   : > { %2247 = vmatmul.mubr.bf16.gmra.mrb[48].mxu1 %v5698_v35  ;;  %2416 = vmatmul.mubr.bf16.gmra.mrb[88].mxu0 %v5751_v53 }
 0x1fb   : > { %2254 = vmatprep.mubr.bf16.mxu1 %v5762_v17  ;;  %2423 = vmatprep.mubr.bf16.mxu0 %v5755_v40 }
 0x202   : > { %2255 = vmatmul.mubr.bf16.gmra.mrb[52].mxu1 %v5713_v9  ;;  %2424 = vmatmul.mubr.bf16.gmra.mrb[92].mxu0 %v5773_v20 }
 0x203   : > { %2262 = vmatprep.mubr.bf16.mxu1 %v5778_v42  ;;  %2431 = vmatprep.mubr.bf16.mxu0 %v5783_v43 }
 0x20a   : > { %2263 = vmatmul.mubr.bf16.gmra.mrb[56].mxu1 %v5734_v32  ;;  %2432 = vmatmul.mubr.bf16.gmra.mrb[96].mxu0 %v5789_v28 }
 0x20b   : > { %2270 = vmatprep.mubr.bf16.mxu1 %v5793_v3  ;;  %2633 = vmatprep.mubr.bf16.mxu0 %v5330_v25 }
 0x212   : > { %2271 = vmatmul.mubr.bf16.gmra.mrb[60].mxu1 %v5755_v40  ;;  %2634 = vmatmul.mubr.bf16.vlgmr.msra.gmra.mrb[100].mxu0 %v5265_v24  ;;  %v4625_v24 = vld [vmem:[#allocation7 + $0x220] sm:$0xff]  }
 0x213   : > { %2472 = vmatprep.mubr.bf16.mxu1 %v5277_v26  ;;  %4318 = vmatpush3.bf16.msra.mxu0 %v5415_v51  ;;  %v4626_v26 = vld [vmem:[#allocation7 + $0x228] sm:$0xff]  }
 0x214   : > { %2641 = vmatprep.mubr.bf16.mxu0 %v5390_v21  ;;  %4319 = vmatprep.subr.bf16.mxu0 %v4622_v13 }
 0x217   : > { %4320 = vmatpush3.bf16.msra.mxu0 %v4622_v13 }
 0x218   : > { %4321 = vmatprep.subr.bf16.mxu0 %v4623_v47 }
 0x21a   : > { %2473 = vmatmul.mubr.bf16.vlgmr.msra.gmra.mrb[64].mxu1 %v5289_v1  ;;  %2642 = vmatmul.mubr.bf16.gmra.mrb[104].mxu0 %v5281_v8  ;;  %v4627_v8 = vld [vmem:[#allocation7 + $0x230] sm:$0xff]   ;;  %v4628_v1 = vld [vmem:[#allocation7 + $0x238] sm:$0xff]  }
 0x21b   : > { %2480 = vmatprep.mubr.bf16.mxu1 %v5321_v19  ;;  %2649 = vmatprep.mubr.bf16.mxu0 %v5442_v7 }
 0x21c   : > { %4421 = vmatpush3.bf16.msra.mxu1 %v5415_v51  ;;  %4322 = vmatpush3.bf16.msra.mxu0 %v4623_v47  ;;  %v1110_v51 = vshrl.u32 %v5673_v49, 16 }
 0x21d   : > { %4414 = vmatprep.subr.bf16.mxu1 %v4622_v13  ;;  %4323 = vmatprep.subr.bf16.mxu0 %v4624_v54 }
 0x220   : > { %4422 = vmatpush3.bf16.msra.mxu1 %v4622_v13  ;;  %4324 = vmatpush3.bf16.msra.mxu0 %v4624_v54 }
 0x221   : > { %4415 = vmatprep.subr.bf16.mxu1 %v4623_v47  ;;  %4325 = vmatprep.subr.bf16.mxu0 %v4625_v24 }
 0x222   : > { %2481 = vmatmul.mubr.bf16.gmra.mrb[68].mxu1 %v5330_v25  ;;  %2650 = vmatmul.mubr.bf16.gmra.mrb[108].mxu0 %v5337_v14 }
 0x223   : > { %2488 = vmatprep.mubr.bf16.mxu1 %v5379_v6  ;;  %2657 = vmatprep.mubr.bf16.mxu0 %v5496_v22 }
 0x224   : > { %4423 = vmatpush3.bf16.msra.mxu1 %v4623_v47  ;;  %4326 = vmatpush3.bf16.msra.mxu0 %v4625_v24 }
 0x225   : > { %4416 = vmatprep.subr.bf16.mxu1 %v4624_v54  ;;  %4327 = vmatprep.subr.bf16.mxu0 %v4626_v26 }
 0x228   : > { %4424 = vmatpush3.bf16.msra.mxu1 %v4624_v54  ;;  %4328 = vmatpush3.bf16.msra.mxu0 %v4626_v26 }
 0x229   : > { %4417 = vmatprep.subr.bf16.mxu1 %v4625_v24  ;;  %4329 = vmatprep.subr.bf16.mxu0 %v4627_v8 }
 0x22a   : > { %2489 = vmatmul.mubr.bf16.gmra.mrb[72].mxu1 %v5390_v21  ;;  %2658 = vmatmul.mubr.bf16.gmra.mrb[112].mxu0 %v5366_v57 }
 0x22b   : > { %2496 = vmatprep.mubr.bf16.mxu1 %v5434_v34  ;;  %2665 = vmatprep.mubr.bf16.mxu0 %v5550_v23 }
 0x22c   : > { %4425 = vmatpush3.bf16.msra.mxu1 %v4625_v24  ;;  %4330 = vmatpush3.bf16.msra.mxu0 %v4627_v8 }
 0x22d   : > { %4418 = vmatprep.subr.bf16.mxu1 %v4626_v26  ;;  %4331 = vmatprep.subr.bf16.mxu0 %v4628_v1 }
 0x230   : > { %4426 = vmatpush3.bf16.msra.mxu1 %v4626_v26  ;;  %4332 = vmatpush3.bf16.msra.mxu0 %v4628_v1 }
 0x231   : > { %4419 = vmatprep.subr.bf16.mxu1 %v4627_v8 }
 0x232   : > { %2497 = vmatmul.mubr.bf16.gmra.mrb[76].mxu1 %v5442_v7  ;;  %2666 = vmatmul.mubr.bf16.gmra.mrb[116].mxu0 %v5447_v59 }
 0x233   : > { %2504 = vmatprep.mubr.bf16.mxu1 %v5487_v58  ;;  %2673 = vmatprep.mubr.bf16.mxu0 %v5592_v15 }
 0x234   : > { %4427 = vmatpush3.bf16.msra.mxu1 %v4627_v8 }
 0x235   : > { %4420 = vmatprep.subr.bf16.mxu1 %v4628_v1 }
 0x238   : > { %4428 = vmatpush3.bf16.msra.mxu1 %v4628_v1 }
 0x23a   : > { %2505 = vmatmul.mubr.bf16.gmra.mrb[80].mxu1 %v5496_v22  ;;  %2674 = vmatmul.mubr.bf16.gmra.mrb[120].mxu0 %v5501_v30  ;;  %v1112_v22 = vrot.slane %v1110_v51, 7  ;;  %v1113_v30 = vshll.u32 %v5673_v49, 16 }
 0x23b   : > { %2512 = vmatprep.mubr.bf16.mxu1 %v5537_v4  ;;  %2681 = vmatprep.mubr.bf16.mxu0 %v5624_v10 }
 0x242   : > { %2513 = vmatmul.mubr.bf16.gmra.mrb[84].mxu1 %v5550_v23  ;;  %2682 = vmatmul.mubr.bf16.gmra.mrb[124].mxu0 %v5543_v31 }
 0x243   : > { %2520 = vmatprep.mubr.bf16.mxu1 %v5584_v16  ;;  %2689 = vmatprep.mubr.bf16.mxu0 %v5665_v63 }
 0x24a   : > { %2521 = vmatmul.mubr.bf16.gmra.mrb[88].mxu1 %v5592_v15  ;;  %2690 = vmatmul.mubr.bf16.gmra.mrb[128].mxu0 %v5576_v11  ;;  %v5853_v11 = vld [vmem:[%s6294_s4] ss:$0 sm:$0xff] }
 0x24b   : > { %2528 = vmatprep.mubr.bf16.mxu1 %v5615_v52  ;;  %2697 = vmatprep.mubr.bf16.mxu0 %v5693_v50 }
 0x252   : > { %2529 = vmatmul.mubr.bf16.gmra.mrb[92].mxu1 %v5624_v10  ;;  %2698 = vmatmul.mubr.bf16.gmra.mrb[132].mxu0 %v5629_v29  ;;  %v1500_v29 = vshll.u32 %v5783_v43, 16 }
 0x253   : > { %2536 = vmatprep.mubr.bf16.mxu1 %v5657_v44  ;;  %2705 = vmatprep.mubr.bf16.mxu0 %v5717_v41 }
 0x254   : > { %v1502_v45 = vrot.slane %v1500_v29, 1 }
 0x256   : > { %v1503_v13 = vor.u32 %v1502_v45, %v1498_v39 }
 0x25a   : > { %2537 = vmatmul.mubr.bf16.gmra.mrb[96].mxu1 %v5665_v63  ;;  %2706 = vmatmul.mubr.bf16.gmra.mrb[136].mxu0 %v5661_v61  ;;  %v1115_v61 = vor.u32 %v1113_v30, %v1112_v22 }
 0x25b   : > { %2544 = vmatprep.mubr.bf16.mxu1 %v5688_v27  ;;  %2713 = vmatprep.mubr.bf16.mxu0 %v5738_v36 }
 0x25c   : > { %v5868_v56 = vsel %vm5202_vm9, 0, %v1115_v61 }
 0x25d   : > { %v1519_v54 = vshll.u32 %v5868_v56, 16  ;;  %v1517_v30 = vshrl.u32 %v5868_v56, 16 }
 0x262   : > { %2545 = vmatmul.mubr.bf16.gmra.mrb[100].mxu1 %v5693_v50  ;;  %2714 = vmatmul.mubr.bf16.gmra.mrb[140].mxu0 %v5698_v35 }
 0x263   : > { %2552 = vmatprep.mubr.bf16.mxu1 %v5709_v37  ;;  %2721 = vmatprep.mubr.bf16.mxu0 %v5762_v17 }
 0x265   : > { %v3897_v25 = vpop.f32.mrb[36].mxu0 }
 0x266   : > { %v3898_v14 = vpop.f32.mrb[37].mxu0 }
 0x267   : > { %v3899_v57 = vadd.f32 %v3898_v14, %v3897_v25  ;;  %v3900_v21 = vpop.f32.mrb[38].mxu0  ;;  %v5880_v25 = vsel %vm5202_vm9, %v1112_v22, 0 }
 0x268   : > { %v3901_v7 = vpop.f32.mrb[39].mxu0  ;;  %v1524_v46 = vshll.u32 %v5880_v25, 16 }
 0x269   : > { %v3902_v59 = vadd.f32 %v3901_v7, %v3900_v21 }
 0x26a   : > { %2553 = vmatmul.mubr.bf16.gmra.mrb[104].mxu1 %v5717_v41  ;;  %2722 = vmatmul.mubr.bf16.gmra.mrb[144].mxu0 %v5713_v9  ;;  %v5859_v9 = vsel %vm5202_vm9, %v5758_v18, 0 }
 0x26b   : > { %2560 = vmatprep.mubr.bf16.mxu1 %v5730_v33  ;;  %2729 = vmatprep.mubr.bf16.mxu0 %v5778_v42  ;;  %v1505_v38 = vshll.u32 %v5859_v9, 16 }
 0x26d   : > { %v3785_v31 = vpop.f32.mrb[0].mxu1  ;;  %v3903_v23 = vpop.f32.mrb[40].mxu0  ;;  %v1507_v47 = vrot.slane %v1505_v38, 1 }
 0x26e   : > { %v3786_v15 = vpop.f32.mrb[1].mxu1  ;;  %v3904_v10 = vpop.f32.mrb[41].mxu0 }
 0x26f   : > { %v3787_v63 = vadd.f32 %v3786_v15, %v3785_v31  ;;  %v3788_v50 = vpop.f32.mrb[2].mxu1  ;;  %v3905_v35 = vadd.f32 %v3904_v10, %v3903_v23  ;;  %v3906_v49 = vpop.f32.mrb[42].mxu0  ;;  %v1521_v31 = vrot.slane %v1519_v54, 1 }
 0x270   : > { %v3789_v41 = vpop.f32.mrb[3].mxu1  ;;  %v3907_v12 = vpop.f32.mrb[43].mxu0 }
 0x271   : > { %v2153_v60 = vadd.f32 %v3787_v63, %v5853_v11  ;;  %v3790_v55 = vadd.f32 %v3789_v41, %v3788_v50  ;;  %v3908_v62 = vadd.f32 %v3907_v12, %v3906_v49  ;;  %v1522_v61 = vor.u32 %v1521_v31, %v1517_v30 }
 0x272   : > { %2561 = vmatmul.mubr.bf16.gmra.mrb[108].mxu1 %v5738_v36  ;;  %2730 = vmatmul.mubr.bf16.gmra.mrb[148].mxu0 %v5734_v32  ;;  %v1526_v63 = vrot.slane %v1524_v46, 1 }
 0x273   : > { %v2156_v18 = vadd.f32 %v3790_v55, %v5853_v11  ;;  %2568 = vmatprep.mubr.bf16.mxu1 %v5751_v53  ;;  %2737 = vmatprep.mubr.bf16.mxu0 %v5793_v3  ;;  %v5873_v2 = vadd.f32 %v3899_v57, %v2153_v60 }
 0x275   : > { %v3791_v36 = vpop.f32.mrb[4].mxu1  ;;  %v3909_v0 = vpop.f32.mrb[44].mxu0  ;;  %v5875_v32 = vadd.f32 %v3902_v59, %v2156_v18  ;;  %v5886_v59 = vsel %vm1191_vm11, %v1503_v13, %v1507_v47  ;;  %v1512_v47 = vrot.slane %v5783_v43, 1 }
 0x276   : > { %v3792_v48 = vpop.f32.mrb[5].mxu1  ;;  %v3910_v5 = vpop.f32.mrb[45].mxu0 }
 0x277   : > { %v3793_v24 = vadd.f32 %v3792_v48, %v3791_v36  ;;  %v3794_v26 = vpop.f32.mrb[6].mxu1  ;;  %v3911_v8 = vadd.f32 %v3910_v5, %v3909_v0  ;;  %v3912_v1 = vpop.f32.mrb[46].mxu0 }
 0x278   : > { %v3795_v14 = vpop.f32.mrb[7].mxu1  ;;  %v3913_v57 = vpop.f32.mrb[47].mxu0 }
 0x279   : > { %v2161_v21 = vadd.f32 %v3793_v24, %v5853_v11  ;;  %v3796_v51 = vadd.f32 %v3795_v14, %v3794_v26  ;;  %v3914_v7 = vadd.f32 %v3913_v57, %v3912_v1 }
 0x27a   : > { %2569 = vmatmul.mubr.bf16.gmra.mrb[112].mxu1 %v5762_v17  ;;  %2738 = vmatmul.mubr.bf16.gmra.mrb[152].mxu0 %v5755_v40 }
 0x27b   : > { %v2164_v22 = vadd.f32 %v3796_v51, %v5853_v11  ;;  %2576 = vmatprep.mubr.bf16.mxu1 %v5773_v20  ;;  %2745 = vmatprep.mubr.bf16.mxu0 %v5886_v59  ;;  %v5893_v23 = vadd.f32 %v3905_v35, %v2161_v21  ;;  %v1527_v35 = vsel %vm1191_vm11, %v1522_v61, %v1526_v63 }
 0x27d   : > { %v3797_v15 = vpop.f32.mrb[8].mxu1  ;;  %v3915_v17 = vpop.f32.mrb[48].mxu0  ;;  %v5895_v10 = vadd.f32 %v3908_v62, %v2164_v22 }
 0x27e   : > { %v3798_v40 = vpop.f32.mrb[9].mxu1  ;;  %v3916_v29 = vpop.f32.mrb[49].mxu0 }
 0x27f   : > { %v3799_v50 = vadd.f32 %v3798_v40, %v3797_v15  ;;  %v3800_v49 = vpop.f32.mrb[10].mxu1  ;;  %v3917_v41 = vadd.f32 %v3916_v29, %v3915_v17  ;;  %v3918_v12 = vpop.f32.mrb[50].mxu0 }
 0x280   : > { %v3801_v60 = vpop.f32.mrb[11].mxu1  ;;  %v3919_v55 = vpop.f32.mrb[51].mxu0 }
 0x281   : > { %v2169_v39 = vadd.f32 %v3799_v50, %v5853_v11  ;;  %v3802_v45 = vadd.f32 %v3801_v60, %v3800_v49  ;;  %v3920_v38 = vadd.f32 %v3919_v55, %v3918_v12 }
 0x282   : > { %2577 = vmatmul.mubr.bf16.gmra.mrb[116].mxu1 %v5778_v42  ;;  %2746 = vmatmul.mubr.bf16.gmra.mrb[156].mxu0 %v5783_v43  ;;  %v1513_v42 = vrot.slane %v5859_v9, 1 }
 0x283   : > { %v2172_v62 = vadd.f32 %v3802_v45, %v5853_v11  ;;  %2584 = vmatprep.mubr.bf16.mxu1 %v5789_v28  ;;  %2753 = vmatprep.mubr.bf16.mxu0 %v1527_v35  ;;  %v5903_v18 = vadd.f32 %v3911_v8, %v2169_v39 }
 0x285   : > { %v3803_v36 = vpop.f32.mrb[12].mxu1  ;;  %v3921_v0 = vpop.f32.mrb[52].mxu0  ;;  %v5905_v48 = vadd.f32 %v3914_v7, %v2172_v62  ;;  %v5912_v7 = vsel %vm1432_vm7, %v1512_v47, %v1513_v42 }
 0x286   : > { %v3804_v5 = vpop.f32.mrb[13].mxu1  ;;  %v3922_v13 = vpop.f32.mrb[53].mxu0 }
 0x287   : > { %v3805_v54 = vadd.f32 %v3804_v5, %v3803_v36  ;;  %v3806_v24 = vpop.f32.mrb[14].mxu1  ;;  %v3923_v26 = vadd.f32 %v3922_v13, %v3921_v0  ;;  %v3924_v1 = vpop.f32.mrb[54].mxu0 }
 0x288   : > { %v3807_v14 = vpop.f32.mrb[15].mxu1  ;;  %v3925_v57 = vpop.f32.mrb[55].mxu0 }
 0x289   : > { %v2177_v21 = vadd.f32 %v3805_v54, %v5853_v11  ;;  %v3808_v8 = vadd.f32 %v3807_v14, %v3806_v24  ;;  %v3926_v51 = vadd.f32 %v3925_v57, %v3924_v1 }
 0x28a   : > { %2585 = vmatmul.mubr.bf16.gmra.mrb[120].mxu1 %v5793_v3  ;;  %2754 = vmatmul.mubr.bf16.gmra.mrb[160].mxu0 %v5868_v56 }
 0x28b   : > { %v2180_v43 = vadd.f32 %v3808_v8, %v5853_v11  ;;  %2592 = vmatprep.mubr.bf16.mxu1 %v5912_v7  ;;  %4333 = vmatprep.mubr.bf16.mxu0 %v5321_v19  ;;  %v5918_v9 = vadd.f32 %v3917_v41, %v2177_v21 }
 0x28d   : > { %v3809_v30 = vpop.f32.mrb[16].mxu1  ;;  %v3927_v31 = vpop.f32.mrb[56].mxu0  ;;  %v5920_v46 = vadd.f32 %v3920_v38, %v2180_v43 }
 0x28e   : > { %v3810_v22 = vpop.f32.mrb[17].mxu1  ;;  %v3928_v15 = vpop.f32.mrb[57].mxu0 }
 0x28f   : > { %v3811_v3 = vadd.f32 %v3810_v22, %v3809_v30  ;;  %v3812_v17 = vpop.f32.mrb[18].mxu1  ;;  %v3929_v40 = vadd.f32 %v3928_v15, %v3927_v31  ;;  %v3930_v29 = vpop.f32.mrb[58].mxu0 }
 0x290   : > { %v3813_v61 = vpop.f32.mrb[19].mxu1  ;;  %v3931_v63 = vpop.f32.mrb[59].mxu0 }
 0x291   : > { %v2185_v50 = vadd.f32 %v3811_v3, %v5853_v11  ;;  %v3814_v49 = vadd.f32 %v3813_v61, %v3812_v17  ;;  %v3932_v12 = vadd.f32 %v3931_v63, %v3930_v29 }
 0x292   : > { %2593 = vmatmul.mubr.bf16.gmra.mrb[124].mxu1 %v5886_v59  ;;  %4334 = vmatmul.mubr.bf16.vlgmr.msra.gmra.mrb[164].mxu0 %v5379_v6 }
 0x293   : > { %v2188_v19 = vadd.f32 %v3814_v49, %v5853_v11  ;;  %4349 = vmatprep.mubr.bf16.mxu1 %v5688_v27  ;;  %4337 = vmatprep.mubr.bf16.mxu0 %v5434_v34  ;;  %v5928_v41 = vadd.f32 %v3923_v26, %v2185_v50 }
 0x295   : > { %v3815_v60 = vpop.f32.mrb[20].mxu1  ;;  %v3933_v55 = vpop.f32.mrb[60].mxu0  ;;  %v5930_v39 = vadd.f32 %v3926_v51, %v2188_v19 }
 0x296   : > { %v3816_v45 = vpop.f32.mrb[21].mxu1  ;;  %v3934_v38 = vpop.f32.mrb[61].mxu0 }
 0x297   : > { %v3817_v35 = vadd.f32 %v3816_v45, %v3815_v60  ;;  %v3818_v62 = vpop.f32.mrb[22].mxu1  ;;  %v3935_v36 = vadd.f32 %v3934_v38, %v3933_v55  ;;  %v3936_v59 = vpop.f32.mrb[62].mxu0  ;;  %v1531_v55 = vrot.slane %v5868_v56, 1  ;;  %v1532_v45 = vrot.slane %v5880_v25, 1 }
 0x298   : > { %v3819_v0 = vpop.f32.mrb[23].mxu1  ;;  %v3937_v6 = vpop.f32.mrb[63].mxu0 }
 0x299   : > { %v2193_v5 = vadd.f32 %v3817_v35, %v5853_v11  ;;  %v3820_v13 = vadd.f32 %v3819_v0, %v3818_v62  ;;  %v3938_v27 = vadd.f32 %v3937_v6, %v3936_v59 }
 0x29a   : > { %4350 = vmatmul.mubr.bf16.vlgmr.msra.gmra.mrb[128].mxu1 %v5709_v37  ;;  %4338 = vmatmul.mubr.bf16.gmra.mrb[168].mxu0 %v5487_v58 }
 0x29b   : > { %v2196_v34 = vadd.f32 %v3820_v13, %v5853_v11  ;;  %4353 = vmatprep.mubr.bf16.mxu1 %v5730_v33  ;;  %4341 = vmatprep.mubr.bf16.mxu0 %v5537_v4  ;;  %v5938_v47 = vadd.f32 %v3929_v40, %v2193_v5  ;;  %v1533_v13 = vsel %vm1432_vm7, %v1531_v55, %v1532_v45 }
 0x29d   : > { %v3821_v42 = vpop.f32.mrb[24].mxu1  ;;  %v3939_v54 = vpop.f32.mrb[64].mxu0  ;;  %v5940_v24 = vadd.f32 %v3932_v12, %v2196_v34 }
 0x29e   : > { %v3822_v26 = vpop.f32.mrb[25].mxu1  ;;  %v3940_v1 = vpop.f32.mrb[65].mxu0 }
 0x29f   : > { %v3823_v14 = vadd.f32 %v3822_v26, %v3821_v42  ;;  %v3824_v57 = vpop.f32.mrb[26].mxu1  ;;  %v3941_v21 = vadd.f32 %v3940_v1, %v3939_v54  ;;  %v3942_v37 = vpop.f32.mrb[66].mxu0 }
 0x2a0   : > { %v3825_v8 = vpop.f32.mrb[27].mxu1  ;;  %v3943_v58 = vpop.f32.mrb[67].mxu0 }
 0x2a1   : > { %v2201_v51 = vadd.f32 %v3823_v14, %v5853_v11  ;;  %v3826_v43 = vadd.f32 %v3825_v8, %v3824_v57  ;;  %v3944_v33 = vadd.f32 %v3943_v58, %v3942_v37 }
 0x2a2   : > { %4354 = vmatmul.mubr.bf16.gmra.mrb[132].mxu1 %v5751_v53  ;;  %4342 = vmatmul.mubr.bf16.gmra.mrb[172].mxu0 %v5584_v16 }
 0x2a3   : > { %v2204_v4 = vadd.f32 %v3826_v43, %v5853_v11  ;;  %4357 = vmatprep.mubr.bf16.mxu1 %v5773_v20  ;;  %4345 = vmatprep.mubr.bf16.mxu0 %v5615_v52  ;;  %v5948_v30 = vadd.f32 %v3935_v36, %v2201_v51 }
 0x2a5   : > { %v3827_v31 = vpop.f32.mrb[28].mxu1  ;;  %v3945_v22 = vpop.f32.mrb[68].mxu0  ;;  %v5950_v15 = vadd.f32 %v3938_v27, %v2204_v4 }
 0x2a6   : > { %v3828_v3 = vpop.f32.mrb[29].mxu1  ;;  %v3946_v17 = vpop.f32.mrb[69].mxu0 }
 0x2a7   : > { %v3829_v40 = vadd.f32 %v3828_v3, %v3827_v31  ;;  %v3830_v29 = vpop.f32.mrb[30].mxu1  ;;  %v3947_v61 = vadd.f32 %v3946_v17, %v3945_v22  ;;  %v3948_v53 = vpop.f32.mrb[70].mxu0 }
 0x2a8   : > { %v3831_v63 = vpop.f32.mrb[31].mxu1  ;;  %v3949_v16 = vpop.f32.mrb[71].mxu0 }
 0x2a9   : > { %v2209_v50 = vadd.f32 %v3829_v40, %v5853_v11  ;;  %v3832_v49 = vadd.f32 %v3831_v63, %v3830_v29  ;;  %v3950_v20 = vadd.f32 %v3949_v16, %v3948_v53 }
 0x2aa   : > { %4358 = vmatmul.mubr.bf16.gmra.mrb[136].mxu1 %v5789_v28  ;;  %4346 = vmatmul.mubr.bf16.gmra.mrb[176].mxu0 %v5657_v44 }
 0x2ab   : > { %v2212_v52 = vadd.f32 %v3832_v49, %v5853_v11  ;;  %4361 = vmatprep.mubr.bf16.mxu1 %v5912_v7  ;;  %v5957_v12 = vadd.f32 %v3941_v21, %v2209_v50 }
 0x2ad   : > { %v3833_v19 = vpop.f32.mrb[32].mxu1  ;;  %v3951_v60 = vpop.f32.mrb[72].mxu0  ;;  %v5961_v38 = vadd.f32 %v3944_v33, %v2212_v52 }
 0x2ae   : > { %v3834_v35 = vpop.f32.mrb[33].mxu1  ;;  %v3952_v62 = vpop.f32.mrb[73].mxu0 }
 0x2af   : > { %v3835_v36 = vadd.f32 %v3834_v35, %v3833_v19  ;;  %v3836_v28 = vpop.f32.mrb[34].mxu1  ;;  %v3953_v59 = vadd.f32 %v3952_v62, %v3951_v60  ;;  %v3954_v44 = vpop.f32.mrb[74].mxu0 }
 0x2b0   : > { %v3837_v0 = vpop.f32.mrb[35].mxu1  ;;  %v3955_v6 = vpop.f32.mrb[75].mxu0 }
 0x2b1   : > { %v2217_v7 = vadd.f32 %v3835_v36, %v5853_v11  ;;  %v3838_v5 = vadd.f32 %v3837_v0, %v3836_v28  ;;  %v3956_v27 = vadd.f32 %v3955_v6, %v3954_v44 }
 0x2b2   : > { %4362 = vmatmul.mubr.bf16.gmra.mrb[140].mxu1 %v1533_v13 }
 0x2b3   : > { %v2220_v56 = vadd.f32 %v3838_v5, %v5853_v11  ;;  %v5966_v25 = vadd.f32 %v3947_v61, %v2217_v7 }
 0x2b5   : > { %v3839_v34 = vpop.f32.mrb[36].mxu1  ;;  %v3957_v42 = vpop.f32.mrb[76].mxu0  ;;  %v5968_v54 = vadd.f32 %v3950_v20, %v2220_v56 }
 0x2b6   : > { %v3840_v26 = vpop.f32.mrb[37].mxu1  ;;  %v3958_v1 = vpop.f32.mrb[77].mxu0 }
 0x2b7   : > { %v3841_v14 = vadd.f32 %v3840_v26, %v3839_v34  ;;  %v3842_v57 = vpop.f32.mrb[38].mxu1  ;;  %v3959_v21 = vadd.f32 %v3958_v1, %v3957_v42  ;;  %v3960_v37 = vpop.f32.mrb[78].mxu0 }
 0x2b8   : > { %v3843_v8 = vpop.f32.mrb[39].mxu1  ;;  %v3961_v58 = vpop.f32.mrb[79].mxu0 }
 0x2b9   : > { %v2225_v51 = vadd.f32 %v3841_v14, %v5853_v11  ;;  %v3844_v43 = vadd.f32 %v3843_v8, %v3842_v57  ;;  %v3962_v33 = vadd.f32 %v3961_v58, %v3960_v37 }
 0x2bb   : > { %v2228_v4 = vadd.f32 %v3844_v43, %v5853_v11  ;;  %v5972_v31 = vadd.f32 %v3953_v59, %v2225_v51 }
 0x2bd   : > { %v3845_v22 = vpop.f32.mrb[40].mxu1  ;;  %v3963_v3 = vpop.f32.mrb[80].mxu0  ;;  %v5974_v17 = vadd.f32 %v3956_v27, %v2228_v4 }
 0x2be   : > { %v3846_v40 = vpop.f32.mrb[41].mxu1  ;;  %v3964_v29 = vpop.f32.mrb[81].mxu0 }
 0x2bf   : > { %v3847_v61 = vadd.f32 %v3846_v40, %v3845_v22  ;;  %v3848_v53 = vpop.f32.mrb[42].mxu1  ;;  %v3965_v63 = vadd.f32 %v3964_v29, %v3963_v3  ;;  %v3966_v16 = vpop.f32.mrb[82].mxu0 }
 0x2c0   : > { %v3849_v50 = vpop.f32.mrb[43].mxu1  ;;  %v3967_v49 = vpop.f32.mrb[83].mxu0 }
 0x2c1   : > { %v2233_v20 = vadd.f32 %v3847_v61, %v5853_v11  ;;  %v3850_v52 = vadd.f32 %v3849_v50, %v3848_v53  ;;  %v3968_v19 = vadd.f32 %v3967_v49, %v3966_v16  ;;  %v4629_v61 = vld [vmem:[#allocation8] sm:$0xff]  }
 0x2c2   : > { %4365 = vmatprep.subr.bf16.mxu1 %v4629_v61 }
 0x2c3   : > { %v2236_v60 = vadd.f32 %v3850_v52, %v5853_v11  ;;  %v5978_v55 = vadd.f32 %v3959_v21, %v2233_v20  ;;  %4366 = vmatpush3.bf16.msra.mxu1 %v4629_v61 }
 0x2c5   : > { %v3851_v45 = vpop.f32.mrb[44].mxu1  ;;  %v3969_v35 = vpop.f32.mrb[84].mxu0  ;;  %v5980_v62 = vadd.f32 %v3962_v33, %v2236_v60 }
 0x2c6   : > { %v3852_v36 = vpop.f32.mrb[45].mxu1  ;;  %v3970_v28 = vpop.f32.mrb[85].mxu0 }
 0x2c7   : > { %v3853_v59 = vadd.f32 %v3852_v36, %v3851_v45  ;;  %v3854_v44 = vpop.f32.mrb[46].mxu1  ;;  %v3971_v0 = vadd.f32 %v3970_v28, %v3969_v35  ;;  %v3972_v6 = vpop.f32.mrb[86].mxu0 }
 0x2c8   : > { %v3855_v7 = vpop.f32.mrb[47].mxu1  ;;  %v3973_v5 = vpop.f32.mrb[87].mxu0 }
 0x2c9   : > { %v2241_v13 = vadd.f32 %v3853_v59, %v5853_v11  ;;  %v3856_v27 = vadd.f32 %v3855_v7, %v3854_v44  ;;  %v3974_v56 = vadd.f32 %v3973_v5, %v3972_v6  ;;  %v4630_v44 = vld [vmem:[#allocation8 + $0x8] sm:$0xff]   ;;  %v4631_v7 = vld [vmem:[#allocation8 + $0x10] sm:$0xff]  }
 0x2ca   : > { %4367 = vmatprep.subr.bf16.mxu1 %v4630_v44 }
 0x2cb   : > { %v2244_v34 = vadd.f32 %v3856_v27, %v5853_v11  ;;  %v5984_v42 = vadd.f32 %v3965_v63, %v2241_v13  ;;  %4368 = vmatpush3.bf16.msra.mxu1 %v4630_v44  ;;  %v4634_v44 = vld [vmem:[#allocation8 + $0x28] sm:$0xff]  }
 0x2cc   : > { %4369 = vmatprep.subr.bf16.mxu1 %v4631_v7 }
 0x2cd   : > { %v3857_v26 = vpop.f32.mrb[48].mxu1  ;;  %v3975_v1 = vpop.f32.mrb[88].mxu0  ;;  %v5986_v14 = vadd.f32 %v3968_v19, %v2244_v34 }
 0x2ce   : > { %v3858_v57 = vpop.f32.mrb[49].mxu1  ;;  %v3976_v21 = vpop.f32.mrb[89].mxu0 }
 0x2cf   : > { %v3859_v37 = vadd.f32 %v3858_v57, %v3857_v26  ;;  %v3860_v8 = vpop.f32.mrb[50].mxu1  ;;  %v3977_v58 = vadd.f32 %v3976_v21, %v3975_v1  ;;  %v3978_v51 = vpop.f32.mrb[90].mxu0  ;;  %4370 = vmatpush3.bf16.msra.mxu1 %v4631_v7 }
 0x2d0   : > { %v3861_v43 = vpop.f32.mrb[51].mxu1  ;;  %v3979_v33 = vpop.f32.mrb[91].mxu0 }
 0x2d1   : > { %v2249_v4 = vadd.f32 %v3859_v37, %v5853_v11  ;;  %v3862_v22 = vadd.f32 %v3861_v43, %v3860_v8  ;;  %v3980_v3 = vadd.f32 %v3979_v33, %v3978_v51  ;;  %v4632_v33 = vld [vmem:[#allocation8 + $0x18] sm:$0xff]  }
 0x2d2   : > { %4371 = vmatprep.subr.bf16.mxu1 %v4632_v33 }
 0x2d3   : > { %v2252_v40 = vadd.f32 %v3862_v22, %v5853_v11  ;;  %v5990_v29 = vadd.f32 %v3971_v0, %v2249_v4  ;;  %4372 = vmatpush3.bf16.msra.mxu1 %v4632_v33 }
 0x2d5   : > { %v3863_v53 = vpop.f32.mrb[52].mxu1  ;;  %v3981_v63 = vpop.f32.mrb[92].mxu0  ;;  %v5992_v16 = vadd.f32 %v3974_v56, %v2252_v40 }
 0x2d6   : > { %v3864_v50 = vpop.f32.mrb[53].mxu1  ;;  %v3982_v49 = vpop.f32.mrb[93].mxu0 }
 0x2d7   : > { %v3865_v20 = vadd.f32 %v3864_v50, %v3863_v53  ;;  %v3866_v52 = vpop.f32.mrb[54].mxu1  ;;  %v3983_v19 = vadd.f32 %v3982_v49, %v3981_v63  ;;  %v3984_v60 = vpop.f32.mrb[94].mxu0 }
 0x2d8   : > { %v3867_v45 = vpop.f32.mrb[55].mxu1  ;;  %v3985_v35 = vpop.f32.mrb[95].mxu0 }
 0x2d9   : > { %v2257_v36 = vadd.f32 %v3865_v20, %v5853_v11  ;;  %v3868_v28 = vadd.f32 %v3867_v45, %v3866_v52  ;;  %v3986_v59 = vadd.f32 %v3985_v35, %v3984_v60 }
 0x2db   : > { %v2260_v0 = vadd.f32 %v3868_v28, %v5853_v11  ;;  %v5996_v6 = vadd.f32 %v3977_v58, %v2257_v36 }
 0x2dd   : > { %v3869_v5 = vpop.f32.mrb[56].mxu1  ;;  %v3987_v13 = vpop.f32.mrb[96].mxu0  ;;  %v5998_v27 = vadd.f32 %v3980_v3, %v2260_v0  ;;  %v4633_v3 = vld [vmem:[#allocation8 + $0x20] sm:$0xff]  }
 0x2de   : > { %v3870_v56 = vpop.f32.mrb[57].mxu1  ;;  %v3988_v34 = vpop.f32.mrb[97].mxu0  ;;  %4373 = vmatprep.subr.bf16.mxu1 %v4633_v3 }
 0x2df   : > { %v3871_v26 = vadd.f32 %v3870_v56, %v3869_v5  ;;  %v3872_v1 = vpop.f32.mrb[58].mxu1  ;;  %v3989_v57 = vadd.f32 %v3988_v34, %v3987_v13  ;;  %v3990_v21 = vpop.f32.mrb[98].mxu0  ;;  %4374 = vmatpush3.bf16.msra.mxu1 %v4633_v3 }
 0x2e0   : > { %v3873_v37 = vpop.f32.mrb[59].mxu1  ;;  %v3991_v8 = vpop.f32.mrb[99].mxu0  ;;  %4375 = vmatprep.subr.bf16.mxu1 %v4634_v44 }
 0x2e1   : > { %v2265_v58 = vadd.f32 %v3871_v26, %v5853_v11  ;;  %v3874_v51 = vadd.f32 %v3873_v37, %v3872_v1  ;;  %v3992_v43 = vadd.f32 %v3991_v8, %v3990_v21 }
 0x2e3   : > { %v2268_v4 = vadd.f32 %v3874_v51, %v5853_v11  ;;  %v6002_v22 = vadd.f32 %v3983_v19, %v2265_v58  ;;  %4376 = vmatpush3.bf16.msra.mxu1 %v4634_v44 }
 0x2e5   : > { %v3875_v40 = vpop.f32.mrb[60].mxu1  ;;  %v4121_v61 = vpop.f32.mrb[100].mxu0  ;;  %v6004_v53 = vadd.f32 %v3986_v59, %v2268_v4  ;;  %v4635_v59 = vld [vmem:[#allocation8 + $0x30] sm:$0xff]   ;;  %v4636_v4 = vld [vmem:[#allocation8 + $0x38] sm:$0xff]  }
 0x2e6   : > { %v3876_v63 = vpop.f32.mrb[61].mxu1  ;;  %v4122_v50 = vpop.f32.mrb[101].mxu0  ;;  %4377 = vmatprep.subr.bf16.mxu1 %v4635_v59 }
 0x2e7   : > { %v3877_v49 = vadd.f32 %v3876_v63, %v3875_v40  ;;  %v3878_v20 = vpop.f32.mrb[62].mxu1  ;;  %v4123_v52 = vadd.f32 %v4122_v50, %v4121_v61  ;;  %v4124_v60 = vpop.f32.mrb[102].mxu0  ;;  %4378 = vmatpush3.bf16.msra.mxu1 %v4635_v59 }
 0x2e8   : > { %v3879_v45 = vpop.f32.mrb[63].mxu1  ;;  %v4125_v35 = vpop.f32.mrb[103].mxu0  ;;  %4379 = vmatprep.subr.bf16.mxu1 %v4636_v4 }
 0x2e9   : > { %v2273_v19 = vadd.f32 %v3877_v49, %v5853_v11  ;;  %v3880_v36 = vadd.f32 %v3879_v45, %v3878_v20  ;;  %v4126_v28 = vadd.f32 %v4125_v35, %v4124_v60 }
 0x2eb   : > { %v2276_v0 = vadd.f32 %v3880_v36, %v5853_v11  ;;  %v6008_v7 = vadd.f32 %v3989_v57, %v2273_v19  ;;  %4380 = vmatpush3.bf16.msra.mxu1 %v4636_v4 }
 0x2ed   : > { %v4009_v5 = vpop.f32.mrb[64].mxu1  ;;  %v4127_v13 = vpop.f32.mrb[104].mxu0  ;;  %v6010_v56 = vadd.f32 %v3992_v43, %v2276_v0 }
 0x2ee   : > { %v4010_v34 = vpop.f32.mrb[65].mxu1  ;;  %v4128_v26 = vpop.f32.mrb[105].mxu0 }
 0x2ef   : > { %v4011_v1 = vadd.f32 %v4010_v34, %v4009_v5  ;;  %v4012_v21 = vpop.f32.mrb[66].mxu1  ;;  %v4129_v37 = vadd.f32 %v4128_v26, %v4127_v13  ;;  %v4130_v8 = vpop.f32.mrb[106].mxu0 }
 0x2f0   : > { %v4013_v58 = vpop.f32.mrb[67].mxu1  ;;  %v4131_v51 = vpop.f32.mrb[107].mxu0 }
 0x2f1   : > { %v2475_v11 = vadd.f32 %v4011_v1, %v5873_v2  ;;  %v4014_v57 = vadd.f32 %v4013_v58, %v4012_v21  ;;  %v4132_v33 = vadd.f32 %v4131_v51, %v4130_v8 }
 0x2f3   : > { %v2478_v3 = vadd.f32 %v4014_v57, %v5875_v32  ;;  %v6014_v40 = vadd.f32 %v4123_v52, %v2475_v11 }
 0x2f5   : > { %v4015_v43 = vpop.f32.mrb[68].mxu1  ;;  %v4133_v61 = vpop.f32.mrb[108].mxu0  ;;  %v6016_v63 = vadd.f32 %v4126_v28, %v2478_v3 }
 0x2f6   : > { %v4016_v50 = vpop.f32.mrb[69].mxu1  ;;  %v4134_v49 = vpop.f32.mrb[109].mxu0 }
 0x2f7   : > { %v4017_v20 = vadd.f32 %v4016_v50, %v4015_v43  ;;  %v4018_v60 = vpop.f32.mrb[70].mxu1  ;;  %v4135_v45 = vadd.f32 %v4134_v49, %v4133_v61  ;;  %v4136_v35 = vpop.f32.mrb[110].mxu0 }
 0x2f8   : > { %v4019_v2 = vpop.f32.mrb[71].mxu1  ;;  %v4137_v19 = vpop.f32.mrb[111].mxu0 }
 0x2f9   : > { %v2483_v36 = vadd.f32 %v4017_v20, %v5893_v23  ;;  %v4020_v44 = vadd.f32 %v4019_v2, %v4018_v60  ;;  %v4138_v32 = vadd.f32 %v4137_v19, %v4136_v35 }
 0x2fb   : > { %v2486_v52 = vadd.f32 %v4020_v44, %v5895_v10  ;;  %v6020_v0 = vadd.f32 %v4129_v37, %v2483_v36 }
 0x2fd   : > { %v4021_v59 = vpop.f32.mrb[72].mxu1  ;;  %v4139_v5 = vpop.f32.mrb[112].mxu0  ;;  %v6022_v28 = vadd.f32 %v4132_v33, %v2486_v52 }
 0x2fe   : > { %v4022_v13 = vpop.f32.mrb[73].mxu1  ;;  %v4140_v34 = vpop.f32.mrb[113].mxu0 }
 0x2ff   : > { %v4023_v26 = vadd.f32 %v4022_v13, %v4021_v59  ;;  %v4024_v1 = vpop.f32.mrb[74].mxu1  ;;  %v4141_v21 = vadd.f32 %v4140_v34, %v4139_v5  ;;  %v4142_v8 = vpop.f32.mrb[114].mxu0 }
 0x300   : > { %v4025_v58 = vpop.f32.mrb[75].mxu1  ;;  %v4143_v51 = vpop.f32.mrb[115].mxu0 }
 0x301   : > { %v2491_v23 = vadd.f32 %v4023_v26, %v5903_v18  ;;  %v4026_v11 = vadd.f32 %v4025_v58, %v4024_v1  ;;  %v4144_v57 = vadd.f32 %v4143_v51, %v4142_v8 }
 0x303   : > { %v2494_v10 = vadd.f32 %v4026_v11, %v5905_v48  ;;  %v6026_v37 = vadd.f32 %v4135_v45, %v2491_v23 }
 0x305   : > { %v4027_v4 = vpop.f32.mrb[76].mxu1  ;;  %v4145_v3 = vpop.f32.mrb[116].mxu0  ;;  %v6028_v33 = vadd.f32 %v4138_v32, %v2494_v10 }
 0x306   : > { %v4028_v43 = vpop.f32.mrb[77].mxu1  ;;  %v4146_v61 = vpop.f32.mrb[117].mxu0 }
 0x307   : > { %v4029_v50 = vadd.f32 %v4028_v43, %v4027_v4  ;;  %v4030_v49 = vpop.f32.mrb[78].mxu1  ;;  %v4147_v20 = vadd.f32 %v4146_v61, %v4145_v3  ;;  %v4148_v60 = vpop.f32.mrb[118].mxu0 }
 0x308   : > { %v4031_v35 = vpop.f32.mrb[79].mxu1  ;;  %v4149_v2 = vpop.f32.mrb[119].mxu0 }
 0x309   : > { %v2499_v18 = vadd.f32 %v4029_v50, %v5918_v9  ;;  %v4032_v19 = vadd.f32 %v4031_v35, %v4030_v49  ;;  %v4150_v36 = vadd.f32 %v4149_v2, %v4148_v60 }
 0x30b   : > { %v2502_v48 = vadd.f32 %v4032_v19, %v5920_v46  ;;  %v6032_v45 = vadd.f32 %v4141_v21, %v2499_v18 }
 0x30d   : > { %v4033_v44 = vpop.f32.mrb[80].mxu1  ;;  %v4151_v52 = vpop.f32.mrb[120].mxu0  ;;  %v6034_v32 = vadd.f32 %v4144_v57, %v2502_v48 }
 0x30e   : > { %v4034_v59 = vpop.f32.mrb[81].mxu1  ;;  %v4152_v5 = vpop.f32.mrb[121].mxu0 }
 0x30f   : > { %v4035_v13 = vadd.f32 %v4034_v59, %v4033_v44  ;;  %v4036_v34 = vpop.f32.mrb[82].mxu1  ;;  %v4153_v26 = vadd.f32 %v4152_v5, %v4151_v52  ;;  %v4154_v1 = vpop.f32.mrb[122].mxu0 }
 0x310   : > { %v4037_v8 = vpop.f32.mrb[83].mxu1  ;;  %v4155_v58 = vpop.f32.mrb[123].mxu0 }
 0x311   : > { %v2507_v9 = vadd.f32 %v4035_v13, %v5928_v41  ;;  %v4038_v51 = vadd.f32 %v4037_v8, %v4036_v34  ;;  %v4156_v23 = vadd.f32 %v4155_v58, %v4154_v1 }
 0x313   : > { %v2510_v46 = vadd.f32 %v4038_v51, %v5930_v39  ;;  %v6038_v21 = vadd.f32 %v4147_v20, %v2507_v9 }
 0x315   : > { %v4039_v11 = vpop.f32.mrb[84].mxu1  ;;  %v4157_v10 = vpop.f32.mrb[124].mxu0  ;;  %v6040_v57 = vadd.f32 %v4150_v36, %v2510_v46 }
 0x316   : > { %v4040_v4 = vpop.f32.mrb[85].mxu1  ;;  %v4158_v3 = vpop.f32.mrb[125].mxu0 }
 0x317   : > { %v4041_v43 = vadd.f32 %v4040_v4, %v4039_v11  ;;  %v4042_v61 = vpop.f32.mrb[86].mxu1  ;;  %v4159_v50 = vadd.f32 %v4158_v3, %v4157_v10  ;;  %v4160_v49 = vpop.f32.mrb[126].mxu0 }
 0x318   : > { %v4043_v60 = vpop.f32.mrb[87].mxu1  ;;  %v4161_v35 = vpop.f32.mrb[127].mxu0 }
 0x319   : > { %v2515_v41 = vadd.f32 %v4041_v43, %v5938_v47  ;;  %v4044_v2 = vadd.f32 %v4043_v60, %v4042_v61  ;;  %v4162_v18 = vadd.f32 %v4161_v35, %v4160_v49 }
 0x31b   : > { %v2518_v39 = vadd.f32 %v4044_v2, %v5940_v24  ;;  %v6044_v20 = vadd.f32 %v4153_v26, %v2515_v41 }
 0x31d   : > { %v4045_v19 = vpop.f32.mrb[88].mxu1  ;;  %v4163_v48 = vpop.f32.mrb[128].mxu0  ;;  %v6046_v36 = vadd.f32 %v4156_v23, %v2518_v39 }
 0x31e   : > { %v4046_v44 = vpop.f32.mrb[89].mxu1  ;;  %v4164_v52 = vpop.f32.mrb[129].mxu0 }
 0x31f   : > { %v4047_v59 = vadd.f32 %v4046_v44, %v4045_v19  ;;  %v4048_v5 = vpop.f32.mrb[90].mxu1  ;;  %v4165_v13 = vadd.f32 %v4164_v52, %v4163_v48  ;;  %v4166_v34 = vpop.f32.mrb[130].mxu0 }
 0x320   : > { %v4049_v1 = vpop.f32.mrb[91].mxu1  ;;  %v4167_v8 = vpop.f32.mrb[131].mxu0 }
 0x321   : > { %v2523_v47 = vadd.f32 %v4047_v59, %v5948_v30  ;;  %v4050_v58 = vadd.f32 %v4049_v1, %v4048_v5  ;;  %v4168_v9 = vadd.f32 %v4167_v8, %v4166_v34 }
 0x323   : > { %v2526_v24 = vadd.f32 %v4050_v58, %v5950_v15  ;;  %v6050_v26 = vadd.f32 %v4159_v50, %v2523_v47 }
 0x325   : > { %v4051_v51 = vpop.f32.mrb[92].mxu1  ;;  %v4169_v46 = vpop.f32.mrb[132].mxu0  ;;  %v6052_v23 = vadd.f32 %v4162_v18, %v2526_v24 }
 0x326   : > { %v4052_v11 = vpop.f32.mrb[93].mxu1  ;;  %v4170_v10 = vpop.f32.mrb[133].mxu0 }
 0x327   : > { %v4053_v4 = vadd.f32 %v4052_v11, %v4051_v51  ;;  %v4054_v3 = vpop.f32.mrb[94].mxu1  ;;  %v4171_v43 = vadd.f32 %v4170_v10, %v4169_v46  ;;  %v4172_v61 = vpop.f32.mrb[134].mxu0 }
 0x328   : > { %v4055_v49 = vpop.f32.mrb[95].mxu1  ;;  %v4173_v60 = vpop.f32.mrb[135].mxu0 }
 0x329   : > { %v2531_v30 = vadd.f32 %v4053_v4, %v5957_v12  ;;  %v4056_v35 = vadd.f32 %v4055_v49, %v4054_v3  ;;  %v4174_v41 = vadd.f32 %v4173_v60, %v4172_v61 }
 0x32b   : > { %v2534_v15 = vadd.f32 %v4056_v35, %v5961_v38  ;;  %v6056_v50 = vadd.f32 %v4165_v13, %v2531_v30 }
 0x32d   : > { %v4057_v2 = vpop.f32.mrb[96].mxu1  ;;  %v4175_v39 = vpop.f32.mrb[136].mxu0  ;;  %v6058_v18 = vadd.f32 %v4168_v9, %v2534_v15 }
 0x32e   : > { %v4058_v19 = vpop.f32.mrb[97].mxu1  ;;  %v4176_v48 = vpop.f32.mrb[137].mxu0 }
 0x32f   : > { %v4059_v44 = vadd.f32 %v4058_v19, %v4057_v2  ;;  %v4060_v52 = vpop.f32.mrb[98].mxu1  ;;  %v4177_v59 = vadd.f32 %v4176_v48, %v4175_v39  ;;  %v4178_v5 = vpop.f32.mrb[138].mxu0 }
 0x330   : > { %v4061_v34 = vpop.f32.mrb[99].mxu1  ;;  %v4179_v1 = vpop.f32.mrb[139].mxu0 }
 0x331   : > { %v2539_v12 = vadd.f32 %v4059_v44, %v5966_v25  ;;  %v4062_v8 = vadd.f32 %v4061_v34, %v4060_v52  ;;  %v4180_v47 = vadd.f32 %v4179_v1, %v4178_v5 }
 0x333   : > { %v2542_v38 = vadd.f32 %v4062_v8, %v5968_v54  ;;  %v6062_v13 = vadd.f32 %v4171_v43, %v2539_v12 }
 0x335   : > { %v4063_v58 = vpop.f32.mrb[100].mxu1  ;;  %v4181_v24 = vpop.f32.mrb[140].mxu0  ;;  %v6064_v9 = vadd.f32 %v4174_v41, %v2542_v38 }
 0x336   : > { %v4064_v51 = vpop.f32.mrb[101].mxu1  ;;  %v4182_v46 = vpop.f32.mrb[141].mxu0 }
 0x337   : > { %v4065_v11 = vadd.f32 %v4064_v51, %v4063_v58  ;;  %v4066_v10 = vpop.f32.mrb[102].mxu1  ;;  %v4183_v4 = vadd.f32 %v4182_v46, %v4181_v24  ;;  %v4184_v3 = vpop.f32.mrb[142].mxu0 }
 0x338   : > { %v4067_v61 = vpop.f32.mrb[103].mxu1  ;;  %v4185_v49 = vpop.f32.mrb[143].mxu0 }
 0x339   : > { %v2547_v25 = vadd.f32 %v4065_v11, %v5972_v31  ;;  %v4068_v60 = vadd.f32 %v4067_v61, %v4066_v10  ;;  %v4186_v30 = vadd.f32 %v4185_v49, %v4184_v3 }
 0x33b   : > { %v2550_v54 = vadd.f32 %v4068_v60, %v5974_v17  ;;  %v6068_v43 = vadd.f32 %v4177_v59, %v2547_v25 }
 0x33d   : > { %v4069_v35 = vpop.f32.mrb[104].mxu1  ;;  %v4187_v15 = vpop.f32.mrb[144].mxu0  ;;  %v6070_v41 = vadd.f32 %v4180_v47, %v2550_v54 }
 0x33e   : > { %v4070_v2 = vpop.f32.mrb[105].mxu1  ;;  %v4188_v39 = vpop.f32.mrb[145].mxu0 }
 0x33f   : > { %v4071_v19 = vadd.f32 %v4070_v2, %v4069_v35  ;;  %v4072_v48 = vpop.f32.mrb[106].mxu1  ;;  %v4189_v44 = vadd.f32 %v4188_v39, %v4187_v15  ;;  %v4190_v52 = vpop.f32.mrb[146].mxu0 }
 0x340   : > { %v4073_v5 = vpop.f32.mrb[107].mxu1  ;;  %v4191_v34 = vpop.f32.mrb[147].mxu0 }
 0x341   : > { %v2555_v31 = vadd.f32 %v4071_v19, %v5978_v55  ;;  %v4074_v1 = vadd.f32 %v4073_v5, %v4072_v48  ;;  %v4192_v12 = vadd.f32 %v4191_v34, %v4190_v52 }
 0x343   : > { %v2558_v17 = vadd.f32 %v4074_v1, %v5980_v62  ;;  %v6074_v59 = vadd.f32 %v4183_v4, %v2555_v31 }
 0x345   : > { %v4075_v8 = vpop.f32.mrb[108].mxu1  ;;  %v4193_v38 = vpop.f32.mrb[148].mxu0  ;;  %v6076_v47 = vadd.f32 %v4186_v30, %v2558_v17 }
 0x346   : > { %v4076_v58 = vpop.f32.mrb[109].mxu1  ;;  %v4194_v24 = vpop.f32.mrb[149].mxu0 }
 0x347   : > { %v4077_v51 = vadd.f32 %v4076_v58, %v4075_v8  ;;  %v4078_v46 = vpop.f32.mrb[110].mxu1  ;;  %v4195_v11 = vadd.f32 %v4194_v24, %v4193_v38  ;;  %v4196_v10 = vpop.f32.mrb[150].mxu0 }
 0x348   : > { %v4079_v3 = vpop.f32.mrb[111].mxu1  ;;  %v4197_v61 = vpop.f32.mrb[151].mxu0 }
 0x349   : > { %v2563_v55 = vadd.f32 %v4077_v51, %v5984_v42  ;;  %v4080_v49 = vadd.f32 %v4079_v3, %v4078_v46  ;;  %v4198_v25 = vadd.f32 %v4197_v61, %v4196_v10 }
 0x34b   : > { %v2566_v62 = vadd.f32 %v4080_v49, %v5986_v14  ;;  %v6080_v4 = vadd.f32 %v4189_v44, %v2563_v55 }
 0x34d   : > { %v4081_v60 = vpop.f32.mrb[112].mxu1  ;;  %v4199_v54 = vpop.f32.mrb[152].mxu0  ;;  %v6082_v30 = vadd.f32 %v4192_v12, %v2566_v62 }
 0x34e   : > { %v4082_v35 = vpop.f32.mrb[113].mxu1  ;;  %v4200_v15 = vpop.f32.mrb[153].mxu0 }
 0x34f   : > { %v4083_v2 = vadd.f32 %v4082_v35, %v4081_v60  ;;  %v4084_v39 = vpop.f32.mrb[114].mxu1  ;;  %v4201_v19 = vadd.f32 %v4200_v15, %v4199_v54  ;;  %v4202_v48 = vpop.f32.mrb[154].mxu0 }
 0x350   : > { %v4085_v52 = vpop.f32.mrb[115].mxu1  ;;  %v4203_v5 = vpop.f32.mrb[155].mxu0 }
 0x351   : > { %v2571_v42 = vadd.f32 %v4083_v2, %v5990_v29  ;;  %v4086_v34 = vadd.f32 %v4085_v52, %v4084_v39  ;;  %v4204_v31 = vadd.f32 %v4203_v5, %v4202_v48 }
 0x353   : > { %v2574_v14 = vadd.f32 %v4086_v34, %v5992_v16  ;;  %v6086_v44 = vadd.f32 %v4195_v11, %v2571_v42 }
 0x355   : > { %v4087_v1 = vpop.f32.mrb[116].mxu1  ;;  %v4205_v17 = vpop.f32.mrb[156].mxu0  ;;  %v6088_v12 = vadd.f32 %v4198_v25, %v2574_v14 }
 0x356   : > { %v4088_v8 = vpop.f32.mrb[117].mxu1  ;;  %v4206_v38 = vpop.f32.mrb[157].mxu0 }
 0x357   : > { %v4089_v58 = vadd.f32 %v4088_v8, %v4087_v1  ;;  %v4090_v24 = vpop.f32.mrb[118].mxu1  ;;  %v4207_v51 = vadd.f32 %v4206_v38, %v4205_v17  ;;  %v4208_v46 = vpop.f32.mrb[158].mxu0 }
 0x358   : > { %v4091_v10 = vpop.f32.mrb[119].mxu1  ;;  %v4209_v3 = vpop.f32.mrb[159].mxu0 }
 0x359   : > { %v2579_v29 = vadd.f32 %v4089_v58, %v5996_v6  ;;  %v4092_v61 = vadd.f32 %v4091_v10, %v4090_v24  ;;  %v4210_v55 = vadd.f32 %v4209_v3, %v4208_v46 }
 0x35b   : > { %v2582_v16 = vadd.f32 %v4092_v61, %v5998_v27  ;;  %v6092_v11 = vadd.f32 %v4201_v19, %v2579_v29 }
 0x35d   : > { %v4093_v49 = vpop.f32.mrb[120].mxu1  ;;  %v4211_v62 = vpop.f32.mrb[160].mxu0  ;;  %v6094_v25 = vadd.f32 %v4204_v31, %v2582_v16 }
 0x35e   : > { %v4094_v60 = vpop.f32.mrb[121].mxu1  ;;  %v4212_v54 = vpop.f32.mrb[161].mxu0 }
 0x35f   : > { %v4095_v35 = vadd.f32 %v4094_v60, %v4093_v49  ;;  %v4096_v15 = vpop.f32.mrb[122].mxu1  ;;  %v4213_v2 = vadd.f32 %v4212_v54, %v4211_v62  ;;  %v4214_v39 = vpop.f32.mrb[162].mxu0 }
 0x360   : > { %v4097_v48 = vpop.f32.mrb[123].mxu1  ;;  %v4215_v52 = vpop.f32.mrb[163].mxu0 }
 0x361   : > { %v2587_v6 = vadd.f32 %v4095_v35, %v6002_v22  ;;  %v4098_v5 = vadd.f32 %v4097_v48, %v4096_v15  ;;  %v4216_v42 = vadd.f32 %v4215_v52, %v4214_v39 }
 0x363   : > { %v2590_v27 = vadd.f32 %v4098_v5, %v6004_v53  ;;  %v6098_v19 = vadd.f32 %v4207_v51, %v2587_v6 }
 0x365   : > { %v4099_v34 = vpop.f32.mrb[124].mxu1  ;;  %v4335_v14 = vpop.f32.mrb[164].mxu0  ;;  %v6100_v31 = vadd.f32 %v4210_v55, %v2590_v27 }
 0x366   : > { %v4100_v1 = vpop.f32.mrb[125].mxu1  ;;  %v2805_v17 = vadd.f32 %v4335_v14, %v6020_v0  ;;  %v2796_v8 = vpop.f32.mrb[165].mxu0 }
 0x367   : > { %v4101_v38 = vadd.f32 %v4100_v1, %v4099_v34  ;;  %v4102_v58 = vpop.f32.mrb[126].mxu1  ;;  %v2797_v24 = vadd.f32 %v2796_v8, %v6014_v40  ;;  %v4336_v46 = vpop.f32.mrb[166].mxu0 }
 0x368   : > { %v4103_v22 = vpop.f32.mrb[127].mxu1  ;;  %v2808_v10 = vadd.f32 %v4336_v46, %v6022_v28  ;;  %v2799_v3 = vpop.f32.mrb[167].mxu0  ;;  %v2925_v61 = vmax.f32 %v2805_v17, 0.0 }
 0x369   : > { %v2595_v53 = vadd.f32 %v4101_v38, %v6008_v7  ;;  %v4104_v51 = vadd.f32 %v4103_v22, %v4102_v58  ;;  %v2800_v29 = vadd.f32 %v2799_v3, %v6016_v63  ;;  %v2923_v0 = vmax.f32 %v2797_v24, 0.0 }
 0x36a   : > { %v2926_v55 = vmax.f32 %v2808_v10, 0.0 }
 0x36b   : > { %v2598_v16 = vadd.f32 %v4104_v51, %v6010_v56  ;;  %v2924_v49 = vmax.f32 %v2800_v29, 0.0  ;;  %v6108_v62 = vadd.f32 %v4213_v2, %v2595_v53 }
 0x36c   : > { %v2956_v60 = vpack.c.bf16 %v2926_v55, %v2925_v61 }
 0x36d   : > { %v2955_v40 = vpack.c.bf16 %v2924_v49, %v2923_v0  ;;  %v4351_v54 = vpop.f32.mrb[128].mxu1  ;;  %v4339_v35 = vpop.f32.mrb[168].mxu0  ;;  %v6110_v15 = vadd.f32 %v4216_v42, %v2598_v16 }
 0x36e   : > { %v2869_v28 = vadd.f32 %v4351_v54, %v6068_v43  ;;  %v2860_v7 = vpop.f32.mrb[129].mxu1  ;;  %v2821_v39 = vadd.f32 %v4339_v35, %v6032_v45  ;;  %v2812_v63 = vpop.f32.mrb[169].mxu0 }
 0x36f   : > { %v2861_v48 = vadd.f32 %v2860_v7, %v6062_v13  ;;  %v4352_v52 = vpop.f32.mrb[130].mxu1  ;;  %v2813_v56 = vadd.f32 %v2812_v63, %v6026_v37  ;;  %v4340_v6 = vpop.f32.mrb[170].mxu0  ;;  %4381 = vmatprep.mubr.bf16.mxu1 %v2955_v40 }
 0x370   : > { %v2872_v2 = vadd.f32 %v4352_v52, %v6070_v41  ;;  %v2863_v5 = vpop.f32.mrb[131].mxu1  ;;  %v2824_v27 = vadd.f32 %v4340_v6, %v6034_v32  ;;  %v2815_v42 = vpop.f32.mrb[171].mxu0  ;;  %4382 = vmatmul.mubr.bf16.vlgmr.msra.gmra.mrb[144].mxu1 %v2956_v60  ;;  %v2941_v45 = vmax.f32 %v2869_v28, 0.0  ;;  %v2929_v1 = vmax.f32 %v2821_v39, 0.0 }
 0x371   : > { %v2864_v43 = vadd.f32 %v2863_v5, %v6064_v9  ;;  %v2816_v34 = vadd.f32 %v2815_v42, %v6028_v33  ;;  %v2939_v17 = vmax.f32 %v2861_v48, 0.0  ;;  %v2927_v37 = vmax.f32 %v2813_v56, 0.0 }
 0x372   : > { %v2942_v14 = vmax.f32 %v2872_v2, 0.0  ;;  %v2930_v13 = vmax.f32 %v2824_v27, 0.0 }
 0x373   : > { %v2940_v8 = vmax.f32 %v2864_v43, 0.0  ;;  %v2928_v38 = vmax.f32 %v2816_v34, 0.0 }
 0x374   : > { %v6120_v58 = vpack.c.bf16 %v2942_v14, %v2941_v45  ;;  %v2958_v41 = vpack.c.bf16 %v2930_v13, %v2929_v1 }
 0x375   : > { %v6122_v24 = vpack.c.bf16 %v2940_v8, %v2939_v17  ;;  %v2957_v32 = vpack.c.bf16 %v2928_v38, %v2927_v37  ;;  %v4355_v46 = vpop.f32.mrb[132].mxu1  ;;  %v4343_v22 = vpop.f32.mrb[172].mxu0 }
 0x376   : > { %v2885_v9 = vadd.f32 %v4355_v46, %v6080_v4  ;;  %v2876_v10 = vpop.f32.mrb[133].mxu1  ;;  %v2837_v33 = vadd.f32 %v4343_v22, %v6044_v20  ;;  %v2828_v3 = vpop.f32.mrb[173].mxu0 }
 0x377   : > { %v2877_v53 = vadd.f32 %v2876_v10, %v6074_v59  ;;  %v4356_v51 = vpop.f32.mrb[134].mxu1  ;;  %v2829_v29 = vadd.f32 %v2828_v3, %v6038_v21  ;;  %v4344_v61 = vpop.f32.mrb[174].mxu0  ;;  %4385 = vmatprep.mubr.bf16.mxu1 %v2957_v32 }
 0x378   : > { %v2888_v55 = vadd.f32 %v4356_v51, %v6082_v30  ;;  %v2879_v16 = vpop.f32.mrb[135].mxu1  ;;  %v2840_v0 = vadd.f32 %v4344_v61, %v6046_v36  ;;  %v2831_v49 = vpop.f32.mrb[175].mxu0  ;;  %4386 = vmatmul.mubr.bf16.gmra.mrb[148].mxu1 %v2958_v41  ;;  %v2945_v20 = vmax.f32 %v2885_v9, 0.0  ;;  %v2933_v54 = vmax.f32 %v2837_v33, 0.0 }
 0x379   : > { %v2880_v4 = vadd.f32 %v2879_v16, %v6076_v47  ;;  %v2832_v60 = vadd.f32 %v2831_v49, %v6040_v57  ;;  %v2943_v35 = vmax.f32 %v2877_v53, 0.0  ;;  %v2931_v21 = vmax.f32 %v2829_v29, 0.0 }
 0x37a   : > { %v2946_v40 = vmax.f32 %v2888_v55, 0.0  ;;  %v2934_v59 = vmax.f32 %v2840_v0, 0.0 }
 0x37b   : > { %v2944_v28 = vmax.f32 %v2880_v4, 0.0  ;;  %v2932_v7 = vmax.f32 %v2832_v60, 0.0 }
 0x37c   : > { %v2966_v39 = vpack.c.bf16 %v2946_v40, %v2945_v20  ;;  %v2960_v63 = vpack.c.bf16 %v2934_v59, %v2933_v54 }
 0x37d   : > { %v2965_v30 = vpack.c.bf16 %v2944_v28, %v2943_v35  ;;  %v2959_v48 = vpack.c.bf16 %v2932_v7, %v2931_v21  ;;  %v4359_v52 = vpop.f32.mrb[136].mxu1  ;;  %v4347_v36 = vpop.f32.mrb[176].mxu0  ;;  %v3730_v7 = vld [vmem:[%s5117_s19 + $0x20] sm:$0xff]  }
 0x37e   : > { %v2901_v56 = vadd.f32 %v4359_v52, %v6092_v11  ;;  %v2892_v6 = vpop.f32.mrb[137].mxu1  ;;  %v2853_v47 = vadd.f32 %v4347_v36, %v6056_v50  ;;  %v2844_v57 = vpop.f32.mrb[177].mxu0 }
 0x37f   : > { %v2893_v2 = vadd.f32 %v2892_v6, %v6086_v44  ;;  %v4360_v5 = vpop.f32.mrb[138].mxu1  ;;  %v2845_v27 = vadd.f32 %v2844_v57, %v6050_v26  ;;  %v4348_v42 = vpop.f32.mrb[178].mxu0  ;;  %4389 = vmatprep.mubr.bf16.mxu1 %v2959_v48 }
 0x380   : > { %v2904_v43 = vadd.f32 %v4360_v5, %v6094_v25  ;;  %v2895_v34 = vpop.f32.mrb[139].mxu1  ;;  %v2856_v45 = vadd.f32 %v4348_v42, %v6058_v18  ;;  %v2847_v14 = vpop.f32.mrb[179].mxu0  ;;  %4390 = vmatmul.mubr.bf16.gmra.mrb[152].mxu1 %v2960_v63  ;;  %v2949_v50 = vmax.f32 %v2901_v56, 0.0  ;;  %v2937_v17 = vmax.f32 %v2853_v47, 0.0 }
 0x381   : > { %v2896_v11 = vadd.f32 %v2895_v34, %v6088_v12  ;;  %v2848_v1 = vadd.f32 %v2847_v14, %v6052_v23  ;;  %v2947_v8 = vmax.f32 %v2893_v2, 0.0  ;;  %v2935_v26 = vmax.f32 %v2845_v27, 0.0 }
 0x382   : > { %v2950_v13 = vmax.f32 %v2904_v43, 0.0  ;;  %v2938_v44 = vmax.f32 %v2856_v45, 0.0  ;;  %v3677_v56 = vunpack.c.l.bf16 %v3730_v7  ;;  %v3678_v27 = vunpack.c.h.bf16 %v3730_v7 }
 0x383   : > { %v2948_v37 = vmax.f32 %v2896_v11, 0.0  ;;  %v2936_v38 = vmax.f32 %v2848_v1, 0.0 }
 0x384   : > { %v2968_v41 = vpack.c.bf16 %v2950_v13, %v2949_v50  ;;  %v2962_v32 = vpack.c.bf16 %v2938_v44, %v2937_v17  ;;  %v3732_v13 = vld [vmem:[%s5117_s19 + $0x30] sm:$0xff]  }
 0x385   : > { %v2967_v25 = vpack.c.bf16 %v2948_v37, %v2947_v8  ;;  %v2961_v46 = vpack.c.bf16 %v2936_v38, %v2935_v26  ;;  %v4363_v22 = vpop.f32.mrb[140].mxu1  ;;  %v3731_v8 = vld [vmem:[%s5117_s19 + $0x28] sm:$0xff]  }
 0x386   : > { %v2917_v18 = vadd.f32 %v4363_v22, %v6108_v62  ;;  %v2908_v9 = vpop.f32.mrb[141].mxu1 }
 0x387   : > { %v2909_v12 = vadd.f32 %v2908_v9, %v6098_v19  ;;  %v4364_v10 = vpop.f32.mrb[142].mxu1  ;;  %4393 = vmatprep.mubr.bf16.mxu1 %v2961_v46  ;;  %v3728_v19 = vld [vmem:[%s5117_s19 + $0x10] sm:$0xff]   ;;  %v3681_v46 = vunpack.c.l.bf16 %v3731_v8  ;;  %v3686_v9 = vunpack.c.h.bf16 %v3732_v13 }
 0x388   : > { %v2920_v23 = vadd.f32 %v4364_v10, %v6110_v15  ;;  %v2911_v33 = vpop.f32.mrb[143].mxu1  ;;  %4394 = vmatmul.mubr.bf16.gmra.mrb[156].mxu1 %v2962_v32  ;;  %v2953_v53 = vmax.f32 %v2917_v18, 0.0  ;;  %v6151_v15 = vld [vmem:[%s6296_s6] ss:$0 sm:$0xff]  ;;  %v3670_v4 = vunpack.c.h.bf16 %v3728_v19 }
 0x389   : > { %v2912_v3 = vadd.f32 %v2911_v33, %v6100_v31  ;;  %4397 = vmatprep.mubr.bf16.mxu1 %v6122_v24  ;;  %v2951_v29 = vmax.f32 %v2909_v12, 0.0  ;;  %v3727_v31 = vld [vmem:[%s5117_s19 + $0x8] sm:$0xff]   ;;  %v3669_v24 = vunpack.c.l.bf16 %v3728_v19  ;;  %v3733_v19 = vld [vmem:[%s5117_s19 + $0x38] sm:$0xff]  }
 0x38a   : > { %v2954_v51 = vmax.f32 %v2920_v23, 0.0  ;;  %v3665_v0 = vunpack.c.l.bf16 %v3727_v31  ;;  %v3666_v40 = vunpack.c.h.bf16 %v3727_v31  ;;  %v3682_v23 = vunpack.c.h.bf16 %v3731_v8  ;;  %v3738_v8 = vld [vmem:[%s5117_s19 + $0x60] sm:$0xff]  }
 0x38b   : > { %v2952_v61 = vmax.f32 %v2912_v3, 0.0 }
 0x38c   : > { %v2970_v62 = vpack.c.bf16 %v2954_v51, %v2953_v53 }
 0x38d   : > { %v2969_v55 = vpack.c.bf16 %v2952_v61, %v2951_v29  ;;  %v3734_v61 = vld [vmem:[%s5117_s19 + $0x40] sm:$0xff]  }
 0x390   : > { %4398 = vmatmul.mubr.bf16.gmra.mrb[160].mxu1 %v6120_v58 }
 0x391   : > { %4401 = vmatprep.mubr.bf16.mxu1 %v2965_v30  ;;  %v3729_v30 = vld [vmem:[%s5117_s19 + $0x18] sm:$0xff]  }
 0x392   : > { %v3673_v57 = vunpack.c.l.bf16 %v3729_v30  ;;  %v3674_v34 = vunpack.c.h.bf16 %v3729_v30  ;;  %v3736_v30 = vld [vmem:[%s5117_s19 + $0x50] sm:$0xff]  }
 0x398   : > { %4402 = vmatmul.mubr.bf16.gmra.mrb[164].mxu1 %v2966_v39 }
 0x399   : > { %4405 = vmatprep.mubr.bf16.mxu1 %v2967_v25 }
 0x3a0   : > { %4406 = vmatmul.mubr.bf16.gmra.mrb[168].mxu1 %v2968_v41  ;;  %v3685_v41 = vunpack.c.l.bf16 %v3732_v13 }
 0x3a1   : > { %4409 = vmatprep.mubr.bf16.mxu1 %v2969_v55 }
 0x3a8   : > { %4410 = vmatmul.mubr.bf16.gmra.mrb[172].mxu1 %v2970_v62 }
 0x443   : > { %v4383_v16 = vpop.f32.mrb[144].mxu1 }
 0x444   : > { %v3085_v58 = vadd.f32 %v4383_v16, %v6151_v15  ;;  %v3076_v49 = vpop.f32.mrb[145].mxu1 }
 0x445   : > { %v3077_v60 = vadd.f32 %v6151_v15, %v3076_v49  ;;  %v4384_v20 = vpop.f32.mrb[146].mxu1 }
 0x446   : > { %v3273_v54 = vadd.f32 %v3669_v24, %v3085_v58  ;;  %v3088_v59 = vadd.f32 %v4384_v20, %v6151_v15  ;;  %v3079_v35 = vpop.f32.mrb[147].mxu1 }
 0x447   : > { %v3271_v28 = vadd.f32 %v3665_v0, %v3077_v60  ;;  %v3080_v21 = vadd.f32 %v6151_v15, %v3079_v35  ;;  %v3693_v0 = vunpack.c.l.bf16 %v3734_v61  ;;  %v3690_v35 = vunpack.c.h.bf16 %v3733_v19 }
 0x448   : > { %v3305_v39 = vmax.f32 %v3273_v54, 0.0  ;;  %v3274_v63 = vadd.f32 %v3670_v4, %v3088_v59  ;;  %v3689_v4 = vunpack.c.l.bf16 %v3733_v19  ;;  %v3740_v19 = vld [vmem:[%s5117_s19 + $0x70] sm:$0xff]  }
 0x449   : > { %v3303_v48 = vmax.f32 %v3271_v28, 0.0  ;;  %v3272_v52 = vadd.f32 %v3666_v40, %v3080_v21  ;;  %v3694_v40 = vunpack.c.h.bf16 %v3734_v61 }
 0x44a   : > { %3337 = vst [vmem:[%s6160_s7 + $0x10] sm:$0xff] %v3305_v39  ;;  %v3306_v36 = vmax.f32 %v3274_v63, 0.0 }
 0x44b   : > { %3335 = vst [vmem:[%s6160_s7] sm:$0xff] %v3303_v48  ;;  %v3304_v6 = vmax.f32 %v3272_v52, 0.0  ;;  %v4387_v47 = vpop.f32.mrb[148].mxu1 }
 0x44c   : > { %3338 = vst [vmem:[%s6160_s7 + $0x18] sm:$0xff] %v3306_v36  ;;  %v3101_v2 = vadd.f32 %v4387_v47, %v6151_v15  ;;  %v3092_v5 = vpop.f32.mrb[149].mxu1  ;;  %v3735_v36 = vld [vmem:[%s5117_s19 + $0x48] sm:$0xff]  }
 0x44d   : > { %3336 = vst [vmem:[%s6160_s7 + $0x8] sm:$0xff] %v3304_v6  ;;  %v3093_v42 = vadd.f32 %v6151_v15, %v3092_v5  ;;  %v4388_v43 = vpop.f32.mrb[150].mxu1 }
 0x44e   : > { %v3277_v45 = vadd.f32 %v3677_v56, %v3101_v2  ;;  %v3104_v14 = vadd.f32 %v4388_v43, %v6151_v15  ;;  %v3095_v11 = vpop.f32.mrb[151].mxu1 }
 0x44f   : > { %v3275_v1 = vadd.f32 %v3673_v57, %v3093_v42  ;;  %v3096_v50 = vadd.f32 %v6151_v15, %v3095_v11  ;;  %v3701_v57 = vunpack.c.l.bf16 %v3736_v30  ;;  %v3698_v11 = vunpack.c.h.bf16 %v3735_v36 }
 0x450   : > { %v3309_v17 = vmax.f32 %v3277_v45, 0.0  ;;  %v3278_v44 = vadd.f32 %v3678_v27, %v3104_v14  ;;  %v3697_v27 = vunpack.c.l.bf16 %v3735_v36  ;;  %v3742_v36 = vld [vmem:[%s5117_s19 + $0x80] sm:$0xff]  }
 0x451   : > { %v3307_v37 = vmax.f32 %v3275_v1, 0.0  ;;  %v3276_v26 = vadd.f32 %v3674_v34, %v3096_v50  ;;  %v3702_v34 = vunpack.c.h.bf16 %v3736_v30 }
 0x452   : > { %3341 = vst [vmem:[%s6160_s7 + $0x30] sm:$0xff] %v3309_v17  ;;  %v3310_v38 = vmax.f32 %v3278_v44, 0.0 }
 0x453   : > { %3339 = vst [vmem:[%s6160_s7 + $0x20] sm:$0xff] %v3307_v37  ;;  %v3308_v32 = vmax.f32 %v3276_v26, 0.0  ;;  %v4391_v25 = vpop.f32.mrb[152].mxu1 }
 0x454   : > { %3342 = vst [vmem:[%s6160_s7 + $0x38] sm:$0xff] %v3310_v38  ;;  %v3117_v22 = vadd.f32 %v4391_v25, %v6151_v15  ;;  %v3108_v18 = vpop.f32.mrb[153].mxu1  ;;  %v3737_v38 = vld [vmem:[%s5117_s19 + $0x58] sm:$0xff]  }
 0x455   : > { %3340 = vst [vmem:[%s6160_s7 + $0x28] sm:$0xff] %v3308_v32  ;;  %v3109_v12 = vadd.f32 %v6151_v15, %v3108_v18  ;;  %v4392_v10 = vpop.f32.mrb[154].mxu1 }
 0x456   : > { %v3281_v33 = vadd.f32 %v3685_v41, %v3117_v22  ;;  %v3120_v3 = vadd.f32 %v4392_v10, %v6151_v15  ;;  %v3111_v53 = vpop.f32.mrb[155].mxu1 }
 0x457   : > { %v3279_v51 = vadd.f32 %v3681_v46, %v3109_v12  ;;  %v3112_v29 = vadd.f32 %v6151_v15, %v3111_v53  ;;  %v3709_v46 = vunpack.c.l.bf16 %v3738_v8  ;;  %v3706_v53 = vunpack.c.h.bf16 %v3737_v38 }
 0x458   : > { %v3313_v62 = vmax.f32 %v3281_v33, 0.0  ;;  %v3282_v55 = vadd.f32 %v3686_v9, %v3120_v3  ;;  %v3705_v9 = vunpack.c.l.bf16 %v3737_v38 }
 0x459   : > { %v3311_v31 = vmax.f32 %v3279_v51, 0.0  ;;  %v3280_v24 = vadd.f32 %v3682_v23, %v3112_v29  ;;  %v3710_v23 = vunpack.c.h.bf16 %v3738_v8 }
 0x45a   : > { %3345 = vst [vmem:[%s6160_s7 + $0x50] sm:$0xff] %v3313_v62  ;;  %v3314_v16 = vmax.f32 %v3282_v55, 0.0 }
 0x45b   : > { %3343 = vst [vmem:[%s6160_s7 + $0x40] sm:$0xff] %v3311_v31  ;;  %v3312_v58 = vmax.f32 %v3280_v24, 0.0  ;;  %v4395_v49 = vpop.f32.mrb[156].mxu1 }
 0x45c   : > { %3346 = vst [vmem:[%s6160_s7 + $0x58] sm:$0xff] %v3314_v16  ;;  %v3133_v60 = vadd.f32 %v4395_v49, %v6151_v15  ;;  %v3124_v20 = vpop.f32.mrb[157].mxu1  ;;  %v3739_v16 = vld [vmem:[%s5117_s19 + $0x68] sm:$0xff]  }
 0x45d   : > { %3344 = vst [vmem:[%s6160_s7 + $0x48] sm:$0xff] %v3312_v58  ;;  %v3125_v54 = vadd.f32 %v6151_v15, %v3124_v20  ;;  %v4396_v59 = vpop.f32.mrb[158].mxu1 }
 0x45e   : > { %v3285_v28 = vadd.f32 %v3693_v0, %v3133_v60  ;;  %v3136_v21 = vadd.f32 %v4396_v59, %v6151_v15  ;;  %v3127_v7 = vpop.f32.mrb[159].mxu1 }
 0x45f   : > { %v3283_v39 = vadd.f32 %v3689_v4, %v3125_v54  ;;  %v3128_v63 = vadd.f32 %v6151_v15, %v3127_v7  ;;  %v3717_v4 = vunpack.c.l.bf16 %v3740_v19  ;;  %v3714_v7 = vunpack.c.h.bf16 %v3739_v16 }
 0x460   : > { %v3317_v48 = vmax.f32 %v3285_v28, 0.0  ;;  %v3286_v52 = vadd.f32 %v3694_v40, %v3136_v21  ;;  %v3713_v40 = vunpack.c.l.bf16 %v3739_v16 }
 0x461   : > { %v3315_v56 = vmax.f32 %v3283_v39, 0.0  ;;  %v3284_v6 = vadd.f32 %v3690_v35, %v3128_v63  ;;  %v3718_v35 = vunpack.c.h.bf16 %v3740_v19 }
 0x462   : > { %3349 = vst [vmem:[%s6160_s7 + $0x70] sm:$0xff] %v3317_v48  ;;  %v3318_v47 = vmax.f32 %v3286_v52, 0.0 }
 0x463   : > { %3347 = vst [vmem:[%s6160_s7 + $0x60] sm:$0xff] %v3315_v56  ;;  %v3316_v2 = vmax.f32 %v3284_v6, 0.0  ;;  %v4399_v5 = vpop.f32.mrb[160].mxu1 }
 0x464   : > { %3350 = vst [vmem:[%s6160_s7 + $0x78] sm:$0xff] %v3318_v47  ;;  %v3149_v42 = vadd.f32 %v4399_v5, %v6151_v15  ;;  %v3140_v43 = vpop.f32.mrb[161].mxu1  ;;  %v3741_v47 = vld [vmem:[%s5117_s19 + $0x78] sm:$0xff]   ;;  %s3368_s19 = scalar_lea.sflag [#allocation4], %s5113_s14 }
 0x465   : > { %3348 = vst [vmem:[%s6160_s7 + $0x68] sm:$0xff] %v3316_v2  ;;  %v3141_v45 = vadd.f32 %v6151_v15, %v3140_v43  ;;  %v4400_v14 = vpop.f32.mrb[162].mxu1 }
 0x466   : > { %v3289_v1 = vadd.f32 %v3701_v57, %v3149_v42  ;;  %v3152_v50 = vadd.f32 %v4400_v14, %v6151_v15  ;;  %v3143_v13 = vpop.f32.mrb[163].mxu1 }
 0x467   : > { %v3287_v17 = vadd.f32 %v3697_v27, %v3141_v45  ;;  %v3144_v44 = vadd.f32 %v6151_v15, %v3143_v13  ;;  %v3725_v27 = vunpack.c.l.bf16 %v3742_v36  ;;  %v3722_v13 = vunpack.c.h.bf16 %v3741_v47 }
 0x468   : > { %v3321_v37 = vmax.f32 %v3289_v1, 0.0  ;;  %v3290_v26 = vadd.f32 %v3702_v34, %v3152_v50  ;;  %v3721_v34 = vunpack.c.l.bf16 %v3741_v47 }
 0x469   : > { %v3319_v41 = vmax.f32 %v3287_v17, 0.0  ;;  %v3288_v32 = vadd.f32 %v3698_v11, %v3144_v44  ;;  %v3726_v11 = vunpack.c.h.bf16 %v3742_v36 }
 0x46a   : > { %3353 = vst [vmem:[%s6160_s7 + $0x90] sm:$0xff] %v3321_v37  ;;  %v3322_v25 = vmax.f32 %v3290_v26, 0.0 }
 0x46b   : > { %3351 = vst [vmem:[%s6160_s7 + $0x80] sm:$0xff] %v3319_v41  ;;  %v3320_v22 = vmax.f32 %v3288_v32, 0.0  ;;  %v4403_v18 = vpop.f32.mrb[164].mxu1 }
 0x46c   : > { %3354 = vst [vmem:[%s6160_s7 + $0x98] sm:$0xff] %v3322_v25  ;;  %v3165_v12 = vadd.f32 %v4403_v18, %v6151_v15  ;;  %v3156_v10 = vpop.f32.mrb[165].mxu1 }
 0x46d   : > { %3352 = vst [vmem:[%s6160_s7 + $0x88] sm:$0xff] %v3320_v22  ;;  %v3157_v33 = vadd.f32 %v6151_v15, %v3156_v10  ;;  %v4404_v3 = vpop.f32.mrb[166].mxu1 }
 0x46e   : > { %v3293_v51 = vadd.f32 %v3709_v46, %v3165_v12  ;;  %v3168_v29 = vadd.f32 %v4404_v3, %v6151_v15  ;;  %v3159_v61 = vpop.f32.mrb[167].mxu1 }
 0x46f   : > { %v3291_v62 = vadd.f32 %v3705_v9, %v3157_v33  ;;  %v3160_v55 = vadd.f32 %v6151_v15, %v3159_v61 }
 0x470   : > { %v3325_v31 = vmax.f32 %v3293_v51, 0.0  ;;  %v3294_v24 = vadd.f32 %v3710_v23, %v3168_v29 }
 0x471   : > { %v3323_v0 = vmax.f32 %v3291_v62, 0.0  ;;  %v3292_v58 = vadd.f32 %v3706_v53, %v3160_v55 }
 0x472   : > { %3357 = vst [vmem:[%s6160_s7 + $0xb0] sm:$0xff] %v3325_v31  ;;  %v3326_v49 = vmax.f32 %v3294_v24, 0.0 }
 0x473   : > { %3355 = vst [vmem:[%s6160_s7 + $0xa0] sm:$0xff] %v3323_v0  ;;  %v3324_v60 = vmax.f32 %v3292_v58, 0.0  ;;  %v4407_v20 = vpop.f32.mrb[168].mxu1 }
 0x474   : > { %3358 = vst [vmem:[%s6160_s7 + $0xb8] sm:$0xff] %v3326_v49  ;;  %v3181_v54 = vadd.f32 %v4407_v20, %v6151_v15  ;;  %v3172_v59 = vpop.f32.mrb[169].mxu1 }
 0x475   : > { %3356 = vst [vmem:[%s6160_s7 + $0xa8] sm:$0xff] %v3324_v60  ;;  %v3173_v28 = vadd.f32 %v6151_v15, %v3172_v59  ;;  %v4408_v21 = vpop.f32.mrb[170].mxu1 }
 0x476   : > { %v3297_v39 = vadd.f32 %v3717_v4, %v3181_v54  ;;  %v3184_v63 = vadd.f32 %v4408_v21, %v6151_v15  ;;  %v3175_v30 = vpop.f32.mrb[171].mxu1 }
 0x477   : > { %v3295_v48 = vadd.f32 %v3713_v40, %v3173_v28  ;;  %v3176_v52 = vadd.f32 %v6151_v15, %v3175_v30 }
 0x478   : > { %v3329_v56 = vmax.f32 %v3297_v39, 0.0  ;;  %v3298_v6 = vadd.f32 %v3718_v35, %v3184_v63 }
 0x479   : > { %v3327_v57 = vmax.f32 %v3295_v48, 0.0  ;;  %v3296_v2 = vadd.f32 %v3714_v7, %v3176_v52 }
 0x47a   : > { %3361 = vst [vmem:[%s6160_s7 + $0xd0] sm:$0xff] %v3329_v56  ;;  %v3330_v5 = vmax.f32 %v3298_v6, 0.0 }
 0x47b   : > { %3359 = vst [vmem:[%s6160_s7 + $0xc0] sm:$0xff] %v3327_v57  ;;  %v3328_v42 = vmax.f32 %v3296_v2, 0.0  ;;  %v4411_v43 = vpop.f32.mrb[172].mxu1 }
 0x47c   : > { %3362 = vst [vmem:[%s6160_s7 + $0xd8] sm:$0xff] %v3330_v5  ;;  %v3197_v45 = vadd.f32 %v4411_v43, %v6151_v15  ;;  %v3188_v14 = vpop.f32.mrb[173].mxu1 }
 0x47d   : > { %3360 = vst [vmem:[%s6160_s7 + $0xc8] sm:$0xff] %v3328_v42  ;;  %v3189_v1 = vadd.f32 %v6151_v15, %v3188_v14  ;;  %v4412_v50 = vpop.f32.mrb[174].mxu1 }
 0x47e   : > { %v3301_v17 = vadd.f32 %v3725_v27, %v3197_v45  ;;  %v3200_v44 = vadd.f32 %v4412_v50, %v6151_v15  ;;  %v3191_v8 = vpop.f32.mrb[175].mxu1 }
 0x47f   : > { %v3299_v37 = vadd.f32 %v3721_v34, %v3189_v1  ;;  %v3192_v26 = vadd.f32 %v6151_v15, %v3191_v8 }
 0x480   : > { %v3333_v38 = vmax.f32 %v3301_v17, 0.0  ;;  %v3302_v41 = vadd.f32 %v3726_v11, %v3200_v44 }
 0x481   : > { %v3331_v32 = vmax.f32 %v3299_v37, 0.0  ;;  %v3300_v25 = vadd.f32 %v3722_v13, %v3192_v26 }
 0x482   : > { %3365 = vst [vmem:[%s6160_s7 + $0xf0] sm:$0xff] %v3333_v38  ;;  %v3334_v46 = vmax.f32 %v3302_v41, 0.0 }
 0x483   : > { %3363 = vst [vmem:[%s6160_s7 + $0xe0] sm:$0xff] %v3331_v32  ;;  %v3332_v15 = vmax.f32 %v3300_v25, 0.0 }
 0x484   : > { %3366 = vst [vmem:[%s6160_s7 + $0xf8] sm:$0xff] %v3334_v46 }
 0x485   : > { %3364 = vst [vmem:[%s6160_s7 + $0xe8] sm:$0xff] %v3332_v15 }
 0x486   : > { %4764 = shalt.err (!%p4761_p0)
}
 0x487   : > { %s4765_s8 = scalar_lea.hbm %s6236_s17, 4096  ;;  %s4769_s7 = scalar_lea.hbm %s6331_s30, 8192 }
 0x488   : > { %p4766_p4 = scmp.ne.s32.totalorder %s6236_s17, %s4765_s8  ;;  %p4770_p12 = scmp.lt.u32.totalorder %s6236_s17, %s6331_s30 }
 0x489   : > { %p4771_p1 = scmp.lt.u32.totalorder %s4769_s7, %s4765_s8  ;;  %p4773_p13 = scmp.lt.u32.totalorder %s4765_s8, %s6236_s17 }
 0x48a   : > { %p4767_p2 = pnand %p4766_p4, %p5054_p10 }
 0x48b   : > { %p4772_p11 = por %p4771_p1, %p4770_p12 }
 0x48c   : > { %p4768_p8 = pneg %p4767_p2 }
 0x48d   : > { %p4774_p6 = por %p4773_p13, %p4772_p11 }
 0x48f   : > { %p4775_p3 = pnand %p4774_p6, %p4768_p8 }
 0x491   : > { %4778 = shalt.err (!%p4775_p3)
}
 0x492   : > { %s4852_s22 = smov 128   ;;  %s4853_s12 = smov 8  }
 0x493   : > { %4446 = dma.vmem_to_hbm [thread:$0]  (%p5054_p10), %s6238_s15, 4096, %s6236_s17, %s3368_s19, %s4852_s22, %s4852_s22, %s4853_s12  }
 0x494 PF: > { %s6332_s9 = sld [smem:[#allocation15_spill]]  ;;  %s6333_s11 = sld [smem:[#allocation17_spill]] }
 0x495   : > { %p6335_p7 = scmp.ge.s32.totalorder %s4841_s29, 2 }
 0x49a   : > { %s3399_s13 = sand.u32 1, %s6332_s9   ;;  %p6334_p5 = scmp.ne.s32.totalorder %s6333_s11, 0 }
 0x49b   : > { %s3400_s23 = scalar_lea.sflag [#allocation4], %s3399_s13 }
 0x49c   : > { %p4463_p9 = pnand %p6335_p7, %p6334_p5 }
 0x49e   : > { %4816 = dma.done.wait (!%p4463_p9), %s3400_s23, 4096  }
 0x49f   : > { %4818 = vsyncadd (!%p4463_p9), %s3400_s23, 4294963200  ;;  %s25_s29 = sadd.s32 1, %s4841_s29   ;;  %s6336_s24 = smov %s4825_s25 }
 0x4a0   : > { %p22_p0 = scmp.ge.s32.totalorder %s25_s29, 4   ;;  %s6337_s25 = smov %s4829_s26 }
 0x4a1   : > { %s6338_s26 = smov %s5070_s10  ;;  %s6339_s27 = smov %s4837_s28 }
 0x4a2   : > { %s6340_s28 = smov %s6342_s16  ;;  %24 = sbr.rel (!%p22_p0) target bundleno = 10 (0xa), region = 107 }
 0x4a9   :  { %3405 = vsyncpa [#allocation3], 1 }
 0x4aa   :  { %3407 = vsyncpa [#allocation3 + $0x1], 1 }
 0x4ab   :  { %3408 = vsyncpa [#allocation6], 1 }
 0x4ac   :  { %3409 = vsyncpa [#allocation9], 1 }
 0x4ad   :  { %3410 = vsyncpa [#allocation4], 1 }
 0x4ae   :  { %3412 = vsyncpa [#allocation4 + $0x1], 1 }

</bundles_post_ra>
